<compile_context>
chip_gen: v5e
topology: v5e:2x2
jax: 0.10.0
libtpu: 0.0.40
codegen_flags: <defaults>
</compile_context>

<pallas_src>
import math
import jax
import jax.numpy as jnp
from jax.experimental import pallas as pl
from jax.experimental.pallas import tpu as pltpu

CLASS_NUM = 10
OLD_PRIOR = 0.95    # args.old_prior (TBR prior)
DOT = 0.95          # args.dot
BN_EPS = 1e-5       # nn.BatchNorm2d default eps
LANE = 128          # lane-pad channel/class dims to this width
NEG_BIG = -1e30     # finite mask value for padded classes inside the softmax


def _full_spec(shape):
    n = len(shape)
    return pl.BlockSpec(shape, lambda i, n=n: (0,) * n)


def _pad_last(a, size, value=0.0):
    pad = size - a.shape[-1]
    if pad <= 0:
        return a
    return jnp.pad(a, [(0, 0)] * (a.ndim - 1) + [(0, pad)],
                   constant_values=value)


# ----------------------------------------------------------------------------
# Fused kernel: conv3x3 -> TBR -> ReLU -> global avg pool -> fc -> DELTA head
# ----------------------------------------------------------------------------
def delta_fused_kernel(first_ref,            # SMEM (1,) int32
                       x_ref,                # (N, H+2, W+2, Cin)  zero-padded NHWC
                       wconv_ref,            # (9, Cin, CMID_P)
                       bconv_ref,            # (1, CMID_P)
                       rm_ref, rs_ref,       # (1, CMID_P) TBR running mean/std
                       gamma_ref, beta_ref,  # (1, CMID_P) BN affine (adapted params)
                       wfc_ref,              # (CMID_P, CP)
                       bfc_ref,              # (1, CP)
                       qhat_ref,             # (1, CP)  (padded entries = 1.0)
                       logits_ref,           # out (N, CP)
                       loss_ref,             # out (1, 1)
                       qhat_new_ref,         # out (1, CP)
                       nrm_ref, nrs_ref,     # out (1, CMID_P) new running stats
                       rm_use_ref, rs_use_ref):  # VMEM scratch (1, CMID_P)
    N, HP, WP, CIN = x_ref.shape
    H, W = HP - 2, WP - 2
    HW = H * W
    M = N * HW
    CMID_P = wconv_ref.shape[2]
    CP = wfc_ref.shape[1]

    # ---- 3x3 conv (pad=1): bias-initialized f32 accumulator + 9 shifted
    #      (M,Cin)x(Cin,Cmid) MXU matmuls (no im2col inflation) ----
    acc = jnp.broadcast_to(bconv_ref[...], (M, CMID_P)).astype(jnp.float32)
    for t in range(9):
        dh, dw = t // 3, t % 3
        xs = x_ref[:, dh:dh + H, dw:dw + W, :].reshape(M, CIN)
        acc = acc + jnp.dot(xs, wconv_ref[t],
                            preferred_element_type=jnp.float32)
    conv = acc                                                    # (M, CMID_P)

    # ---- TBR: one-pass stats over rows (== torch dims [0, 2, 3]) ----
    inv_m = 1.0 / M
    bm = jnp.sum(conv, axis=0, keepdims=True) * inv_m             # batch mean
    ex2 = jnp.sum(conv * conv, axis=0, keepdims=True) * inv_m     # E[x^2]
    var = jnp.maximum(ex2 - bm * bm, 0.0)                         # unbiased=False
    bs = jnp.sqrt(var + BN_EPS)                                   # batch std

    first = first_ref[0]

    @pl.when(first == 1)       # running stats uninitialized -> use batch stats
    def _():
        rm_use_ref[...] = bm
        rs_use_ref[...] = bs

    @pl.when(first != 1)
    def _():
        rm_use_ref[...] = rm_ref[...]
        rs_use_ref[...] = rs_ref[...]

    rm = rm_use_ref[...]
    rs = rs_use_ref[...]

    r = bs / rs
    d = (bm - rm) / rs
    y = ((conv - bm) / bs * r + d) * gamma_ref[...] + beta_ref[...]

    nrm_ref[...] = OLD_PRIOR * rm + (1.0 - OLD_PRIOR) * bm
    nrs_ref[...] = OLD_PRIOR * rs + (1.0 - OLD_PRIOR) * bs

    # ---- ReLU + global average pool (pooling matmul on the MXU) ----
    yr = jnp.maximum(y, 0.0)                                      # (M, CMID_P)
    row_id = jax.lax.broadcasted_iota(jnp.int32, (N, M), 0)
    col_id = jax.lax.broadcasted_iota(jnp.int32, (N, M), 1)
    lo = row_id * HW
    pool = jnp.where((col_id >= lo) & (col_id < lo + HW), 1.0 / HW, 0.0)
    feat = jnp.dot(pool, yr, preferred_element_type=jnp.float32)  # (N, CMID_P)

    # ---- fc classifier ----
    logits = jnp.dot(feat, wfc_ref[...],
                     preferred_element_type=jnp.float32) + bfc_ref[...]
    logits_ref[...] = logits                                      # (N, CP)

    # ---- DELTA head: softmax / entropy / ent_weight / qhat reweighting ----
    B = N
    col = jax.lax.broadcasted_iota(jnp.int32, (B, CP), 1)
    cls_mask = col < CLASS_NUM                    # mask out lane-padded classes
    lm = jnp.where(cls_mask, logits, NEG_BIG)

    mx = jnp.max(lm, axis=1, keepdims=True)
    z = lm - mx
    ez = jnp.where(cls_mask, jnp.exp(z), 0.0)
    denom = jnp.sum(ez, axis=1, keepdims=True)                    # >= 1
    inv_denom = pl.reciprocal(denom, approx=True)                 # EUP slot
    p = ez * inv_denom                                            # softmax

    # entropy = -sum(p * log p) = log(denom) - sum(ez * z) / denom
    entropys = jnp.log(denom) - jnp.sum(ez * z, axis=1,
                                        keepdims=True) * inv_denom  # (B, 1)

    # ent_w = True
    ent_weight = jnp.exp(math.log(CLASS_NUM) * 0.5 - entropys)
    use_idx = (ent_weight > 1.0).astype(jnp.float32)              # (B, 1)

    # pseudo labels = first argmax of the logits (== argmax of softmax)
    cand = jnp.where(lm == mx, col, CP)
    pls = jnp.min(cand, axis=1, keepdims=True)                    # (B, 1) int32
    onehot = (col == pls).astype(jnp.float32)                     # (B, CP)

    # dot reweighting
    qhat = qhat_ref[...]                                          # (1, CP)
    cmask1 = jax.lax.broadcasted_iota(jnp.int32, (1, CP), 1) < CLASS_NUM
    cw = jnp.where(cmask1, pl.reciprocal(qhat, approx=True), 0.0)
    cw = cw / jnp.sum(cw, keepdims=True)
    sample_weight = jnp.sum(onehot * cw, axis=1, keepdims=True)   # (B, 1)
    sample_weight = sample_weight / jnp.sum(sample_weight, keepdims=True) * B
    ent_weight = ent_weight * sample_weight

    # (entropys * ent_weight)[use_idx].mean()  (NaN when the filter is empty,
    # matching torch's mean over an empty tensor)
    num = jnp.sum(entropys * ent_weight * use_idx, keepdims=True)  # (1, 1)
    cnt = jnp.sum(use_idx, keepdims=True)                          # (1, 1)
    loss_ref[...] = num / cnt

    # qhat EMA update
    p_mean = jnp.sum(p, axis=0, keepdims=True) * (1.0 / B)
    qhat_new_ref[...] = DOT * qhat + (1.0 - DOT) * p_mean


# ----------------------------------------------------------------------------
# Wrapper: layout plumbing (NCHW->NHWC, spatial pad, lane-pad channels/classes)
# ----------------------------------------------------------------------------
@jax.jit
def delta_forward(x_nchw, w_conv, b_conv, gamma, beta, w_fc, b_fc,
                  running_mean, running_std, qhat, first_flag):
    N, Cin, H, W = x_nchw.shape
    Cmid = w_conv.shape[0]
    CMID_P = LANE
    CP = LANE

    # input: NCHW -> NHWC, zero-pad spatial dims for the 3x3 / pad=1 conv
    x = jnp.transpose(x_nchw, (0, 2, 3, 1))
    x = jnp.pad(x, ((0, 0), (1, 1), (1, 1), (0, 0)))

    # conv weight (Cmid, Cin, 3, 3) -> (9, Cin, Cmid), lane-pad Cmid
    wc = _pad_last(jnp.transpose(w_conv, (2, 3, 1, 0)).reshape(9, Cin, Cmid),
                   CMID_P, 0.0)
    bc = _pad_last(b_conv.reshape(1, Cmid), CMID_P, 0.0)
    g = _pad_last(gamma.reshape(1, Cmid), CMID_P, 1.0)
    b = _pad_last(beta.reshape(1, Cmid), CMID_P, 0.0)
    rm = _pad_last(running_mean.reshape(1, Cmid), CMID_P, 0.0)
    rs = _pad_last(running_std.reshape(1, Cmid), CMID_P, 1.0)   # avoid 1/0 on pads

    wf = jnp.pad(w_fc, ((0, CMID_P - Cmid), (0, CP - CLASS_NUM)))
    bf = _pad_last(b_fc.reshape(1, CLASS_NUM), CP, 0.0)
    qh = _pad_last(qhat.reshape(1, CLASS_NUM), CP, 1.0)         # avoid 1/0 on pads

    out_shapes = (
        jax.ShapeDtypeStruct((N, CP), jnp.float32),      # logits (lane-padded)
        jax.ShapeDtypeStruct((1, 1), jnp.float32),       # loss
        jax.ShapeDtypeStruct((1, CP), jnp.float32),      # new qhat (lane-padded)
        jax.ShapeDtypeStruct((1, CMID_P), jnp.float32),  # new running mean
        jax.ShapeDtypeStruct((1, CMID_P), jnp.float32),  # new running std
    )
    in_specs = [
        pl.BlockSpec(memory_space=pltpu.MemorySpace.SMEM),  # first flag (scalar)
        _full_spec(x.shape),
        _full_spec(wc.shape), _full_spec(bc.shape),
        _full_spec(rm.shape), _full_spec(rs.shape),
        _full_spec(g.shape), _full_spec(b.shape),
        _full_spec(wf.shape), _full_spec(bf.shape),
        _full_spec(qh.shape),
    ]
    out_specs = tuple(_full_spec(s.shape) for s in out_shapes)

    logits_p, loss, qhat_p, nrm_p, nrs_p = pl.pallas_call(
        delta_fused_kernel,
        out_shape=out_shapes,
        grid=(1,),
        in_specs=in_specs,
        out_specs=out_specs,
        scratch_shapes=[pltpu.VMEM((1, CMID_P), jnp.float32),
                        pltpu.VMEM((1, CMID_P), jnp.float32)],
        compiler_params=pltpu.CompilerParams(
            dimension_semantics=("arbitrary",)),
    )(first_flag, x, wc, bc, rm, rs, g, b, wf, bf, qh)

    return (logits_p[:, :CLASS_NUM], loss[0, 0],
            qhat_p[:, :CLASS_NUM],
            nrm_p[:, :Cmid], nrs_p[:, :Cmid])


if __name__ == "__main__":
    key = jax.random.PRNGKey(0)
    kx, kw1, kb1, kwf = jax.random.split(key, 4)

    N, Cin, H, W = 2, 4, 16, 16
    Cmid = 8

    # input (PyTorch NCHW convention)
    x = jax.random.normal(kx, (N, Cin, H, W), jnp.float32)

    # deterministic synthetic backbone params: Conv3x3 -> TBR(BN) -> ReLU ->
    # global avg pool -> Linear(Cmid, CLASS_NUM)
    w_conv = jax.random.normal(kw1, (Cmid, Cin, 3, 3), jnp.float32) * 0.1
    b_conv = jax.random.normal(kb1, (1, Cmid), jnp.float32) * 0.1
    gamma = jnp.ones((1, Cmid), jnp.float32)     # BN weight (adapted params)
    beta = jnp.zeros((1, Cmid), jnp.float32)     # BN bias  (adapted params)
    w_fc = jax.random.normal(kwf, (Cmid, CLASS_NUM), jnp.float32) * 0.1
    b_fc = jnp.zeros((1, CLASS_NUM), jnp.float32)

    # DELTA / TBR state
    qhat = jnp.full((1, CLASS_NUM), 1.0 / CLASS_NUM, jnp.float32)
    running_mean = jnp.zeros((1, Cmid), jnp.float32)  # ignored when first_flag=1
    running_std = jnp.ones((1, Cmid), jnp.float32)

    # step 1: TBR running stats uninitialized (first_flag = 1)
    logits, loss, qhat, running_mean, running_std = delta_forward(
        x, w_conv, b_conv, gamma, beta, w_fc, b_fc,
        running_mean, running_std, qhat, jnp.array([1], jnp.int32))

    # step 2: reuse updated state (first_flag = 0) to exercise the EMA branch
    logits2, loss2, qhat, running_mean, running_std = delta_forward(
        x, w_conv, b_conv, gamma, beta, w_fc, b_fc,
        running_mean, running_std, qhat, jnp.array([0], jnp.int32))

    # TODO(synk): loss.backward() + optimizer.step() on the BN affine params is
    # host-side autograd / optimizer-state machinery with no clean Pallas
    # equivalent; the kernel returns the loss and the updated TBR/qhat state.

    jax.block_until_ready((logits, loss, qhat, running_mean, running_std,
                           logits2, loss2))
    print("KERNEL_OK")
</pallas_src>

<mosaic_0001>
module attributes {stable_mosaic.version = 11 : i64} {
  func.func @delta_fused_kernel(%arg0: i32, %arg1: memref<1xi32, #tpu.memory_space<smem>>, %arg2: memref<2x18x18x4xf32, #tpu.memory_space<vmem>>, %arg3: memref<9x4x128xf32, #tpu.memory_space<vmem>>, %arg4: memref<1x128xf32, #tpu.memory_space<vmem>>, %arg5: memref<1x128xf32, #tpu.memory_space<vmem>>, %arg6: memref<1x128xf32, #tpu.memory_space<vmem>>, %arg7: memref<1x128xf32, #tpu.memory_space<vmem>>, %arg8: memref<1x128xf32, #tpu.memory_space<vmem>>, %arg9: memref<128x128xf32, #tpu.memory_space<vmem>>, %arg10: memref<1x128xf32, #tpu.memory_space<vmem>>, %arg11: memref<1x128xf32, #tpu.memory_space<vmem>>, %arg12: memref<2x128xf32, #tpu.memory_space<vmem>>, %arg13: memref<1x1xf32, #tpu.memory_space<vmem>>, %arg14: memref<1x128xf32, #tpu.memory_space<vmem>>, %arg15: memref<1x128xf32, #tpu.memory_space<vmem>>, %arg16: memref<1x128xf32, #tpu.memory_space<vmem>>, %arg17: memref<1x128xf32, #tpu.memory_space<vmem>>, %arg18: memref<1x128xf32, #tpu.memory_space<vmem>>) attributes {dimension_semantics = [#tpu.dimension_semantics<arbitrary>], iteration_bounds = array<i64: 1>, scalar_prefetch = 0 : i64, scratch_operands = 2 : i64, tpu.core_type = #tpu.core_type<tc>, window_params = [{transform_indices = @transform_0, window_bounds = array<i64: 1>}, {pipeline_mode = #tpu.pipeline_mode<synchronous>, transform_indices = @transform_1, window_bounds = array<i64: 2, 18, 18, 4>}, {pipeline_mode = #tpu.pipeline_mode<synchronous>, transform_indices = @transform_2, window_bounds = array<i64: 9, 4, 128>}, {pipeline_mode = #tpu.pipeline_mode<synchronous>, transform_indices = @transform_3, window_bounds = array<i64: 1, 128>}, {pipeline_mode = #tpu.pipeline_mode<synchronous>, transform_indices = @transform_4, window_bounds = array<i64: 1, 128>}, {pipeline_mode = #tpu.pipeline_mode<synchronous>, transform_indices = @transform_5, window_bounds = array<i64: 1, 128>}, {pipeline_mode = #tpu.pipeline_mode<synchronous>, transform_indices = @transform_6, window_bounds = array<i64: 1, 128>}, {pipeline_mode = #tpu.pipeline_mode<synchronous>, transform_indices = @transform_7, window_bounds = array<i64: 1, 128>}, {pipeline_mode = #tpu.pipeline_mode<synchronous>, transform_indices = @transform_8, window_bounds = array<i64: 128, 128>}, {pipeline_mode = #tpu.pipeline_mode<synchronous>, transform_indices = @transform_9, window_bounds = array<i64: 1, 128>}, {pipeline_mode = #tpu.pipeline_mode<synchronous>, transform_indices = @transform_10, window_bounds = array<i64: 1, 128>}, {pipeline_mode = #tpu.pipeline_mode<synchronous>, transform_indices = @transform_11, window_bounds = array<i64: 2, 128>}, {pipeline_mode = #tpu.pipeline_mode<synchronous>, transform_indices = @transform_12, window_bounds = array<i64: 1, 1>}, {pipeline_mode = #tpu.pipeline_mode<synchronous>, transform_indices = @transform_13, window_bounds = array<i64: 1, 128>}, {pipeline_mode = #tpu.pipeline_mode<synchronous>, transform_indices = @transform_14, window_bounds = array<i64: 1, 128>}, {pipeline_mode = #tpu.pipeline_mode<synchronous>, transform_indices = @transform_15, window_bounds = array<i64: 1, 128>}]} {
    %c0 = arith.constant 0 : index
    %c0_0 = arith.constant 0 : index
    %0 = vector.load %arg4[%c0, %c0_0] : memref<1x128xf32, #tpu.memory_space<vmem>>, vector<1x128xf32>
    %1 = vector.shape_cast %0 : vector<1x128xf32> to vector<1x128xf32>
    %2 = vector.broadcast %1 : vector<1x128xf32> to vector<512x128xf32>
    %c0_1 = arith.constant 0 : index
    %c0_2 = arith.constant 0 : index
    %c0_3 = arith.constant 0 : index
    %c0_4 = arith.constant 0 : index
    %3 = vector.load %arg2[%c0_1, %c0_2, %c0_3, %c0_4] : memref<2x18x18x4xf32, #tpu.memory_space<vmem>>, vector<2x16x16x4xf32>
    %4 = vector.shape_cast %3 : vector<2x16x16x4xf32> to vector<512x4xf32>
    %c0_5 = arith.constant 0 : index
    %c0_6 = arith.constant 0 : index
    %c0_7 = arith.constant 0 : index
    %5 = vector.load %arg3[%c0_5, %c0_6, %c0_7] : memref<9x4x128xf32, #tpu.memory_space<vmem>>, vector<1x4x128xf32>
    %6 = vector.shape_cast %5 : vector<1x4x128xf32> to vector<4x128xf32>
    %cst = arith.constant dense<0.000000e+00> : vector<512x128xf32>
    %7 = tpu.matmul %4, %6, %cst {dimension_numbers = #tpu.dot_dimension_numbers<[1], [0], [0], [1], [0, 0, 1, 1], [], []>} : vector<512x4xf32>, vector<4x128xf32>, vector<512x128xf32> -> vector<512x128xf32>
    %8 = arith.addf %2, %7 : vector<512x128xf32>
    %c0_8 = arith.constant 0 : index
    %c0_9 = arith.constant 0 : index
    %c1 = arith.constant 1 : index
    %c0_10 = arith.constant 0 : index
    %9 = vector.load %arg2[%c0_8, %c0_9, %c1, %c0_10] : memref<2x18x18x4xf32, #tpu.memory_space<vmem>>, vector<2x16x16x4xf32>
    %10 = vector.shape_cast %9 : vector<2x16x16x4xf32> to vector<512x4xf32>
    %c1_11 = arith.constant 1 : index
    %c0_12 = arith.constant 0 : index
    %c0_13 = arith.constant 0 : index
    %11 = vector.load %arg3[%c1_11, %c0_12, %c0_13] : memref<9x4x128xf32, #tpu.memory_space<vmem>>, vector<1x4x128xf32>
    %12 = vector.shape_cast %11 : vector<1x4x128xf32> to vector<4x128xf32>
    %cst_14 = arith.constant dense<0.000000e+00> : vector<512x128xf32>
    %13 = tpu.matmul %10, %12, %cst_14 {dimension_numbers = #tpu.dot_dimension_numbers<[1], [0], [0], [1], [0, 0, 1, 1], [], []>} : vector<512x4xf32>, vector<4x128xf32>, vector<512x128xf32> -> vector<512x128xf32>
    %14 = arith.addf %8, %13 : vector<512x128xf32>
    %c0_15 = arith.constant 0 : index
    %c0_16 = arith.constant 0 : index
    %c2 = arith.constant 2 : index
    %c0_17 = arith.constant 0 : index
    %15 = vector.load %arg2[%c0_15, %c0_16, %c2, %c0_17] : memref<2x18x18x4xf32, #tpu.memory_space<vmem>>, vector<2x16x16x4xf32>
    %16 = vector.shape_cast %15 : vector<2x16x16x4xf32> to vector<512x4xf32>
    %c2_18 = arith.constant 2 : index
    %c0_19 = arith.constant 0 : index
    %c0_20 = arith.constant 0 : index
    %17 = vector.load %arg3[%c2_18, %c0_19, %c0_20] : memref<9x4x128xf32, #tpu.memory_space<vmem>>, vector<1x4x128xf32>
    %18 = vector.shape_cast %17 : vector<1x4x128xf32> to vector<4x128xf32>
    %cst_21 = arith.constant dense<0.000000e+00> : vector<512x128xf32>
    %19 = tpu.matmul %16, %18, %cst_21 {dimension_numbers = #tpu.dot_dimension_numbers<[1], [0], [0], [1], [0, 0, 1, 1], [], []>} : vector<512x4xf32>, vector<4x128xf32>, vector<512x128xf32> -> vector<512x128xf32>
    %20 = arith.addf %14, %19 : vector<512x128xf32>
    %c0_22 = arith.constant 0 : index
    %c1_23 = arith.constant 1 : index
    %c0_24 = arith.constant 0 : index
    %c0_25 = arith.constant 0 : index
    %21 = vector.load %arg2[%c0_22, %c1_23, %c0_24, %c0_25] : memref<2x18x18x4xf32, #tpu.memory_space<vmem>>, vector<2x16x16x4xf32>
    %22 = vector.shape_cast %21 : vector<2x16x16x4xf32> to vector<512x4xf32>
    %c3 = arith.constant 3 : index
    %c0_26 = arith.constant 0 : index
    %c0_27 = arith.constant 0 : index
    %23 = vector.load %arg3[%c3, %c0_26, %c0_27] : memref<9x4x128xf32, #tpu.memory_space<vmem>>, vector<1x4x128xf32>
    %24 = vector.shape_cast %23 : vector<1x4x128xf32> to vector<4x128xf32>
    %cst_28 = arith.constant dense<0.000000e+00> : vector<512x128xf32>
    %25 = tpu.matmul %22, %24, %cst_28 {dimension_numbers = #tpu.dot_dimension_numbers<[1], [0], [0], [1], [0, 0, 1, 1], [], []>} : vector<512x4xf32>, vector<4x128xf32>, vector<512x128xf32> -> vector<512x128xf32>
    %26 = arith.addf %20, %25 : vector<512x128xf32>
    %c0_29 = arith.constant 0 : index
    %c1_30 = arith.constant 1 : index
    %c1_31 = arith.constant 1 : index
    %c0_32 = arith.constant 0 : index
    %27 = vector.load %arg2[%c0_29, %c1_30, %c1_31, %c0_32] : memref<2x18x18x4xf32, #tpu.memory_space<vmem>>, vector<2x16x16x4xf32>
    %28 = vector.shape_cast %27 : vector<2x16x16x4xf32> to vector<512x4xf32>
    %c4 = arith.constant 4 : index
    %c0_33 = arith.constant 0 : index
    %c0_34 = arith.constant 0 : index
    %29 = vector.load %arg3[%c4, %c0_33, %c0_34] : memref<9x4x128xf32, #tpu.memory_space<vmem>>, vector<1x4x128xf32>
    %30 = vector.shape_cast %29 : vector<1x4x128xf32> to vector<4x128xf32>
    %cst_35 = arith.constant dense<0.000000e+00> : vector<512x128xf32>
    %31 = tpu.matmul %28, %30, %cst_35 {dimension_numbers = #tpu.dot_dimension_numbers<[1], [0], [0], [1], [0, 0, 1, 1], [], []>} : vector<512x4xf32>, vector<4x128xf32>, vector<512x128xf32> -> vector<512x128xf32>
    %32 = arith.addf %26, %31 : vector<512x128xf32>
    %c0_36 = arith.constant 0 : index
    %c1_37 = arith.constant 1 : index
    %c2_38 = arith.constant 2 : index
    %c0_39 = arith.constant 0 : index
    %33 = vector.load %arg2[%c0_36, %c1_37, %c2_38, %c0_39] : memref<2x18x18x4xf32, #tpu.memory_space<vmem>>, vector<2x16x16x4xf32>
    %34 = vector.shape_cast %33 : vector<2x16x16x4xf32> to vector<512x4xf32>
    %c5 = arith.constant 5 : index
    %c0_40 = arith.constant 0 : index
    %c0_41 = arith.constant 0 : index
    %35 = vector.load %arg3[%c5, %c0_40, %c0_41] : memref<9x4x128xf32, #tpu.memory_space<vmem>>, vector<1x4x128xf32>
    %36 = vector.shape_cast %35 : vector<1x4x128xf32> to vector<4x128xf32>
    %cst_42 = arith.constant dense<0.000000e+00> : vector<512x128xf32>
    %37 = tpu.matmul %34, %36, %cst_42 {dimension_numbers = #tpu.dot_dimension_numbers<[1], [0], [0], [1], [0, 0, 1, 1], [], []>} : vector<512x4xf32>, vector<4x128xf32>, vector<512x128xf32> -> vector<512x128xf32>
    %38 = arith.addf %32, %37 : vector<512x128xf32>
    %c0_43 = arith.constant 0 : index
    %c2_44 = arith.constant 2 : index
    %c0_45 = arith.constant 0 : index
    %c0_46 = arith.constant 0 : index
    %39 = vector.load %arg2[%c0_43, %c2_44, %c0_45, %c0_46] : memref<2x18x18x4xf32, #tpu.memory_space<vmem>>, vector<2x16x16x4xf32>
    %40 = vector.shape_cast %39 : vector<2x16x16x4xf32> to vector<512x4xf32>
    %c6 = arith.constant 6 : index
    %c0_47 = arith.constant 0 : index
    %c0_48 = arith.constant 0 : index
    %41 = vector.load %arg3[%c6, %c0_47, %c0_48] : memref<9x4x128xf32, #tpu.memory_space<vmem>>, vector<1x4x128xf32>
    %42 = vector.shape_cast %41 : vector<1x4x128xf32> to vector<4x128xf32>
    %cst_49 = arith.constant dense<0.000000e+00> : vector<512x128xf32>
    %43 = tpu.matmul %40, %42, %cst_49 {dimension_numbers = #tpu.dot_dimension_numbers<[1], [0], [0], [1], [0, 0, 1, 1], [], []>} : vector<512x4xf32>, vector<4x128xf32>, vector<512x128xf32> -> vector<512x128xf32>
    %44 = arith.addf %38, %43 : vector<512x128xf32>
    %c0_50 = arith.constant 0 : index
    %c2_51 = arith.constant 2 : index
    %c1_52 = arith.constant 1 : index
    %c0_53 = arith.constant 0 : index
    %45 = vector.load %arg2[%c0_50, %c2_51, %c1_52, %c0_53] : memref<2x18x18x4xf32, #tpu.memory_space<vmem>>, vector<2x16x16x4xf32>
    %46 = vector.shape_cast %45 : vector<2x16x16x4xf32> to vector<512x4xf32>
    %c7 = arith.constant 7 : index
    %c0_54 = arith.constant 0 : index
    %c0_55 = arith.constant 0 : index
    %47 = vector.load %arg3[%c7, %c0_54, %c0_55] : memref<9x4x128xf32, #tpu.memory_space<vmem>>, vector<1x4x128xf32>
    %48 = vector.shape_cast %47 : vector<1x4x128xf32> to vector<4x128xf32>
    %cst_56 = arith.constant dense<0.000000e+00> : vector<512x128xf32>
    %49 = tpu.matmul %46, %48, %cst_56 {dimension_numbers = #tpu.dot_dimension_numbers<[1], [0], [0], [1], [0, 0, 1, 1], [], []>} : vector<512x4xf32>, vector<4x128xf32>, vector<512x128xf32> -> vector<512x128xf32>
    %50 = arith.addf %44, %49 : vector<512x128xf32>
    %c0_57 = arith.constant 0 : index
    %c2_58 = arith.constant 2 : index
    %c2_59 = arith.constant 2 : index
    %c0_60 = arith.constant 0 : index
    %51 = vector.load %arg2[%c0_57, %c2_58, %c2_59, %c0_60] : memref<2x18x18x4xf32, #tpu.memory_space<vmem>>, vector<2x16x16x4xf32>
    %52 = vector.shape_cast %51 : vector<2x16x16x4xf32> to vector<512x4xf32>
    %c8 = arith.constant 8 : index
    %c0_61 = arith.constant 0 : index
    %c0_62 = arith.constant 0 : index
    %53 = vector.load %arg3[%c8, %c0_61, %c0_62] : memref<9x4x128xf32, #tpu.memory_space<vmem>>, vector<1x4x128xf32>
    %54 = vector.shape_cast %53 : vector<1x4x128xf32> to vector<4x128xf32>
    %cst_63 = arith.constant dense<0.000000e+00> : vector<512x128xf32>
    %55 = tpu.matmul %52, %54, %cst_63 {dimension_numbers = #tpu.dot_dimension_numbers<[1], [0], [0], [1], [0, 0, 1, 1], [], []>} : vector<512x4xf32>, vector<4x128xf32>, vector<512x128xf32> -> vector<512x128xf32>
    %56 = arith.addf %50, %55 : vector<512x128xf32>
    %cst_64 = arith.constant dense<0.000000e+00> : vector<128xf32>
    %57 = vector.multi_reduction <add>, %56, %cst_64 [0] : vector<512x128xf32> to vector<128xf32>
    %58 = vector.shape_cast %57 : vector<128xf32> to vector<1x128xf32>
    %cst_65 = arith.constant 0.001953125 : f32
    %59 = vector.broadcast %cst_65 : f32 to vector<1x128xf32>
    %60 = arith.mulf %58, %59 : vector<1x128xf32>
    %61 = arith.mulf %56, %56 : vector<512x128xf32>
    %cst_66 = arith.constant dense<0.000000e+00> : vector<128xf32>
    %62 = vector.multi_reduction <add>, %61, %cst_66 [0] : vector<512x128xf32> to vector<128xf32>
    %63 = vector.shape_cast %62 : vector<128xf32> to vector<1x128xf32>
    %cst_67 = arith.constant 0.001953125 : f32
    %64 = vector.broadcast %cst_67 : f32 to vector<1x128xf32>
    %65 = arith.mulf %63, %64 : vector<1x128xf32>
    %66 = arith.mulf %60, %60 : vector<1x128xf32>
    %67 = arith.subf %65, %66 : vector<1x128xf32>
    %cst_68 = arith.constant 0.000000e+00 : f32
    %68 = vector.broadcast %cst_68 : f32 to vector<1x128xf32>
    %69 = arith.maximumf %67, %68 : vector<1x128xf32>
    %cst_69 = arith.constant 9.99999974E-6 : f32
    %70 = vector.broadcast %cst_69 : f32 to vector<1x128xf32>
    %71 = arith.addf %69, %70 : vector<1x128xf32>
    %72 = math.sqrt %71 : vector<1x128xf32>
    %c0_70 = arith.constant 0 : index
    %73 = memref.load %arg1[%c0_70] : memref<1xi32, #tpu.memory_space<smem>>
    %c1_i32 = arith.constant 1 : i32
    %74 = arith.cmpi eq, %73, %c1_i32 : i32
    %75 = arith.extui %74 : i1 to i32
    %c0_i32 = arith.constant 0 : i32
    %76 = arith.cmpi ne, %75, %c0_i32 : i32
    scf.if %76 {
      %c0_127 = arith.constant 0 : index
      %c0_128 = arith.constant 0 : index
      %224 = vector.load %arg17[%c0_127, %c0_128] : memref<1x128xf32, #tpu.memory_space<vmem>>, vector<1x128xf32>
      tpu.vector_store %arg17[%c0_127, %c0_128], %60 {strides = array<i32>} : memref<1x128xf32, #tpu.memory_space<vmem>>, vector<1x128xf32>,
      %c0_129 = arith.constant 0 : index
      %c0_130 = arith.constant 0 : index
      %225 = vector.load %arg18[%c0_129, %c0_130] : memref<1x128xf32, #tpu.memory_space<vmem>>, vector<1x128xf32>
      tpu.vector_store %arg18[%c0_129, %c0_130], %72 {strides = array<i32>} : memref<1x128xf32, #tpu.memory_space<vmem>>, vector<1x128xf32>,
    } else {
    }
    %c1_i32_71 = arith.constant 1 : i32
    %77 = arith.cmpi ne, %73, %c1_i32_71 : i32
    %78 = arith.extui %77 : i1 to i32
    %c0_i32_72 = arith.constant 0 : i32
    %79 = arith.cmpi ne, %78, %c0_i32_72 : i32
    scf.if %79 {
      %c0_127 = arith.constant 0 : index
      %c0_128 = arith.constant 0 : index
      %224 = vector.load %arg5[%c0_127, %c0_128] : memref<1x128xf32, #tpu.memory_space<vmem>>, vector<1x128xf32>
      %c0_129 = arith.constant 0 : index
      %c0_130 = arith.constant 0 : index
      %225 = vector.load %arg17[%c0_129, %c0_130] : memref<1x128xf32, #tpu.memory_space<vmem>>, vector<1x128xf32>
      tpu.vector_store %arg17[%c0_129, %c0_130], %224 {strides = array<i32>} : memref<1x128xf32, #tpu.memory_space<vmem>>, vector<1x128xf32>,
      %c0_131 = arith.constant 0 : index
      %c0_132 = arith.constant 0 : index
      %226 = vector.load %arg6[%c0_131, %c0_132] : memref<1x128xf32, #tpu.memory_space<vmem>>, vector<1x128xf32>
      %c0_133 = arith.constant 0 : index
      %c0_134 = arith.constant 0 : index
      %227 = vector.load %arg18[%c0_133, %c0_134] : memref<1x128xf32, #tpu.memory_space<vmem>>, vector<1x128xf32>
      tpu.vector_store %arg18[%c0_133, %c0_134], %226 {strides = array<i32>} : memref<1x128xf32, #tpu.memory_space<vmem>>, vector<1x128xf32>,
    } else {
    }
    %c0_73 = arith.constant 0 : index
    %c0_74 = arith.constant 0 : index
    %80 = vector.load %arg17[%c0_73, %c0_74] : memref<1x128xf32, #tpu.memory_space<vmem>>, vector<1x128xf32>
    %c0_75 = arith.constant 0 : index
    %c0_76 = arith.constant 0 : index
    %81 = vector.load %arg18[%c0_75, %c0_76] : memref<1x128xf32, #tpu.memory_space<vmem>>, vector<1x128xf32>
    %82 = arith.divf %72, %81 : vector<1x128xf32>
    %83 = arith.subf %60, %80 : vector<1x128xf32>
    %84 = arith.divf %83, %81 : vector<1x128xf32>
    %85 = vector.broadcast %60 : vector<1x128xf32> to vector<512x128xf32>
    %86 = arith.subf %56, %85 : vector<512x128xf32>
    %87 = vector.broadcast %72 : vector<1x128xf32> to vector<512x128xf32>
    %88 = arith.divf %86, %87 : vector<512x128xf32>
    %89 = vector.broadcast %82 : vector<1x128xf32> to vector<512x128xf32>
    %90 = arith.mulf %88, %89 : vector<512x128xf32>
    %91 = vector.broadcast %84 : vector<1x128xf32> to vector<512x128xf32>
    %92 = arith.addf %90, %91 : vector<512x128xf32>
    %c0_77 = arith.constant 0 : index
    %c0_78 = arith.constant 0 : index
    %93 = vector.load %arg7[%c0_77, %c0_78] : memref<1x128xf32, #tpu.memory_space<vmem>>, vector<1x128xf32>
    %94 = vector.broadcast %93 : vector<1x128xf32> to vector<512x128xf32>
    %95 = arith.mulf %92, %94 : vector<512x128xf32>
    %c0_79 = arith.constant 0 : index
    %c0_80 = arith.constant 0 : index
    %96 = vector.load %arg8[%c0_79, %c0_80] : memref<1x128xf32, #tpu.memory_space<vmem>>, vector<1x128xf32>
    %97 = vector.broadcast %96 : vector<1x128xf32> to vector<512x128xf32>
    %98 = arith.addf %95, %97 : vector<512x128xf32>
    %cst_81 = arith.constant 0.949999988 : f32
    %99 = vector.broadcast %cst_81 : f32 to vector<1x128xf32>
    %100 = arith.mulf %99, %80 : vector<1x128xf32>
    %cst_82 = arith.constant 5.000000e-02 : f32
    %101 = vector.broadcast %cst_82 : f32 to vector<1x128xf32>
    %102 = arith.mulf %101, %60 : vector<1x128xf32>
    %103 = arith.addf %100, %102 : vector<1x128xf32>
    %c0_83 = arith.constant 0 : index
    %c0_84 = arith.constant 0 : index
    %104 = vector.load %arg15[%c0_83, %c0_84] : memref<1x128xf32, #tpu.memory_space<vmem>>, vector<1x128xf32>
    tpu.vector_store %arg15[%c0_83, %c0_84], %103 {strides = array<i32>} : memref<1x128xf32, #tpu.memory_space<vmem>>, vector<1x128xf32>,
    %cst_85 = arith.constant 0.949999988 : f32
    %105 = vector.broadcast %cst_85 : f32 to vector<1x128xf32>
    %106 = arith.mulf %105, %81 : vector<1x128xf32>
    %cst_86 = arith.constant 5.000000e-02 : f32
    %107 = vector.broadcast %cst_86 : f32 to vector<1x128xf32>
    %108 = arith.mulf %107, %72 : vector<1x128xf32>
    %109 = arith.addf %106, %108 : vector<1x128xf32>
    %c0_87 = arith.constant 0 : index
    %c0_88 = arith.constant 0 : index
    %110 = vector.load %arg16[%c0_87, %c0_88] : memref<1x128xf32, #tpu.memory_space<vmem>>, vector<1x128xf32>
    tpu.vector_store %arg16[%c0_87, %c0_88], %109 {strides = array<i32>} : memref<1x128xf32, #tpu.memory_space<vmem>>, vector<1x128xf32>,
    %cst_89 = arith.constant 0.000000e+00 : f32
    %111 = vector.broadcast %cst_89 : f32 to vector<512x128xf32>
    %112 = arith.maximumf %98, %111 : vector<512x128xf32>
    %113 = tpu.iota {dimensions = array<i32: 0>} : vector<2x512xi32>
    %114 = tpu.iota {dimensions = array<i32: 1>} : vector<2x512xi32>
    %c256_i32 = arith.constant 256 : i32
    %115 = vector.broadcast %c256_i32 : i32 to vector<2x512xi32>
    %116 = arith.muli %113, %115 : vector<2x512xi32>
    %117 = arith.cmpi sge, %114, %116 : vector<2x512xi32>
    %c256_i32_90 = arith.constant 256 : i32
    %118 = vector.broadcast %c256_i32_90 : i32 to vector<2x512xi32>
    %119 = arith.addi %116, %118 : vector<2x512xi32>
    %120 = arith.cmpi slt, %114, %119 : vector<2x512xi32>
    %121 = arith.andi %117, %120 : vector<2x512xi1>
    %cst_91 = arith.constant 3.906250e-03 : f32
    %cst_92 = arith.constant 0.000000e+00 : f32
    %122 = vector.broadcast %cst_91 : f32 to vector<2x512xf32>
    %123 = vector.broadcast %cst_92 : f32 to vector<2x512xf32>
    %124 = arith.select %121, %122, %123 : vector<2x512xi1>, vector<2x512xf32>
    %cst_93 = arith.constant dense<0.000000e+00> : vector<2x128xf32>
    %125 = tpu.matmul %124, %112, %cst_93 {dimension_numbers = #tpu.dot_dimension_numbers<[1], [0], [0], [1], [0, 0, 1, 1], [], []>} : vector<2x512xf32>, vector<512x128xf32>, vector<2x128xf32> -> vector<2x128xf32>
    %c0_94 = arith.constant 0 : index
    %c0_95 = arith.constant 0 : index
    %126 = vector.load %arg9[%c0_94, %c0_95] : memref<128x128xf32, #tpu.memory_space<vmem>>, vector<128x128xf32>
    %cst_96 = arith.constant dense<0.000000e+00> : vector<2x128xf32>
    %127 = tpu.matmul %125, %126, %cst_96 {dimension_numbers = #tpu.dot_dimension_numbers<[1], [0], [0], [1], [0, 0, 1, 1], [], []>} : vector<2x128xf32>, vector<128x128xf32>, vector<2x128xf32> -> vector<2x128xf32>
    %c0_97 = arith.constant 0 : index
    %c0_98 = arith.constant 0 : index
    %128 = vector.load %arg10[%c0_97, %c0_98] : memref<1x128xf32, #tpu.memory_space<vmem>>, vector<1x128xf32>
    %129 = vector.broadcast %128 : vector<1x128xf32> to vector<2x128xf32>
    %130 = arith.addf %127, %129 : vector<2x128xf32>
    %c0_99 = arith.constant 0 : index
    %c0_100 = arith.constant 0 : index
    %131 = vector.load %arg12[%c0_99, %c0_100] : memref<2x128xf32, #tpu.memory_space<vmem>>, vector<2x128xf32>
    tpu.vector_store %arg12[%c0_99, %c0_100], %130 {strides = array<i32>} : memref<2x128xf32, #tpu.memory_space<vmem>>, vector<2x128xf32>,
    %132 = tpu.iota {dimensions = array<i32: 1>} : vector<2x128xi32>
    %c10_i32 = arith.constant 10 : i32
    %133 = vector.broadcast %c10_i32 : i32 to vector<2x128xi32>
    %134 = arith.cmpi slt, %132, %133 : vector<2x128xi32>
    %cst_101 = arith.constant -1.000000e+30 : f32
    %135 = vector.broadcast %cst_101 : f32 to vector<2x128xf32>
    %136 = arith.select %134, %130, %135 : vector<2x128xi1>, vector<2x128xf32>
    %cst_102 = arith.constant dense<0xFF800000> : vector<2xf32>
    %137 = vector.multi_reduction <maximumf>, %136, %cst_102 [1] : vector<2x128xf32> to vector<2xf32>
    %138 = vector.shape_cast %137 : vector<2xf32> to vector<2x1xf32>
    %139 = vector.broadcast %138 : vector<2x1xf32> to vector<2x128xf32>
    %140 = arith.subf %136, %139 : vector<2x128xf32>
    %141 = math.exp %140 : vector<2x128xf32>
    %cst_103 = arith.constant 0.000000e+00 : f32
    %142 = vector.broadcast %cst_103 : f32 to vector<2x128xf32>
    %143 = arith.select %134, %141, %142 : vector<2x128xi1>, vector<2x128xf32>
    %cst_104 = arith.constant dense<0.000000e+00> : vector<2xf32>
    %144 = vector.multi_reduction <add>, %143, %cst_104 [1] : vector<2x128xf32> to vector<2xf32>
    %145 = vector.shape_cast %144 : vector<2xf32> to vector<2x1xf32>
    %146 = tpu.reciprocal %145 {approx = true} : vector<2x1xf32> -> vector<2x1xf32>
    %147 = vector.broadcast %146 : vector<2x1xf32> to vector<2x128xf32>
    %148 = arith.mulf %143, %147 : vector<2x128xf32>
    %149 = math.log %145 : vector<2x1xf32>
    %150 = arith.mulf %143, %140 : vector<2x128xf32>
    %cst_105 = arith.constant dense<0.000000e+00> : vector<2xf32>
    %151 = vector.multi_reduction <add>, %150, %cst_105 [1] : vector<2x128xf32> to vector<2xf32>
    %152 = vector.shape_cast %151 : vector<2xf32> to vector<2x1xf32>
    %153 = arith.mulf %152, %146 : vector<2x1xf32>
    %154 = arith.subf %149, %153 : vector<2x1xf32>
    %cst_106 = arith.constant 1.15129256 : f32
    %155 = vector.broadcast %cst_106 : f32 to vector<2x1xf32>
    %156 = arith.subf %155, %154 : vector<2x1xf32>
    %157 = math.exp %156 : vector<2x1xf32>
    %cst_107 = arith.constant 1.000000e+00 : f32
    %158 = vector.broadcast %cst_107 : f32 to vector<2x1xf32>
    %159 = arith.cmpf ogt, %157, %158 : vector<2x1xf32>
    %160 = arith.extui %159 : vector<2x1xi1> to vector<2x1xi32>
    %161 = arith.sitofp %160 : vector<2x1xi32> to vector<2x1xf32>
    %162 = vector.broadcast %138 : vector<2x1xf32> to vector<2x128xf32>
    %163 = arith.cmpf oeq, %136, %162 : vector<2x128xf32>
    %c128_i32 = arith.constant 128 : i32
    %164 = vector.broadcast %c128_i32 : i32 to vector<2x128xi32>
    %165 = arith.select %163, %132, %164 : vector<2x128xi1>, vector<2x128xi32>
    %cst_108 = arith.constant dense<2147483647> : vector<2xi32>
    %166 = vector.multi_reduction <minsi>, %165, %cst_108 [1] : vector<2x128xi32> to vector<2xi32>
    %167 = vector.shape_cast %166 : vector<2xi32> to vector<2x1xi32>
    %168 = vector.broadcast %167 : vector<2x1xi32> to vector<2x128xi32>
    %169 = arith.cmpi eq, %132, %168 : vector<2x128xi32>
    %170 = arith.extui %169 : vector<2x128xi1> to vector<2x128xi32>
    %171 = arith.sitofp %170 : vector<2x128xi32> to vector<2x128xf32>
    %c0_109 = arith.constant 0 : index
    %c0_110 = arith.constant 0 : index
    %172 = vector.load %arg11[%c0_109, %c0_110] : memref<1x128xf32, #tpu.memory_space<vmem>>, vector<1x128xf32>
    %173 = tpu.iota {dimensions = array<i32: 1>} : vector<1x128xi32>
    %c10_i32_111 = arith.constant 10 : i32
    %174 = vector.broadcast %c10_i32_111 : i32 to vector<1x128xi32>
    %175 = arith.cmpi slt, %173, %174 : vector<1x128xi32>
    %176 = tpu.reciprocal %172 {approx = true} : vector<1x128xf32> -> vector<1x128xf32>
    %cst_112 = arith.constant 0.000000e+00 : f32
    %177 = vector.broadcast %cst_112 : f32 to vector<1x128xf32>
    %178 = arith.select %175, %176, %177 : vector<1x128xi1>, vector<1x128xf32>
    %179 = vector.shape_cast %178 : vector<1x128xf32> to vector<1x1x128xf32>
    %cst_113 = arith.constant dense<0.000000e+00> : vector<1xf32>
    %180 = vector.multi_reduction <add>, %179, %cst_113 [1, 2] : vector<1x1x128xf32> to vector<1xf32>
    %181 = vector.shape_cast %180 : vector<1xf32> to vector<1x1x1xf32>
    %182 = vector.extract %181[0, 0, 0] : f32 from vector<1x1x1xf32>
    %183 = vector.broadcast %182 : f32 to vector<1x1xf32>
    %184 = vector.broadcast %183 : vector<1x1xf32> to vector<1x128xf32>
    %185 = arith.divf %178, %184 : vector<1x128xf32>
    %186 = vector.broadcast %185 : vector<1x128xf32> to vector<2x128xf32>
    %187 = arith.mulf %171, %186 : vector<2x128xf32>
    %cst_114 = arith.constant dense<0.000000e+00> : vector<2xf32>
    %188 = vector.multi_reduction <add>, %187, %cst_114 [1] : vector<2x128xf32> to vector<2xf32>
    %189 = vector.shape_cast %188 : vector<2xf32> to vector<2x1xf32>
    %190 = vector.shape_cast %189 : vector<2x1xf32> to vector<1x2x1xf32>
    %cst_115 = arith.constant dense<0.000000e+00> : vector<1xf32>
    %191 = vector.multi_reduction <add>, %190, %cst_115 [1, 2] : vector<1x2x1xf32> to vector<1xf32>
    %192 = vector.shape_cast %191 : vector<1xf32> to vector<1x1x1xf32>
    %193 = vector.extract %192[0, 0, 0] : f32 from vector<1x1x1xf32>
    %194 = vector.broadcast %193 : f32 to vector<1x1xf32>
    %195 = vector.broadcast %194 : vector<1x1xf32> to vector<2x1xf32>
    %196 = arith.divf %189, %195 : vector<2x1xf32>
    %cst_116 = arith.constant 2.000000e+00 : f32
    %197 = vector.broadcast %cst_116 : f32 to vector<2x1xf32>
    %198 = arith.mulf %196, %197 : vector<2x1xf32>
    %199 = arith.mulf %157, %198 : vector<2x1xf32>
    %200 = arith.mulf %154, %199 : vector<2x1xf32>
    %201 = arith.mulf %200, %161 : vector<2x1xf32>
    %202 = vector.shape_cast %201 : vector<2x1xf32> to vector<1x2x1xf32>
    %cst_117 = arith.constant dense<0.000000e+00> : vector<1xf32>
    %203 = vector.multi_reduction <add>, %202, %cst_117 [1, 2] : vector<1x2x1xf32> to vector<1xf32>
    %204 = vector.shape_cast %203 : vector<1xf32> to vector<1x1x1xf32>
    %205 = vector.extract %204[0, 0, 0] : f32 from vector<1x1x1xf32>
    %206 = vector.broadcast %205 : f32 to vector<1x1xf32>
    %207 = vector.shape_cast %161 : vector<2x1xf32> to vector<1x2x1xf32>
    %cst_118 = arith.constant dense<0.000000e+00> : vector<1xf32>
    %208 = vector.multi_reduction <add>, %207, %cst_118 [1, 2] : vector<1x2x1xf32> to vector<1xf32>
    %209 = vector.shape_cast %208 : vector<1xf32> to vector<1x1x1xf32>
    %210 = vector.extract %209[0, 0, 0] : f32 from vector<1x1x1xf32>
    %211 = vector.broadcast %210 : f32 to vector<1x1xf32>
    %212 = arith.divf %206, %211 : vector<1x1xf32>
    %c0_119 = arith.constant 0 : index
    %c0_120 = arith.constant 0 : index
    %213 = vector.load %arg13[%c0_119, %c0_120] : memref<1x1xf32, #tpu.memory_space<vmem>>, vector<1x1xf32>
    tpu.vector_store %arg13[%c0_119, %c0_120], %212 {strides = array<i32>} : memref<1x1xf32, #tpu.memory_space<vmem>>, vector<1x1xf32>,
    %cst_121 = arith.constant dense<0.000000e+00> : vector<128xf32>
    %214 = vector.multi_reduction <add>, %148, %cst_121 [0] : vector<2x128xf32> to vector<128xf32>
    %215 = vector.shape_cast %214 : vector<128xf32> to vector<1x128xf32>
    %cst_122 = arith.constant 5.000000e-01 : f32
    %216 = vector.broadcast %cst_122 : f32 to vector<1x128xf32>
    %217 = arith.mulf %215, %216 : vector<1x128xf32>
    %cst_123 = arith.constant 0.949999988 : f32
    %218 = vector.broadcast %cst_123 : f32 to vector<1x128xf32>
    %219 = arith.mulf %218, %172 : vector<1x128xf32>
    %cst_124 = arith.constant 5.000000e-02 : f32
    %220 = vector.broadcast %cst_124 : f32 to vector<1x128xf32>
    %221 = arith.mulf %220, %217 : vector<1x128xf32>
    %222 = arith.addf %219, %221 : vector<1x128xf32>
    %c0_125 = arith.constant 0 : index
    %c0_126 = arith.constant 0 : index
    %223 = vector.load %arg14[%c0_125, %c0_126] : memref<1x128xf32, #tpu.memory_space<vmem>>, vector<1x128xf32>
    tpu.vector_store %arg14[%c0_125, %c0_126], %222 {strides = array<i32>} : memref<1x128xf32, #tpu.memory_space<vmem>>, vector<1x128xf32>,
    return
  }
  func.func @transform_0(%arg0: i32) -> i32 {
    %c0_i32 = arith.constant 0 : i32
    %c0_i32_0 = arith.constant 0 : i32
    return %c0_i32 : i32
  }
  func.func @transform_1(%arg0: i32) -> (i32, i32, i32, i32) {
    %c0_i32 = arith.constant 0 : i32
    %c0_i32_0 = arith.constant 0 : i32
    %c0_i32_1 = arith.constant 0 : i32
    %c0_i32_2 = arith.constant 0 : i32
    %c0_i32_3 = arith.constant 0 : i32
    return %c0_i32, %c0_i32_0, %c0_i32_1, %c0_i32_2 : i32, i32, i32, i32
  }
  func.func @transform_2(%arg0: i32) -> (i32, i32, i32) {
    %c0_i32 = arith.constant 0 : i32
    %c0_i32_0 = arith.constant 0 : i32
    %c0_i32_1 = arith.constant 0 : i32
    %c0_i32_2 = arith.constant 0 : i32
    return %c0_i32, %c0_i32_0, %c0_i32_1 : i32, i32, i32
  }
  func.func @transform_3(%arg0: i32) -> (i32, i32) {
    %c0_i32 = arith.constant 0 : i32
    %c0_i32_0 = arith.constant 0 : i32
    %c0_i32_1 = arith.constant 0 : i32
    return %c0_i32, %c0_i32_0 : i32, i32
  }
  func.func @transform_4(%arg0: i32) -> (i32, i32) {
    %c0_i32 = arith.constant 0 : i32
    %c0_i32_0 = arith.constant 0 : i32
    %c0_i32_1 = arith.constant 0 : i32
    return %c0_i32, %c0_i32_0 : i32, i32
  }
  func.func @transform_5(%arg0: i32) -> (i32, i32) {
    %c0_i32 = arith.constant 0 : i32
    %c0_i32_0 = arith.constant 0 : i32
    %c0_i32_1 = arith.constant 0 : i32
    return %c0_i32, %c0_i32_0 : i32, i32
  }
  func.func @transform_6(%arg0: i32) -> (i32, i32) {
    %c0_i32 = arith.constant 0 : i32
    %c0_i32_0 = arith.constant 0 : i32
    %c0_i32_1 = arith.constant 0 : i32
    return %c0_i32, %c0_i32_0 : i32, i32
  }
  func.func @transform_7(%arg0: i32) -> (i32, i32) {
    %c0_i32 = arith.constant 0 : i32
    %c0_i32_0 = arith.constant 0 : i32
    %c0_i32_1 = arith.constant 0 : i32
    return %c0_i32, %c0_i32_0 : i32, i32
  }
  func.func @transform_8(%arg0: i32) -> (i32, i32) {
    %c0_i32 = arith.constant 0 : i32
    %c0_i32_0 = arith.constant 0 : i32
    %c0_i32_1 = arith.constant 0 : i32
    return %c0_i32, %c0_i32_0 : i32, i32
  }
  func.func @transform_9(%arg0: i32) -> (i32, i32) {
    %c0_i32 = arith.constant 0 : i32
    %c0_i32_0 = arith.constant 0 : i32
    %c0_i32_1 = arith.constant 0 : i32
    return %c0_i32, %c0_i32_0 : i32, i32
  }
  func.func @transform_10(%arg0: i32) -> (i32, i32) {
    %c0_i32 = arith.constant 0 : i32
    %c0_i32_0 = arith.constant 0 : i32
    %c0_i32_1 = arith.constant 0 : i32
    return %c0_i32, %c0_i32_0 : i32, i32
  }
  func.func @transform_11(%arg0: i32) -> (i32, i32) {
    %c0_i32 = arith.constant 0 : i32
    %c0_i32_0 = arith.constant 0 : i32
    %c0_i32_1 = arith.constant 0 : i32
    return %c0_i32, %c0_i32_0 : i32, i32
  }
  func.func @transform_12(%arg0: i32) -> (i32, i32) {
    %c0_i32 = arith.constant 0 : i32
    %c0_i32_0 = arith.constant 0 : i32
    %c0_i32_1 = arith.constant 0 : i32
    return %c0_i32, %c0_i32_0 : i32, i32
  }
  func.func @transform_13(%arg0: i32) -> (i32, i32) {
    %c0_i32 = arith.constant 0 : i32
    %c0_i32_0 = arith.constant 0 : i32
    %c0_i32_1 = arith.constant 0 : i32
    return %c0_i32, %c0_i32_0 : i32, i32
  }
  func.func @transform_14(%arg0: i32) -> (i32, i32) {
    %c0_i32 = arith.constant 0 : i32
    %c0_i32_0 = arith.constant 0 : i32
    %c0_i32_1 = arith.constant 0 : i32
    return %c0_i32, %c0_i32_0 : i32, i32
  }
  func.func @transform_15(%arg0: i32) -> (i32, i32) {
    %c0_i32 = arith.constant 0 : i32
    %c0_i32_0 = arith.constant 0 : i32
    %c0_i32_1 = arith.constant 0 : i32
    return %c0_i32, %c0_i32_0 : i32, i32
  }
}

</mosaic_0001>

<bundles_post_ra>
// kernel: delta_forward.1
= control target key start
LH: loop header
LB: loop body
LE: loop exit
PB: predicated region body
PF: predicated region fallthrough
CT: control target
= control target key end

     0   :  { %22 = vsyncpa [#allocation6], 0  ;;  %s11269_s0 = inlined_call_operand.<no memory space> [shape: s32[1], index: 0, kind: input, shape index: {}]   ;;  %s11270_s1 = inlined_call_operand.vmem [shape: f32[2,18,18,4], index: 1, kind: input, shape index: {}]   ;;  %s11271_s2 = inlined_call_operand.vmem [shape: f32[9,4,128], index: 2, kind: input, shape index: {}]   ;;  %s11272_s3 = inlined_call_operand.vmem [shape: f32[1,128], index: 3, kind: input, shape index: {}]   ;;  %s11273_s4 = inlined_call_operand.vmem [shape: f32[1,128], index: 4, kind: input, shape index: {}]   ;;  %s11274_s5 = inlined_call_operand.vmem [shape: f32[1,128], index: 5, kind: input, shape index: {}]   ;;  %s11275_s6 = inlined_call_operand.vmem [shape: f32[1,128], index: 6, kind: input, shape index: {}]   ;;  %s11276_s7 = inlined_call_operand.vmem [shape: f32[1,128], index: 7, kind: input, shape index: {}]   ;;  %s11277_s8 = inlined_call_operand.vmem [shape: f32[128,128], index: 8, kind: input, shape index: {}]   ;;  %s11278_s9 = inlined_call_operand.vmem [shape: f32[1,128], index: 9, kind: input, shape index: {}]   ;;  %s11279_s10 = inlined_call_operand.vmem [shape: f32[1,128], index: 10, kind: input, shape index: {}]   ;;  %s11280_s11 = inlined_call_operand.hbm [shape: f32[2,128], index: 11, kind: output, shape index: {0}]   ;;  %s11281_s12 = inlined_call_operand.hbm [shape: f32[1,1], index: 12, kind: output, shape index: {1}]   ;;  %s11282_s13 = inlined_call_operand.hbm [shape: f32[1,128], index: 13, kind: output, shape index: {2}]   ;;  %s11283_s14 = inlined_call_operand.hbm [shape: f32[1,128], index: 14, kind: output, shape index: {3}]   ;;  %s11284_s15 = inlined_call_operand.hbm [shape: f32[1,128], index: 15, kind: output, shape index: {4}]  }
   0x1   :  { %23 = vsyncpa [#allocation8], 0 }
   0x2   :  { %24 = vsyncpa [#allocation11], 0  ;;  %v115_v0 = vld [vmem:[%s11271_s2] sm:$0xf]  ;;  %vm309_vm0 = vcmask 1043456   ;;  %vm116_vm1 = vcmask 31744  }
   0x3   :  { %v51_v1 = vld [vmem:[%s11270_s1] sm:$0xff]  ;;  %5984 = vmatpush.msk.msra.mxu0 %vm309_vm0, %v115_v0  ;;  %6969 = vmatpush.msk.msra.mxu1 %vm309_vm0, %v115_v0  ;;  %v97_v3 = vld [vmem:[%s11270_s1 + $0x258] sm:$0xff]  ;;  %v6245_v4 = vld [vmem:[%s11271_s2 + $0xc] sm:$0xf]  ;;  %p6961_p0 = scmp.ne.s32.totalorder %s11269_s0, 1 }
   0x4   :  { %v7240_v2 = vld [vmem:[%s11270_s1 + $0xe0] sm:$0xff]  ;;  %6971 = vmatpush.msk.msra.mxu3 %vm309_vm0, %v115_v0  ;;  %5985 = vmatmul.msk.f32.vlgmr.msra.gmra.mxu0 %vm116_vm1, %v51_v1  ;;  %v6375_v5 = vld [vmem:[%s11271_s2 + $0x10] sm:$0xf]  ;;  %v84_v6 = vld [vmem:[%s11270_s1 + $0x1b8] sm:$0xff] }
   0x5   :  { %6004 = vmatmul.msk.f32.vlgmr.msra.gmra.mxu1 %vm116_vm1, %v7240_v2  ;;  %6031 = vmatmul.msk.f32.vlgmr.msra.gmra.mxu3 %vm116_vm1, %v97_v3  ;;  %v52_v7 = vld [vmem:[%s11270_s1 + $0x8] sm:$0xff]  ;;  %v6049_v8 = vld [vmem:[%s11271_s2 + $0x4] sm:$0xf]  ;;  %v7272_v9 = vld [vmem:[%s11270_s1 + $0xf0] sm:$0xff] }
   0x6   :  { %6246 = vmatpush.msk.msrb.mxu3 %vm309_vm0, %v6245_v4  ;;  %6376 = vmatpush.msk.msrb.mxu0 %vm309_vm0, %v6375_v5  ;;  %v98_v10 = vld [vmem:[%s11270_s1 + $0x260] sm:$0xff]  ;;  %v6115_v11 = vld [vmem:[%s11271_s2 + $0x8] sm:$0xf]  ;;  %v7293_v13 = vld [vmem:[%s11270_s1 + $0x18] sm:$0xff] }
   0x7   :  { %6970 = vmatpush.msk.msra.mxu2 %vm309_vm0, %v115_v0  ;;  %6050 = vmatpush.msk.msrb.mxu1 %vm309_vm0, %v6049_v8  ;;  %v85_v12 = vld [vmem:[%s11270_s1 + $0x1c8] sm:$0xff]  ;;  %v7298_v14 = vld [vmem:[%s11270_s1 + $0xf8] sm:$0xff]  ;;  %v99_v15 = vld [vmem:[%s11270_s1 + $0x270] sm:$0xff] }
   0x8   :  { %6018 = vmatmul.msk.f32.vlgmr.msra.gmra.mxu2 %vm116_vm1, %v84_v6  ;;  %v86_v16 = vld [vmem:[%s11270_s1 + $0x1d0] sm:$0xff]  ;;  %v7315_v17 = vld [vmem:[%s11270_s1 + $0x20] sm:$0xff]  ;;  %v7320_v18 = vld [vmem:[%s11270_s1 + $0x108] sm:$0xff] }
   0x9   :  { %6116 = vmatpush.msk.msrb.mxu2 %vm309_vm0, %v6115_v11  ;;  %v100_v19 = vld [vmem:[%s11270_s1 + $0x278] sm:$0xff]  ;;  %v87_v20 = vld [vmem:[%s11270_s1 + $0x1e0] sm:$0xff]  ;;  %v7337_v21 = vld [vmem:[%s11270_s1 + $0x30] sm:$0xff] }
   0xa   :  { %v7342_v22 = vld [vmem:[%s11270_s1 + $0x110] sm:$0xff]  ;;  %v101_v23 = vld [vmem:[%s11270_s1 + $0x288] sm:$0xff]  ;;  %v7359_v25 = vld [vmem:[%s11270_s1 + $0x38] sm:$0xff] }
   0xb   :  { %v88_v24 = vld [vmem:[%s11270_s1 + $0x1e8] sm:$0xff]  ;;  %v7364_v26 = vld [vmem:[%s11270_s1 + $0x120] sm:$0xff]  ;;  %v102_v27 = vld [vmem:[%s11270_s1 + $0x290] sm:$0xff] }
   0xc   :  { %5986 = vmatmul.msk.f32.gmra.mxu0 %vm116_vm1, %v52_v7  ;;  %v89_v28 = vld [vmem:[%s11270_s1 + $0x1f8] sm:$0xff]  ;;  %v7381_v29 = vld [vmem:[%s11270_s1 + $0x48] sm:$0xff]  ;;  %v103_v31 = vld [vmem:[%s11270_s1 + $0x2a0] sm:$0xff] }
   0xd   :  { %6005 = vmatmul.msk.f32.gmra.mxu1 %vm116_vm1, %v7272_v9  ;;  %6032 = vmatmul.msk.f32.gmra.mxu3 %vm116_vm1, %v98_v10  ;;  %v7386_v30 = vld [vmem:[%s11270_s1 + $0x128] sm:$0xff]  ;;  %v90_v32 = vld [vmem:[%s11270_s1 + $0x200] sm:$0xff]  ;;  %v7403_v33 = vld [vmem:[%s11270_s1 + $0x50] sm:$0xff] }
   0xe   :  { %v7408_v34 = vld [vmem:[%s11270_s1 + $0x138] sm:$0xff]  ;;  %v104_v35 = vld [vmem:[%s11270_s1 + $0x2a8] sm:$0xff]  ;;  %v91_v36 = vld [vmem:[%s11270_s1 + $0x210] sm:$0xff] }
   0xf   :  { %v7425_v37 = vld [vmem:[%s11270_s1 + $0x60] sm:$0xff]  ;;  %v105_v39 = vld [vmem:[%s11270_s1 + $0x2b8] sm:$0xff]  ;;  %v7447_v41 = vld [vmem:[%s11270_s1 + $0x68] sm:$0xff] }
  0x10   :  { %6019 = vmatmul.msk.f32.gmra.mxu2 %vm116_vm1, %v85_v12  ;;  %v7430_v38 = vld [vmem:[%s11270_s1 + $0x140] sm:$0xff]  ;;  %v92_v40 = vld [vmem:[%s11270_s1 + $0x218] sm:$0xff]  ;;  %v79_v42 = vld [vmem:[%s11270_s1 + $0x150] sm:$0xff] }
  0x11   :  { %v106_v43 = vld [vmem:[%s11270_s1 + $0x2c0] sm:$0xff]  ;;  %v93_v44 = vld [vmem:[%s11270_s1 + $0x228] sm:$0xff]  ;;  %v7466_v45 = vld [vmem:[%s11270_s1 + $0x78] sm:$0xff] }
  0x12   :  { %v80_v46 = vld [vmem:[%s11270_s1 + $0x158] sm:$0xff]  ;;  %v107_v47 = vld [vmem:[%s11270_s1 + $0x2d0] sm:$0xff]  ;;  %v7485_v49 = vld [vmem:[%s11270_s1 + $0x80] sm:$0xff] }
  0x13   :  { %v94_v48 = vld [vmem:[%s11270_s1 + $0x230] sm:$0xff]  ;;  %v81_v50 = vld [vmem:[%s11270_s1 + $0x168] sm:$0xff]  ;;  %v108_v51 = vld [vmem:[%s11270_s1 + $0x2d8] sm:$0xff] }
  0x14   :  { %5987 = vmatmul.msk.f32.gmra.mxu0 %vm116_vm1, %v7293_v13  ;;  %v95_v52 = vld [vmem:[%s11270_s1 + $0x240] sm:$0xff]  ;;  %v7504_v53 = vld [vmem:[%s11270_s1 + $0x90] sm:$0xff]  ;;  %v109_v55 = vld [vmem:[%s11270_s1 + $0x2e8] sm:$0xff] }
  0x15   :  { %6006 = vmatmul.msk.f32.gmra.mxu1 %vm116_vm1, %v7298_v14  ;;  %6033 = vmatmul.msk.f32.gmra.mxu3 %vm116_vm1, %v99_v15  ;;  %v82_v54 = vld [vmem:[%s11270_s1 + $0x170] sm:$0xff]  ;;  %v96_v56 = vld [vmem:[%s11270_s1 + $0x248] sm:$0xff]  ;;  %v7523_v57 = vld [vmem:[%s11270_s1 + $0x98] sm:$0xff] }
  0x16   :  { %v83_v58 = vld [vmem:[%s11270_s1 + $0x1b0] sm:$0xff]  ;;  %v1120_v60 = vld [vmem:[%s11270_s1 + $0x2] sm:$0xff]  ;;  %v6635_v0 = vld [vmem:[%s11271_s2 + $0x18] sm:$0xf] }
  0x17   :  { %v110_v59 = vld [vmem:[%s11270_s1 + $0x2f0] sm:$0xff]  ;;  %v7542_v61 = vld [vmem:[%s11270_s1 + $0xa8] sm:$0xff]  ;;  %v111_v62 = vld [vmem:[%s11270_s1 + $0x300] sm:$0xff]  ;;  %6636 = vmatpush.msk.msra.mxu2 %vm309_vm0, %v6635_v0 }
  0x18   :  { %6020 = vmatmul.msk.f32.gmra.mxu2 %vm116_vm1, %v86_v16  ;;  %v586_v63 = vld [vmem:[%s11270_s1 + $0x1] sm:$0xff]  ;;  %v1121_v1 = vld [vmem:[%s11270_s1 + $0xa] sm:$0xff]  ;;  %v6765_v3 = vld [vmem:[%s11271_s2 + $0x1c] sm:$0xf] }
  0x19   :  { %v6505_v4 = vld [vmem:[%s11271_s2 + $0x14] sm:$0xf]  ;;  %6766 = vmatpush.msk.msra.mxu3 %vm309_vm0, %v6765_v3  ;;  %v112_v6 = vld [vmem:[%s11270_s1 + $0x308] sm:$0xff]  ;;  %v1122_v8 = vld [vmem:[%s11270_s1 + $0x1a] sm:$0xff] }
  0x1a   :  { %6506 = vmatpush.msk.msra.mxu1 %vm309_vm0, %v6505_v4  ;;  %v7573_v5 = vld [vmem:[%s11270_s1 + $0xb0] sm:$0xff]  ;;  %v6895_v10 = vld [vmem:[%s11271_s2 + $0x20] sm:$0xf]  ;;  %v113_v16 = vld [vmem:[%s11270_s1 + $0x318] sm:$0xff] }
  0x1b   :  { %v587_v7 = vld [vmem:[%s11270_s1 + $0x9] sm:$0xff]  ;;  %6896 = vmatpush.msk.msra.mxu0 %vm309_vm0, %v6895_v10  ;;  %v7598_v12 = vld [vmem:[%s11270_s1 + $0xc0] sm:$0xff] }
  0x1c   :  { %5988 = vmatmul.msk.f32.gmra.mxu0 %vm116_vm1, %v7315_v17 }
  0x1d   :  { %6007 = vmatmul.msk.f32.gmra.mxu1 %vm116_vm1, %v7320_v18  ;;  %6034 = vmatmul.msk.f32.gmra.mxu3 %vm116_vm1, %v100_v19  ;;  %v588_v19 = vld [vmem:[%s11270_s1 + $0x19] sm:$0xff] }
  0x20   :  { %6021 = vmatmul.msk.f32.gmra.mxu2 %vm116_vm1, %v87_v20  ;;  %v1123_v20 = vld [vmem:[%s11270_s1 + $0x22] sm:$0xff] }
  0x24   :  { %5989 = vmatmul.msk.f32.gmra.mxu0 %vm116_vm1, %v7337_v21 }
  0x25   :  { %6008 = vmatmul.msk.f32.gmra.mxu1 %vm116_vm1, %v7342_v22  ;;  %6035 = vmatmul.msk.f32.gmra.mxu3 %vm116_vm1, %v101_v23 }
  0x28   :  { %6022 = vmatmul.msk.f32.gmra.mxu2 %vm116_vm1, %v88_v24 }
  0x2c   :  { %5990 = vmatmul.msk.f32.gmra.mxu0 %vm116_vm1, %v7359_v25 }
  0x2d   :  { %6009 = vmatmul.msk.f32.gmra.mxu1 %vm116_vm1, %v7364_v26  ;;  %6036 = vmatmul.msk.f32.gmra.mxu3 %vm116_vm1, %v102_v27  ;;  %v7623_v27 = vld [vmem:[%s11270_s1 + $0xc8] sm:$0xff] }
  0x30   :  { %6023 = vmatmul.msk.f32.gmra.mxu2 %vm116_vm1, %v89_v28 }
  0x34   :  { %5991 = vmatmul.msk.f32.gmra.mxu0 %vm116_vm1, %v7381_v29 }
  0x35   :  { %6010 = vmatmul.msk.f32.gmra.mxu1 %vm116_vm1, %v7386_v30  ;;  %6037 = vmatmul.msk.f32.gmra.mxu3 %vm116_vm1, %v103_v31  ;;  %v114_v31 = vld [vmem:[%s11270_s1 + $0x320] sm:$0xff] }
  0x38   :  { %6024 = vmatmul.msk.f32.gmra.mxu2 %vm116_vm1, %v90_v32  ;;  %v589_v32 = vld [vmem:[%s11270_s1 + $0x21] sm:$0xff] }
  0x3c   :  { %5992 = vmatmul.msk.f32.gmra.mxu0 %vm116_vm1, %v7403_v33 }
  0x3d   :  { %6011 = vmatmul.msk.f32.gmra.mxu1 %vm116_vm1, %v7408_v34  ;;  %6038 = vmatmul.msk.f32.gmra.mxu3 %vm116_vm1, %v104_v35 }
  0x40   :  { %6025 = vmatmul.msk.f32.gmra.mxu2 %vm116_vm1, %v91_v36  ;;  %v1124_v36 = vld [vmem:[%s11270_s1 + $0x32] sm:$0xff] }
  0x44   :  { %5993 = vmatmul.msk.f32.gmra.mxu0 %vm116_vm1, %v7425_v37 }
  0x45   :  { %6012 = vmatmul.msk.f32.gmra.mxu1 %vm116_vm1, %v7430_v38  ;;  %6039 = vmatmul.msk.f32.gmra.mxu3 %vm116_vm1, %v105_v39 }
  0x48   :  { %6026 = vmatmul.msk.f32.gmra.mxu2 %vm116_vm1, %v92_v40 }
  0x4c   :  { %5994 = vmatmul.msk.f32.gmra.mxu0 %vm116_vm1, %v7447_v41 }
  0x4d   :  { %6013 = vmatmul.msk.f32.gmra.mxu1 %vm116_vm1, %v79_v42  ;;  %6040 = vmatmul.msk.f32.gmra.mxu3 %vm116_vm1, %v106_v43  ;;  %v7650_v42 = vld [vmem:[%s11270_s1 + $0xd8] sm:$0xff] }
  0x50   :  { %6027 = vmatmul.msk.f32.gmra.mxu2 %vm116_vm1, %v93_v44  ;;  %v590_v44 = vld [vmem:[%s11270_s1 + $0x31] sm:$0xff] }
  0x54   :  { %5995 = vmatmul.msk.f32.gmra.mxu0 %vm116_vm1, %v7466_v45 }
  0x55   :  { %6014 = vmatmul.msk.f32.gmra.mxu1 %vm116_vm1, %v80_v46  ;;  %6041 = vmatmul.msk.f32.gmra.mxu3 %vm116_vm1, %v107_v47  ;;  %v1125_v47 = vld [vmem:[%s11270_s1 + $0x3a] sm:$0xff] }
  0x58   :  { %6028 = vmatmul.msk.f32.gmra.mxu2 %vm116_vm1, %v94_v48 }
  0x5c   :  { %5996 = vmatmul.msk.f32.gmra.mxu0 %vm116_vm1, %v7485_v49 }
  0x5d   :  { %6015 = vmatmul.msk.f32.gmra.mxu1 %vm116_vm1, %v81_v50  ;;  %6042 = vmatmul.msk.f32.gmra.mxu3 %vm116_vm1, %v108_v51 }
  0x60   :  { %6029 = vmatmul.msk.f32.gmra.mxu2 %vm116_vm1, %v95_v52  ;;  %v591_v52 = vld [vmem:[%s11270_s1 + $0x39] sm:$0xff] }
  0x64   :  { %5997 = vmatmul.msk.f32.gmra.mxu0 %vm116_vm1, %v7504_v53 }
  0x65   :  { %6016 = vmatmul.msk.f32.gmra.mxu1 %vm116_vm1, %v82_v54  ;;  %6043 = vmatmul.msk.f32.gmra.mxu3 %vm116_vm1, %v109_v55 }
  0x68   :  { %6030 = vmatmul.msk.f32.gmra.mxu2 %vm116_vm1, %v96_v56 }
  0x6c   :  { %5998 = vmatmul.msk.f32.gmra.mxu0 %vm116_vm1, %v7523_v57 }
  0x6d   :  { %6017 = vmatmul.msk.f32.gmra.mxu1 %vm116_vm1, %v83_v58  ;;  %6044 = vmatmul.msk.f32.gmra.mxu3 %vm116_vm1, %v110_v59  ;;  %v592_v59 = vld [vmem:[%s11270_s1 + $0x49] sm:$0xff] }
  0x70   :  { %6117 = vmatmul.msk.f32.vlgmr.msrb.gmra.mxu2 %vm116_vm1, %v1120_v60 }
  0x74   :  { %5999 = vmatmul.msk.f32.gmra.mxu0 %vm116_vm1, %v7542_v61 }
  0x75   :  { %6045 = vmatmul.msk.f32.gmra.mxu3 %vm116_vm1, %v111_v62  ;;  %6051 = vmatmul.msk.f32.vlgmr.msrb.gmra.mxu1 %vm116_vm1, %v586_v63 }
  0x78   :  { %6118 = vmatmul.msk.f32.gmra.mxu2 %vm116_vm1, %v1121_v1  ;;  %v593_v1 = vld [vmem:[%s11270_s1 + $0x51] sm:$0xff] }
  0x7c   :  { %6000 = vmatmul.msk.f32.gmra.mxu0 %vm116_vm1, %v7573_v5 }
  0x7d   :  { %6046 = vmatmul.msk.f32.gmra.mxu3 %vm116_vm1, %v112_v6  ;;  %6052 = vmatmul.msk.f32.gmra.mxu1 %vm116_vm1, %v587_v7 }
  0x80   :  { %6119 = vmatmul.msk.f32.gmra.mxu2 %vm116_vm1, %v1122_v8  ;;  %v594_v8 = vld [vmem:[%s11270_s1 + $0x61] sm:$0xff] }
  0x81   :  { %v7593_v11 = vpop.f32.mrf.mxu0 }
  0x82   :  { %v7600_v15 = vpop.f32.mrf.mxu1 }
  0x84   :  { %6001 = vmatmul.msk.f32.gmra.mxu0 %vm116_vm1, %v7598_v12 }
  0x85   :  { %6047 = vmatmul.msk.f32.gmra.mxu3 %vm116_vm1, %v113_v16  ;;  %6053 = vmatmul.msk.f32.gmra.mxu1 %vm116_vm1, %v588_v19 }
  0x88   :  { %v7615_v23 = vpop.f32.mrf.mxu3  ;;  %6120 = vmatmul.msk.f32.gmra.mxu2 %vm116_vm1, %v1123_v20 }
  0x89   :  { %11314 = vst [vmem:[#allocation16_spill] sm:$0xff] %v7615_v23  ;;  %v7618_v24 = vpop.f32.mrf.mxu0 }
  0x8a   :  { %v7625_v28 = vpop.f32.mrf.mxu1 }
  0x8b   :  { %v7633_v35 = vpop.f32.mrf.mxu2 }
  0x8c   :  { %6002 = vmatmul.msk.f32.gmra.mxu0 %vm116_vm1, %v7623_v27 }
  0x8d   :  { %6048 = vmatmul.msk.f32.gmra.mxu3 %vm116_vm1, %v114_v31  ;;  %6054 = vmatmul.msk.f32.gmra.mxu1 %vm116_vm1, %v589_v32  ;;  %v595_v31 = vld [vmem:[%s11270_s1 + $0x69] sm:$0xff] }
  0x90   :  { %v7642_v39 = vpop.f32.mrf.mxu3  ;;  %6121 = vmatmul.msk.f32.gmra.mxu2 %vm116_vm1, %v1124_v36 }
  0x91   :  { %11315 = vst [vmem:[#allocation17_spill] sm:$0xff] %v7642_v39  ;;  %v7645_v40 = vpop.f32.mrf.mxu0 }
  0x92   :  { %v7652_v43 = vpop.f32.mrf.mxu1 }
  0x93   :  { %v7657_v46 = vpop.f32.mrf.mxu2 }
  0x94   :  { %6003 = vmatmul.msk.f32.gmra.mxu0 %vm116_vm1, %v7650_v42 }
  0x95   :  { %6055 = vmatmul.msk.f32.gmra.mxu1 %vm116_vm1, %v590_v44  ;;  %6247 = vmatmul.msk.f32.vlgmr.msrb.gmra.mxu3 %vm116_vm1, %v7293_v13  ;;  %v1126_v13 = vld [vmem:[%s11270_s1 + $0x4a] sm:$0xff] }
  0x98   :  { %v7667_v48 = vpop.f32.mrf.mxu3  ;;  %6122 = vmatmul.msk.f32.gmra.mxu2 %vm116_vm1, %v1125_v47 }
  0x99   :  { %11316 = vst [vmem:[#allocation18_spill] sm:$0xff] %v7667_v48  ;;  %v7670_v50 = vpop.f32.mrf.mxu0 }
  0x9a   :  { %v7672_v51 = vpop.f32.mrf.mxu1 }
  0x9b   :  { %v7677_v54 = vpop.f32.mrf.mxu2 }
  0x9c   :  { %11317 = vst [vmem:[#allocation19_spill] sm:$0xff] %v7677_v54  ;;  %6377 = vmatmul.msk.f32.vlgmr.msrb.gmra.mxu0 %vm116_vm1, %v588_v19 }
  0x9d   :  { %6056 = vmatmul.msk.f32.gmra.mxu1 %vm116_vm1, %v591_v52  ;;  %6248 = vmatmul.msk.f32.gmra.mxu3 %vm116_vm1, %v7315_v17  ;;  %v1127_v17 = vld [vmem:[%s11270_s1 + $0x52] sm:$0xff] }
  0xa0   :  { %v7686_v55 = vpop.f32.mrf.mxu3  ;;  %6123 = vmatmul.msk.f32.gmra.mxu2 %vm116_vm1, %v1126_v13 }
  0xa1   :  { %11318 = vst [vmem:[#allocation20_spill] sm:$0xff] %v7686_v55  ;;  %v7689_v56 = vpop.f32.mrf.mxu0 }
  0xa2   :  { %v7691_v58 = vpop.f32.mrf.mxu1 }
  0xa3   :  { %v7696_v60 = vpop.f32.mrf.mxu2 }
  0xa4   :  { %11319 = vst [vmem:[#allocation21_spill] sm:$0xff] %v7696_v60  ;;  %6378 = vmatmul.msk.f32.gmra.mxu0 %vm116_vm1, %v589_v32 }
  0xa5   :  { %6057 = vmatmul.msk.f32.gmra.mxu1 %vm116_vm1, %v592_v59  ;;  %6249 = vmatmul.msk.f32.gmra.mxu3 %vm116_vm1, %v7337_v21  ;;  %v1128_v21 = vld [vmem:[%s11270_s1 + $0x62] sm:$0xff] }
  0xa8   :  { %v7705_v62 = vpop.f32.mrf.mxu3  ;;  %6124 = vmatmul.msk.f32.gmra.mxu2 %vm116_vm1, %v1127_v17 }
  0xa9   :  { %11320 = vst [vmem:[#allocation22_spill] sm:$0xff] %v7705_v62  ;;  %v7708_v63 = vpop.f32.mrf.mxu0 }
  0xaa   :  { %v7710_v0 = vpop.f32.mrf.mxu1 }
  0xab   :  { %v7715_v3 = vpop.f32.mrf.mxu2 }
  0xac   :  { %11321 = vst [vmem:[#allocation23_spill] sm:$0xff] %v7715_v3  ;;  %6379 = vmatmul.msk.f32.gmra.mxu0 %vm116_vm1, %v590_v44 }
  0xad   :  { %6058 = vmatmul.msk.f32.gmra.mxu1 %vm116_vm1, %v593_v1  ;;  %6250 = vmatmul.msk.f32.gmra.mxu3 %vm116_vm1, %v7359_v25  ;;  %v1129_v25 = vld [vmem:[%s11270_s1 + $0x6a] sm:$0xff] }
  0xb0   :  { %v7724_v4 = vpop.f32.mrf.mxu3  ;;  %6125 = vmatmul.msk.f32.gmra.mxu2 %vm116_vm1, %v1128_v21 }
  0xb1   :  { %11322 = vst [vmem:[#allocation24_spill] sm:$0xff] %v7724_v4  ;;  %v7727_v6 = vpop.f32.mrf.mxu0 }
  0xb2   :  { %v7729_v7 = vpop.f32.mrf.mxu1 }
  0xb3   :  { %v7734_v10 = vpop.f32.mrf.mxu2 }
  0xb4   :  { %11323 = vst [vmem:[#allocation25_spill] sm:$0xff] %v7734_v10  ;;  %6380 = vmatmul.msk.f32.gmra.mxu0 %vm116_vm1, %v591_v52  ;;  %v596_v52 = vld [vmem:[%s11270_s1 + $0x79] sm:$0xff] }
  0xb5   :  { %6059 = vmatmul.msk.f32.gmra.mxu1 %vm116_vm1, %v594_v8  ;;  %6251 = vmatmul.msk.f32.gmra.mxu3 %vm116_vm1, %v7381_v29  ;;  %v1130_v29 = vld [vmem:[%s11270_s1 + $0x7a] sm:$0xff] }
  0xb8   :  { %v7743_v16 = vpop.f32.mrf.mxu3  ;;  %6126 = vmatmul.msk.f32.gmra.mxu2 %vm116_vm1, %v1129_v25 }
  0xb9   :  { %11324 = vst [vmem:[#allocation26_spill] sm:$0xff] %v7743_v16  ;;  %v7746_v19 = vpop.f32.mrf.mxu0 }
  0xba   :  { %v7748_v20 = vpop.f32.mrf.mxu1 }
  0xbb   :  { %v7753_v32 = vpop.f32.mrf.mxu2 }
  0xbc   :  { %11325 = vst [vmem:[#allocation27_spill] sm:$0xff] %v7753_v32  ;;  %6381 = vmatmul.msk.f32.gmra.mxu0 %vm116_vm1, %v592_v59 }
  0xbd   :  { %6060 = vmatmul.msk.f32.gmra.mxu1 %vm116_vm1, %v595_v31  ;;  %6252 = vmatmul.msk.f32.gmra.mxu3 %vm116_vm1, %v7403_v33  ;;  %v1131_v33 = vld [vmem:[%s11270_s1 + $0x82] sm:$0xff] }
  0xc0   :  { %v7762_v36 = vpop.f32.mrf.mxu3  ;;  %6127 = vmatmul.msk.f32.gmra.mxu2 %vm116_vm1, %v1130_v29 }
  0xc1   :  { %11326 = vst [vmem:[#allocation28_spill] sm:$0xff] %v7762_v36  ;;  %v7765_v44 = vpop.f32.mrf.mxu0 }
  0xc2   :  { %v7767_v47 = vpop.f32.mrf.mxu1 }
  0xc3   :  { %v7772_v13 = vpop.f32.mrf.mxu2 }
  0xc4   :  { %11327 = vst [vmem:[#allocation29_spill] sm:$0xff] %v7772_v13  ;;  %6382 = vmatmul.msk.f32.gmra.mxu0 %vm116_vm1, %v593_v1  ;;  %v597_v1 = vld [vmem:[%s11270_s1 + $0x81] sm:$0xff] }
  0xc5   :  { %6061 = vmatmul.msk.f32.gmra.mxu1 %vm116_vm1, %v596_v52  ;;  %6253 = vmatmul.msk.f32.gmra.mxu3 %vm116_vm1, %v7425_v37  ;;  %v1132_v37 = vld [vmem:[%s11270_s1 + $0x92] sm:$0xff] }
  0xc8   :  { %v7781_v59 = vpop.f32.mrf.mxu3  ;;  %6128 = vmatmul.msk.f32.gmra.mxu2 %vm116_vm1, %v1131_v33 }
  0xc9   :  { %11328 = vst [vmem:[#allocation30_spill] sm:$0xff] %v7781_v59  ;;  %v7784_v17 = vpop.f32.mrf.mxu0 }
  0xca   :  { %v7786_v21 = vpop.f32.mrf.mxu1 }
  0xcb   :  { %v7791_v25 = vpop.f32.mrf.mxu2 }
  0xcc   :  { %11329 = vst [vmem:[#allocation31_spill] sm:$0xff] %v7791_v25  ;;  %6383 = vmatmul.msk.f32.gmra.mxu0 %vm116_vm1, %v594_v8  ;;  %v598_v8 = vld [vmem:[%s11270_s1 + $0x91] sm:$0xff] }
  0xcd   :  { %6062 = vmatmul.msk.f32.gmra.mxu1 %vm116_vm1, %v597_v1  ;;  %6254 = vmatmul.msk.f32.gmra.mxu3 %vm116_vm1, %v7447_v41  ;;  %v1133_v41 = vld [vmem:[%s11270_s1 + $0x9a] sm:$0xff] }
  0xd0   :  { %v7800_v29 = vpop.f32.mrf.mxu3  ;;  %6129 = vmatmul.msk.f32.gmra.mxu2 %vm116_vm1, %v1132_v37 }
  0xd1   :  { %11330 = vst [vmem:[#allocation32_spill] sm:$0xff] %v7800_v29  ;;  %v7803_v33 = vpop.f32.mrf.mxu0 }
  0xd2   :  { %v7805_v59 = vpop.f32.mrf.mxu1 }
  0xd3   :  { %v7810_v36 = vpop.f32.mrf.mxu2 }
  0xd4   :  { %11331 = vst [vmem:[#allocation33_spill] sm:$0xff] %v7810_v36  ;;  %6384 = vmatmul.msk.f32.gmra.mxu0 %vm116_vm1, %v595_v31  ;;  %v599_v31 = vld [vmem:[%s11270_s1 + $0x99] sm:$0xff] }
  0xd5   :  { %6063 = vmatmul.msk.f32.gmra.mxu1 %vm116_vm1, %v598_v8  ;;  %6255 = vmatmul.msk.f32.gmra.mxu3 %vm116_vm1, %v7466_v45  ;;  %v1134_v45 = vld [vmem:[%s11270_s1 + $0xaa] sm:$0xff] }
  0xd8   :  { %v7819_v37 = vpop.f32.mrf.mxu3  ;;  %6130 = vmatmul.msk.f32.gmra.mxu2 %vm116_vm1, %v1133_v41 }
  0xd9   :  { %11332 = vst [vmem:[#allocation34_spill] sm:$0xff] %v7819_v37  ;;  %v7822_v29 = vpop.f32.mrf.mxu0 }
  0xda   :  { %v7824_v16 = vpop.f32.mrf.mxu1 }
  0xdb   :  { %11333 = vst [vmem:[#allocation35_spill] sm:$0xff] %v7824_v16  ;;  %v7829_v4 = vpop.f32.mrf.mxu2 }
  0xdc   :  { %11334 = vst [vmem:[#allocation36_spill] sm:$0xff] %v7829_v4  ;;  %6385 = vmatmul.msk.f32.gmra.mxu0 %vm116_vm1, %v596_v52  ;;  %v600_v52 = vld [vmem:[%s11270_s1 + $0xa9] sm:$0xff] }
  0xdd   :  { %6064 = vmatmul.msk.f32.gmra.mxu1 %vm116_vm1, %v599_v31  ;;  %6256 = vmatmul.msk.f32.gmra.mxu3 %vm116_vm1, %v7485_v49  ;;  %v1135_v49 = vld [vmem:[%s11270_s1 + $0xb2] sm:$0xff] }
  0xe0   :  { %v7838_v41 = vpop.f32.mrf.mxu3  ;;  %6131 = vmatmul.msk.f32.gmra.mxu2 %vm116_vm1, %v1134_v45 }
  0xe1   :  { %11335 = vst [vmem:[#allocation37_spill] sm:$0xff] %v7838_v41  ;;  %v7841_v37 = vpop.f32.mrf.mxu0 }
  0xe2   :  { %v7843_v62 = vpop.f32.mrf.mxu1 }
  0xe3   :  { %11336 = vst [vmem:[#allocation38_spill] sm:$0xff] %v7843_v62  ;;  %v7848_v55 = vpop.f32.mrf.mxu2 }
  0xe4   :  { %11337 = vst [vmem:[#allocation39_spill] sm:$0xff] %v7848_v55  ;;  %6386 = vmatmul.msk.f32.gmra.mxu0 %vm116_vm1, %v597_v1  ;;  %v601_v1 = vld [vmem:[%s11270_s1 + $0xb1] sm:$0xff] }
  0xe5   :  { %6065 = vmatmul.msk.f32.gmra.mxu1 %vm116_vm1, %v600_v52  ;;  %6257 = vmatmul.msk.f32.gmra.mxu3 %vm116_vm1, %v7504_v53  ;;  %v1136_v53 = vld [vmem:[%s11270_s1 + $0xc2] sm:$0xff] }
  0xe8   :  { %v7857_v45 = vpop.f32.mrf.mxu3  ;;  %6132 = vmatmul.msk.f32.gmra.mxu2 %vm116_vm1, %v1135_v49 }
  0xe9   :  { %11338 = vst [vmem:[#allocation40_spill] sm:$0xff] %v7857_v45  ;;  %v7860_v41 = vpop.f32.mrf.mxu0 }
  0xea   :  { %v7862_v48 = vpop.f32.mrf.mxu1 }
  0xeb   :  { %11339 = vst [vmem:[#allocation41_spill] sm:$0xff] %v7862_v48  ;;  %v7867_v39 = vpop.f32.mrf.mxu2  ;;  %v606_v48 = vld [vmem:[%s11270_s1 + $0xf1] sm:$0xff] }
  0xec   :  { %11340 = vst [vmem:[#allocation42_spill] sm:$0xff] %v7867_v39  ;;  %6387 = vmatmul.msk.f32.gmra.mxu0 %vm116_vm1, %v598_v8  ;;  %v602_v8 = vld [vmem:[%s11270_s1 + $0xc1] sm:$0xff] }
  0xed   :  { %6066 = vmatmul.msk.f32.gmra.mxu1 %vm116_vm1, %v601_v1  ;;  %6258 = vmatmul.msk.f32.gmra.mxu3 %vm116_vm1, %v7523_v57  ;;  %v1137_v57 = vld [vmem:[%s11270_s1 + $0xca] sm:$0xff] }
  0xf0   :  { %v7876_v49 = vpop.f32.mrf.mxu3  ;;  %6133 = vmatmul.msk.f32.gmra.mxu2 %vm116_vm1, %v1136_v53 }
  0xf1   :  { %11341 = vst [vmem:[#allocation43_spill] sm:$0xff] %v7876_v49  ;;  %v7879_v45 = vpop.f32.mrf.mxu0 }
  0xf2   :  { %v864_v23 = vpop.f32.mrf.mxu1 }
  0xf3   :  { %v1398_v39 = vpop.f32.mrf.mxu2 }
  0xf4   :  { %6388 = vmatmul.msk.f32.gmra.mxu0 %vm116_vm1, %v599_v31  ;;  %v603_v31 = vld [vmem:[%s11270_s1 + $0xc9] sm:$0xff] }
  0xf5   :  { %6067 = vmatmul.msk.f32.gmra.mxu1 %vm116_vm1, %v602_v8  ;;  %6259 = vmatmul.msk.f32.gmra.mxu3 %vm116_vm1, %v7542_v61  ;;  %v1138_v61 = vld [vmem:[%s11270_s1 + $0xda] sm:$0xff] }
  0xf8   :  { %v7891_v53 = vpop.f32.mrf.mxu3  ;;  %6134 = vmatmul.msk.f32.gmra.mxu2 %vm116_vm1, %v1137_v57 }
  0xf9   :  { %11342 = vst [vmem:[#allocation44_spill] sm:$0xff] %v7891_v53  ;;  %v7894_v49 = vpop.f32.mrf.mxu0 }
  0xfa   :  { %v867_v55 = vpop.f32.mrf.mxu1 }
  0xfb   :  { %v1401_v4 = vpop.f32.mrf.mxu2 }
  0xfc   :  { %6389 = vmatmul.msk.f32.gmra.mxu0 %vm116_vm1, %v600_v52  ;;  %v604_v52 = vld [vmem:[%s11270_s1 + $0xd9] sm:$0xff] }
  0xfd   :  { %6068 = vmatmul.msk.f32.gmra.mxu1 %vm116_vm1, %v603_v31  ;;  %6260 = vmatmul.msk.f32.gmra.mxu3 %vm116_vm1, %v7573_v5  ;;  %v1139_v5 = vld [vmem:[%s11270_s1 + $0xe2] sm:$0xff] }
 0x100   :  { %v7906_v57 = vpop.f32.mrf.mxu3  ;;  %6135 = vmatmul.msk.f32.gmra.mxu2 %vm116_vm1, %v1138_v61 }
 0x101   :  { %11343 = vst [vmem:[#allocation45_spill] sm:$0xff] %v7906_v57  ;;  %v7909_v53 = vpop.f32.mrf.mxu0 }
 0x102   :  { %v870_v36 = vpop.f32.mrf.mxu1 }
 0x103   :  { %v1404_v25 = vpop.f32.mrf.mxu2 }
 0x104   :  { %6390 = vmatmul.msk.f32.gmra.mxu0 %vm116_vm1, %v601_v1  ;;  %v605_v1 = vld [vmem:[%s11270_s1 + $0xe1] sm:$0xff] }
 0x105   :  { %6069 = vmatmul.msk.f32.gmra.mxu1 %vm116_vm1, %v604_v52  ;;  %6261 = vmatmul.msk.f32.gmra.mxu3 %vm116_vm1, %v7598_v12  ;;  %v7933_v12 = vld [vmem:[%s11272_s3] ss:$0 sm:$0xff] }
 0x106   :  { %v523_v62 = vadd.f32 %v7933_v12, %v7618_v24  ;;  %v1142_v24 = vld [vmem:[%s11270_s1 + $0x10a] sm:$0xff] }
 0x108   :  { %v7921_v61 = vpop.f32.mrf.mxu3  ;;  %6136 = vmatmul.msk.f32.gmra.mxu2 %vm116_vm1, %v1139_v5  ;;  %v1140_v5 = vld [vmem:[%s11270_s1 + $0xf2] sm:$0xff]  ;;  %v1057_v54 = vadd.f32 %v867_v55, %v523_v62 }
 0x109   :  { %11344 = vst [vmem:[#allocation46_spill] sm:$0xff] %v7921_v61  ;;  %v7924_v57 = vpop.f32.mrf.mxu0 }
 0x10a   :  { %v873_v13 = vpop.f32.mrf.mxu1 }
 0x10b   :  { %v1407_v32 = vpop.f32.mrf.mxu2 }
 0x10c   :  { %6391 = vmatmul.msk.f32.gmra.mxu0 %vm116_vm1, %v602_v8  ;;  %v522_v8 = vadd.f32 %v7933_v12, %v7593_v11  ;;  %v1141_v11 = vld [vmem:[%s11270_s1 + $0xfa] sm:$0xff] }
 0x10d   :  { %6070 = vmatmul.msk.f32.gmra.mxu1 %vm116_vm1, %v605_v1  ;;  %6262 = vmatmul.msk.f32.gmra.mxu3 %vm116_vm1, %v7623_v27 }
 0x10e   :  { %v1056_v60 = vadd.f32 %v864_v23, %v522_v8 }
 0x110   :  { %v7941_v61 = vpop.f32.mrf.mxu3  ;;  %6137 = vmatmul.msk.f32.gmra.mxu2 %vm116_vm1, %v1140_v5  ;;  %v1590_v5 = vadd.f32 %v1398_v39, %v1056_v60  ;;  %v1591_v39 = vadd.f32 %v1401_v4, %v1057_v54 }
 0x111   :  { %11345 = vst [vmem:[#allocation47_spill] sm:$0xff] %v7941_v61  ;;  %v7946_v10 = vpop.f32.mrf.mxu0 }
 0x112   :  { %v876_v3 = vpop.f32.mrf.mxu1 }
 0x113   :  { %v1410_v27 = vpop.f32.mrf.mxu2 }
 0x114   :  { %6392 = vmatmul.msk.f32.gmra.mxu0 %vm116_vm1, %v603_v31 }
 0x115   :  { %6071 = vmatmul.msk.f32.gmra.mxu1 %vm116_vm1, %v606_v48  ;;  %6263 = vmatmul.msk.f32.gmra.mxu3 %vm116_vm1, %v7650_v42  ;;  %v607_v42 = vld [vmem:[%s11270_s1 + $0xf9] sm:$0xff] }
 0x118   :  { %v1933_v61 = vpop.f32.mrf.mxu3  ;;  %6138 = vmatmul.msk.f32.gmra.mxu2 %vm116_vm1, %v1141_v11 }
 0x119   :  { %v7961_v23 = vadd.f32 %v1933_v61, %v1590_v5  ;;  %v7963_v8 = vpop.f32.mrf.mxu0  ;;  %v524_v61 = vadd.f32 %v7933_v12, %v7645_v40  ;;  %v1143_v40 = vld [vmem:[%s11270_s1 + $0x112] sm:$0xff] }
 0x11a   :  { %v879_v31 = vpop.f32.mrf.mxu1 }
 0x11b   :  { %v1413_v16 = vpop.f32.mrf.mxu2  ;;  %v1058_v11 = vadd.f32 %v870_v36, %v524_v61 }
 0x11c   :  { %6393 = vmatmul.msk.f32.gmra.mxu0 %vm116_vm1, %v604_v52 }
 0x11d   :  { %6072 = vmatmul.msk.f32.gmra.mxu1 %vm116_vm1, %v607_v42  ;;  %6264 = vmatmul.msk.f32.gmra.mxu3 %vm116_vm1, %v7240_v2  ;;  %v608_v2 = vld [vmem:[%s11270_s1 + $0x109] sm:$0xff]  ;;  %v1592_v54 = vadd.f32 %v1404_v25, %v1058_v11 }
 0x120   :  { %v1936_v60 = vpop.f32.mrf.mxu3  ;;  %6139 = vmatmul.msk.f32.gmra.mxu2 %vm116_vm1, %v1142_v24  ;;  %v525_v24 = vadd.f32 %v7933_v12, %v7670_v50  ;;  %v1144_v50 = vld [vmem:[%s11270_s1 + $0x122] sm:$0xff] }
 0x121   :  { %v7978_v55 = vadd.f32 %v1936_v60, %v1591_v39  ;;  %v7980_v62 = vpop.f32.mrf.mxu0 }
 0x122   :  { %v882_v52 = vpop.f32.mrf.mxu1  ;;  %v1059_v60 = vadd.f32 %v873_v13, %v525_v24 }
 0x123   :  { %v1416_v5 = vpop.f32.mrf.mxu2 }
 0x124   :  { %6394 = vmatmul.msk.f32.gmra.mxu0 %vm116_vm1, %v605_v1  ;;  %v1593_v25 = vadd.f32 %v1407_v32, %v1059_v60 }
 0x125   :  { %6073 = vmatmul.msk.f32.gmra.mxu1 %vm116_vm1, %v608_v2  ;;  %6265 = vmatmul.msk.f32.gmra.mxu3 %vm116_vm1, %v7272_v9  ;;  %v609_v9 = vld [vmem:[%s11270_s1 + $0x111] sm:$0xff] }
 0x128   :  { %v1939_v4 = vpop.f32.mrf.mxu3  ;;  %6140 = vmatmul.msk.f32.gmra.mxu2 %vm116_vm1, %v1143_v40  ;;  %v526_v40 = vadd.f32 %v7933_v12, %v7689_v56  ;;  %v1145_v56 = vld [vmem:[%s11270_s1 + $0x12a] sm:$0xff] }
 0x129   :  { %v7995_v36 = vadd.f32 %v1939_v4, %v1592_v54  ;;  %v7997_v39 = vpop.f32.mrf.mxu0 }
 0x12a   :  { %v885_v1 = vpop.f32.mrf.mxu1  ;;  %v1060_v4 = vadd.f32 %v876_v3, %v526_v40 }
 0x12b   :  { %v1419_v61 = vpop.f32.mrf.mxu2 }
 0x12c   :  { %6395 = vmatmul.msk.f32.gmra.mxu0 %vm116_vm1, %v606_v48  ;;  %v1594_v32 = vadd.f32 %v1410_v27, %v1060_v4 }
 0x12d   :  { %6074 = vmatmul.msk.f32.gmra.mxu1 %vm116_vm1, %v609_v9  ;;  %6266 = vmatmul.msk.f32.gmra.mxu3 %vm116_vm1, %v7298_v14  ;;  %v610_v14 = vld [vmem:[%s11270_s1 + $0x121] sm:$0xff] }
 0x130   :  { %v1942_v11 = vpop.f32.mrf.mxu3  ;;  %6141 = vmatmul.msk.f32.gmra.mxu2 %vm116_vm1, %v1144_v50  ;;  %v527_v50 = vadd.f32 %v7933_v12, %v7708_v63  ;;  %v1146_v63 = vld [vmem:[%s11270_s1 + $0x13a] sm:$0xff] }
 0x131   :  { %v8012_v13 = vadd.f32 %v1942_v11, %v1593_v25  ;;  %v8014_v54 = vpop.f32.mrf.mxu0 }
 0x132   :  { %v888_v48 = vpop.f32.mrf.mxu1  ;;  %v1061_v11 = vadd.f32 %v879_v31, %v527_v50 }
 0x133   :  { %v1422_v24 = vpop.f32.mrf.mxu2 }
 0x134   :  { %6396 = vmatmul.msk.f32.gmra.mxu0 %vm116_vm1, %v607_v42  ;;  %v1595_v27 = vadd.f32 %v1413_v16, %v1061_v11 }
 0x135   :  { %6075 = vmatmul.msk.f32.gmra.mxu1 %vm116_vm1, %v610_v14  ;;  %6267 = vmatmul.msk.f32.gmra.mxu3 %vm116_vm1, %v7320_v18  ;;  %v611_v18 = vld [vmem:[%s11270_s1 + $0x129] sm:$0xff] }
 0x138   :  { %v1945_v60 = vpop.f32.mrf.mxu3  ;;  %6142 = vmatmul.msk.f32.gmra.mxu2 %vm116_vm1, %v1145_v56  ;;  %v528_v56 = vadd.f32 %v7933_v12, %v7727_v6  ;;  %v1147_v6 = vld [vmem:[%s11270_s1 + $0x142] sm:$0xff] }
 0x139   :  { %v8029_v3 = vadd.f32 %v1945_v60, %v1594_v32  ;;  %v8031_v25 = vpop.f32.mrf.mxu0 }
 0x13a   :  { %v891_v42 = vpop.f32.mrf.mxu1  ;;  %v1062_v60 = vadd.f32 %v882_v52, %v528_v56 }
 0x13b   :  { %v1425_v40 = vpop.f32.mrf.mxu2 }
 0x13c   :  { %6397 = vmatmul.msk.f32.gmra.mxu0 %vm116_vm1, %v608_v2  ;;  %v1596_v16 = vadd.f32 %v1416_v5, %v1062_v60 }
 0x13d   :  { %6076 = vmatmul.msk.f32.gmra.mxu1 %vm116_vm1, %v611_v18  ;;  %6268 = vmatmul.msk.f32.gmra.mxu3 %vm116_vm1, %v7342_v22  ;;  %v612_v22 = vld [vmem:[%s11270_s1 + $0x139] sm:$0xff] }
 0x140   :  { %v1948_v4 = vpop.f32.mrf.mxu3  ;;  %6143 = vmatmul.msk.f32.gmra.mxu2 %vm116_vm1, %v1146_v63  ;;  %v529_v63 = vadd.f32 %v7933_v12, %v7746_v19  ;;  %v1148_v19 = vld [vmem:[%s11270_s1 + $0x152] sm:$0xff] }
 0x141   :  { %v8046_v31 = vadd.f32 %v1948_v4, %v1595_v27  ;;  %v8048_v32 = vpop.f32.mrf.mxu0 }
 0x142   :  { %v894_v2 = vpop.f32.mrf.mxu1  ;;  %v1063_v4 = vadd.f32 %v885_v1, %v529_v63  ;;  %v530_v1 = vadd.f32 %v7933_v12, %v7765_v44  ;;  %v1149_v44 = vld [vmem:[%s11270_s1 + $0x15a] sm:$0xff] }
 0x143   :  { %v1428_v50 = vpop.f32.mrf.mxu2 }
 0x144   :  { %6398 = vmatmul.msk.f32.gmra.mxu0 %vm116_vm1, %v609_v9  ;;  %v1597_v5 = vadd.f32 %v1419_v61, %v1063_v4 }
 0x145   :  { %6077 = vmatmul.msk.f32.gmra.mxu1 %vm116_vm1, %v612_v22  ;;  %6269 = vmatmul.msk.f32.gmra.mxu3 %vm116_vm1, %v7364_v26  ;;  %v613_v26 = vld [vmem:[%s11270_s1 + $0x141] sm:$0xff] }
 0x148   :  { %v1951_v11 = vpop.f32.mrf.mxu3  ;;  %6144 = vmatmul.msk.f32.gmra.mxu2 %vm116_vm1, %v1147_v6 }
 0x149   :  { %v8063_v52 = vadd.f32 %v1951_v11, %v1596_v16  ;;  %v8065_v27 = vpop.f32.mrf.mxu0  ;;  %v1064_v11 = vadd.f32 %v888_v48, %v530_v1  ;;  %v531_v48 = vadd.f32 %v7933_v12, %v7784_v17  ;;  %v1150_v17 = vld [vmem:[%s11270_s1 + $0x16a] sm:$0xff] }
 0x14a   :  { %v897_v9 = vpop.f32.mrf.mxu1 }
 0x14b   :  { %v8070_v56 = vpop.f32.mrf.mxu2  ;;  %v1598_v61 = vadd.f32 %v1422_v24, %v1064_v11 }
 0x14c   :  { %6399 = vmatmul.msk.f32.gmra.mxu0 %vm116_vm1, %v610_v14 }
 0x14d   :  { %6078 = vmatmul.msk.f32.gmra.mxu1 %vm116_vm1, %v613_v26  ;;  %6270 = vmatmul.msk.f32.gmra.mxu3 %vm116_vm1, %v7386_v30  ;;  %v614_v30 = vld [vmem:[%s11270_s1 + $0x151] sm:$0xff] }
 0x150   :  { %v1954_v60 = vpop.f32.mrf.mxu3  ;;  %6145 = vmatmul.msk.f32.gmra.mxu2 %vm116_vm1, %v1148_v19 }
 0x151   :  { %v8082_v6 = vadd.f32 %v1954_v60, %v1597_v5  ;;  %v8084_v16 = vpop.f32.mrf.mxu0  ;;  %v1065_v60 = vadd.f32 %v891_v42, %v531_v48  ;;  %v532_v42 = vadd.f32 %v7933_v12, %v7803_v33  ;;  %v1151_v33 = vld [vmem:[%s11270_s1 + $0x172] sm:$0xff] }
 0x152   :  { %v900_v14 = vpop.f32.mrf.mxu1 }
 0x153   :  { %v8089_v63 = vpop.f32.mrf.mxu2  ;;  %v1599_v24 = vadd.f32 %v1425_v40, %v1065_v60  ;;  %v6207_v40 = vld [vmem:[%s11270_s1 + $0x150] sm:$0xff] }
 0x154   :  { %6400 = vmatmul.msk.f32.gmra.mxu0 %vm116_vm1, %v611_v18 }
 0x155   :  { %6079 = vmatmul.msk.f32.gmra.mxu1 %vm116_vm1, %v614_v30  ;;  %6271 = vmatmul.msk.f32.gmra.mxu3 %vm116_vm1, %v7408_v34  ;;  %v615_v34 = vld [vmem:[%s11270_s1 + $0x159] sm:$0xff] }
 0x158   :  { %v1957_v4 = vpop.f32.mrf.mxu3  ;;  %6146 = vmatmul.msk.f32.gmra.mxu2 %vm116_vm1, %v1149_v44 }
 0x159   :  { %v8101_v19 = vadd.f32 %v1957_v4, %v1598_v61  ;;  %v8103_v5 = vpop.f32.mrf.mxu0  ;;  %v1066_v4 = vadd.f32 %v894_v2, %v532_v42  ;;  %v617_v42 = vld [vmem:[%s11270_s1 + $0x171] sm:$0xff] }
 0x15a   :  { %v903_v18 = vpop.f32.mrf.mxu1 }
 0x15b   :  { %v8108_v1 = vpop.f32.mrf.mxu2  ;;  %v1600_v60 = vadd.f32 %v1428_v50, %v1066_v4  ;;  %v6208_v50 = vld [vmem:[%s11270_s1 + $0x158] sm:$0xff] }
 0x15c   :  { %6401 = vmatmul.msk.f32.gmra.mxu0 %vm116_vm1, %v612_v22 }
 0x15d   :  { %6080 = vmatmul.msk.f32.gmra.mxu1 %vm116_vm1, %v615_v34  ;;  %6272 = vmatmul.msk.f32.gmra.mxu3 %vm116_vm1, %v7430_v38  ;;  %v616_v38 = vld [vmem:[%s11270_s1 + $0x169] sm:$0xff] }
 0x160   :  { %v1960_v11 = vpop.f32.mrf.mxu3  ;;  %6147 = vmatmul.msk.f32.gmra.mxu2 %vm116_vm1, %v1150_v17 }
 0x161   :  { %v8120_v44 = vadd.f32 %v1960_v11, %v1599_v24  ;;  %v8122_v61 = vpop.f32.mrf.mxu0  ;;  %v533_v24 = vadd.f32 %v7933_v12, %v7822_v29  ;;  %v1152_v29 = vld [vmem:[%s11270_s1 + $0x1b2] sm:$0xff] }
 0x162   :  { %v8124_v22 = vpop.f32.mrf.mxu1 }
 0x163   :  { %v8132_v48 = vpop.f32.mrf.mxu2 }
 0x164   :  { %6402 = vmatmul.msk.f32.gmra.mxu0 %vm116_vm1, %v613_v26 }
 0x165   :  { %6081 = vmatmul.msk.f32.gmra.mxu1 %vm116_vm1, %v616_v38  ;;  %6273 = vmatmul.msk.f32.gmra.mxu3 %vm116_vm1, %v6207_v40  ;;  %v1067_v40 = vadd.f32 %v897_v9, %v533_v24  ;;  %v534_v9 = vadd.f32 %v7933_v12, %v7841_v37  ;;  %v1153_v37 = vld [vmem:[%s11270_s1 + $0x1ba] sm:$0xff] }
 0x168   :  { %v1963_v17 = vpop.f32.mrf.mxu3  ;;  %6148 = vmatmul.msk.f32.gmra.mxu2 %vm116_vm1, %v1151_v33  ;;  %v1601_v33 = vadd.f32 %v8070_v56, %v1067_v40  ;;  %v6209_v56 = vld [vmem:[%s11270_s1 + $0x168] sm:$0xff]  ;;  %v1068_v40 = vadd.f32 %v900_v14, %v534_v9  ;;  %v535_v14 = vadd.f32 %v7933_v12, %v7860_v41 }
 0x169   :  { %v8143_v2 = vadd.f32 %v1963_v17, %v1600_v60  ;;  %v8145_v11 = vpop.f32.mrf.mxu0  ;;  %v1154_v41 = vld [vmem:[%s11270_s1 + $0x1ca] sm:$0xff] }
 0x16a   :  { %11346 = vst [vmem:[#allocation48_spill] sm:$0xff] %v8145_v11  ;;  %v8147_v26 = vpop.f32.mrf.mxu1 }
 0x16b   :  { %v8155_v4 = vpop.f32.mrf.mxu2 }
 0x16c   :  { %6403 = vmatmul.msk.f32.gmra.mxu0 %vm116_vm1, %v614_v30 }
 0x16d   :  { %6082 = vmatmul.msk.f32.gmra.mxu1 %vm116_vm1, %v617_v42  ;;  %6274 = vmatmul.msk.f32.gmra.mxu3 %vm116_vm1, %v6208_v50  ;;  %v618_v50 = vld [vmem:[%s11270_s1 + $0x1b1] sm:$0xff] }
 0x170   :  { %v1966_v60 = vpop.f32.mrf.mxu3  ;;  %6149 = vmatmul.msk.f32.gmra.mxu2 %vm116_vm1, %v1152_v29  ;;  %v1602_v29 = vadd.f32 %v8089_v63, %v1068_v40  ;;  %v6210_v63 = vld [vmem:[%s11270_s1 + $0x170] sm:$0xff] }
 0x171   :  { %v8167_v17 = vadd.f32 %v1966_v60, %v1601_v33  ;;  %v8169_v24 = vpop.f32.mrf.mxu0 }
 0x172   :  { %v8171_v30 = vpop.f32.mrf.mxu1 }
 0x173   :  { %v8179_v11 = vpop.f32.mrf.mxu2 }
 0x174   :  { %6404 = vmatmul.msk.f32.gmra.mxu0 %vm116_vm1, %v615_v34 }
 0x175   :  { %6083 = vmatmul.msk.f32.gmra.mxu1 %vm116_vm1, %v618_v50  ;;  %6275 = vmatmul.msk.f32.gmra.mxu3 %vm116_vm1, %v6209_v56  ;;  %v619_v50 = vld [vmem:[%s11270_s1 + $0x1b9] sm:$0xff]  ;;  %v1069_v56 = vadd.f32 %v903_v18, %v535_v14  ;;  %v536_v18 = vadd.f32 %v7933_v12, %v7879_v45 }
 0x176   :  { %v1155_v45 = vld [vmem:[%s11270_s1 + $0x1d2] sm:$0xff] }
 0x178   :  { %v1969_v33 = vpop.f32.mrf.mxu3  ;;  %6150 = vmatmul.msk.f32.gmra.mxu2 %vm116_vm1, %v1153_v37  ;;  %v1603_v37 = vadd.f32 %v8108_v1, %v1069_v56  ;;  %v6211_v1 = vld [vmem:[%s11270_s1 + $0x180] sm:$0xff] }
 0x179   :  { %v8191_v60 = vadd.f32 %v1969_v33, %v1602_v29  ;;  %v8193_v9 = vpop.f32.mrf.mxu0 }
 0x17a   :  { %v8195_v34 = vpop.f32.mrf.mxu1 }
 0x17b   :  { %v8203_v40 = vpop.f32.mrf.mxu2 }
 0x17c   :  { %6405 = vmatmul.msk.f32.gmra.mxu0 %vm116_vm1, %v616_v38 }
 0x17d   :  { %6084 = vmatmul.msk.f32.gmra.mxu1 %vm116_vm1, %v619_v50  ;;  %6276 = vmatmul.msk.f32.gmra.mxu3 %vm116_vm1, %v6210_v63  ;;  %v620_v50 = vld [vmem:[%s11270_s1 + $0x1c9] sm:$0xff]  ;;  %v1070_v63 = vadd.f32 %v8124_v22, %v536_v18  ;;  %v537_v22 = vadd.f32 %v7933_v12, %v7894_v49 }
 0x17f   :  { %v1071_v49 = vadd.f32 %v8147_v26, %v537_v22  ;;  %v538_v26 = vadd.f32 %v7933_v12, %v7909_v53 }
 0x180   :  { %v1972_v29 = vpop.f32.mrf.mxu3  ;;  %6151 = vmatmul.msk.f32.gmra.mxu2 %vm116_vm1, %v1154_v41  ;;  %v1604_v41 = vadd.f32 %v8132_v48, %v1070_v63  ;;  %v621_v48 = vld [vmem:[%s11270_s1 + $0x1d1] sm:$0xff]  ;;  %v6212_v63 = vld [vmem:[%s11270_s1 + $0x188] sm:$0xff] }
 0x181   :  { %v8215_v33 = vadd.f32 %v1972_v29, %v1603_v37  ;;  %v8217_v14 = vpop.f32.mrf.mxu0  ;;  %v1072_v53 = vadd.f32 %v8171_v30, %v538_v26  ;;  %v539_v30 = vadd.f32 %v7933_v12, %v7924_v57  ;;  %v1158_v57 = vld [vmem:[%s11270_s1 + $0x1fa] sm:$0xff] }
 0x182   :  { %v8219_v38 = vpop.f32.mrf.mxu1 }
 0x183   :  { %v8228_v56 = vpop.f32.mrf.mxu2 }
 0x184   :  { %6406 = vmatmul.msk.f32.gmra.mxu0 %vm116_vm1, %v617_v42  ;;  %v6341_v42 = vld [vmem:[%s11270_s1 + $0x181] sm:$0xff] }
 0x185   :  { %6085 = vmatmul.msk.f32.gmra.mxu1 %vm116_vm1, %v620_v50  ;;  %6277 = vmatmul.msk.f32.gmra.mxu3 %vm116_vm1, %v6211_v1 }
 0x188   :  { %v1975_v37 = vpop.f32.mrf.mxu3  ;;  %6152 = vmatmul.msk.f32.gmra.mxu2 %vm116_vm1, %v1155_v45 }
 0x189   :  { %v8240_v29 = vadd.f32 %v1975_v37, %v1604_v41  ;;  %v8242_v18 = vpop.f32.mrf.mxu0  ;;  %v1156_v41 = vld [vmem:[%s11270_s1 + $0x1e2] sm:$0xff]  ;;  %v1605_v37 = vadd.f32 %v8155_v4, %v1071_v49 }
 0x18a   :  { %11348 = vst [vmem:[#allocation50_spill] sm:$0xff] %v8242_v18  ;;  %v8247_v1 = vpop.f32.mrf.mxu1  ;;  %v622_v4 = vld [vmem:[%s11270_s1 + $0x1e1] sm:$0xff] }
 0x18b   :  { %11347 = vst [vmem:[#allocation49_spill] sm:$0xff] %v8240_v29  ;;  %v8256_v45 = vpop.f32.mrf.mxu2  ;;  %v6213_v49 = vld [vmem:[%s11270_s1 + $0x1c8] sm:$0xff] }
 0x18c   :  { %6407 = vmatmul.msk.f32.gmra.mxu0 %vm116_vm1, %v6341_v42  ;;  %v6342_v42 = vld [vmem:[%s11270_s1 + $0x189] sm:$0xff] }
 0x18d   :  { %6086 = vmatmul.msk.f32.gmra.mxu1 %vm116_vm1, %v621_v48  ;;  %6278 = vmatmul.msk.f32.gmra.mxu3 %vm116_vm1, %v6212_v63 }
 0x190   :  { %v1978_v18 = vpop.f32.mrf.mxu3  ;;  %6153 = vmatmul.msk.f32.gmra.mxu2 %vm116_vm1, %v1156_v41  ;;  %v1157_v41 = vld [vmem:[%s11270_s1 + $0x1ea] sm:$0xff] }
 0x191   :  { %v8268_v22 = vadd.f32 %v1978_v18, %v1605_v37  ;;  %v8270_v29 = vpop.f32.mrf.mxu0  ;;  %v1606_v37 = vadd.f32 %v8179_v11, %v1072_v53  ;;  %v6214_v11 = vld [vmem:[%s11270_s1 + $0x1d0] sm:$0xff]  ;;  %v1073_v53 = vadd.f32 %v8195_v34, %v539_v30  ;;  %v540_v34 = vadd.f32 %v7933_v12, %v7946_v10  ;;  %v1159_v10 = vld [vmem:[%s11270_s1 + $0x202] sm:$0xff] }
 0x192   :  { %11350 = vst [vmem:[#allocation52_spill] sm:$0xff] %v8270_v29  ;;  %v8275_v63 = vpop.f32.mrf.mxu1 }
 0x193   :  { %11349 = vst [vmem:[#allocation51_spill] sm:$0xff] %v8268_v22  ;;  %v8284_v18 = vpop.f32.mrf.mxu2 }
 0x194   :  { %6408 = vmatmul.msk.f32.gmra.mxu0 %vm116_vm1, %v6342_v42 }
 0x195   :  { %6087 = vmatmul.msk.f32.gmra.mxu1 %vm116_vm1, %v622_v4  ;;  %6279 = vmatmul.msk.f32.gmra.mxu3 %vm116_vm1, %v6213_v49  ;;  %v623_v49 = vld [vmem:[%s11270_s1 + $0x1e9] sm:$0xff] }
 0x198   :  { %v1981_v29 = vpop.f32.mrf.mxu3  ;;  %6154 = vmatmul.msk.f32.gmra.mxu2 %vm116_vm1, %v1157_v41 }
 0x199   :  { %v8296_v26 = vadd.f32 %v1981_v29, %v1606_v37  ;;  %v8298_v22 = vpop.f32.mrf.mxu0  ;;  %v1607_v29 = vadd.f32 %v8203_v40, %v1073_v53  ;;  %v6215_v40 = vld [vmem:[%s11270_s1 + $0x1e0] sm:$0xff]  ;;  %v1074_v53 = vadd.f32 %v8219_v38, %v540_v34  ;;  %v541_v38 = vadd.f32 %v7933_v12, %v7600_v15  ;;  %v1160_v15 = vld [vmem:[%s11270_s1 + $0x212] sm:$0xff] }
 0x19a   :  { %11351 = vst [vmem:[#allocation53_spill] sm:$0xff] %v8298_v22  ;;  %v8300_v42 = vpop.f32.mrf.mxu1 }
 0x19b   :  { %v8309_v41 = vpop.f32.mrf.mxu2 }
 0x19c   :  { %6409 = vmatmul.msk.f32.gmra.mxu0 %vm116_vm1, %v620_v50 }
 0x19d   :  { %6088 = vmatmul.msk.f32.gmra.mxu1 %vm116_vm1, %v623_v49  ;;  %6280 = vmatmul.msk.f32.gmra.mxu3 %vm116_vm1, %v6214_v11  ;;  %v624_v11 = vld [vmem:[%s11270_s1 + $0x1f9] sm:$0xff] }
 0x1a0   :  { %v1984_v37 = vpop.f32.mrf.mxu3  ;;  %6155 = vmatmul.msk.f32.gmra.mxu2 %vm116_vm1, %v1158_v57 }
 0x1a1   :  { %v8321_v30 = vadd.f32 %v1984_v37, %v1607_v29  ;;  %v8323_v22 = vpop.f32.mrf.mxu0  ;;  %v1608_v29 = vadd.f32 %v8228_v56, %v1074_v53  ;;  %v6216_v56 = vld [vmem:[%s11270_s1 + $0x1e8] sm:$0xff]  ;;  %v1075_v53 = vadd.f32 %v8247_v1, %v541_v38  ;;  %v542_v1 = vadd.f32 %v7933_v12, %v7625_v28  ;;  %v1161_v28 = vld [vmem:[%s11270_s1 + $0x21a] sm:$0xff] }
 0x1a2   :  { %11352 = vst [vmem:[#allocation54_spill] sm:$0xff] %v8323_v22  ;;  %v8325_v50 = vpop.f32.mrf.mxu1 }
 0x1a3   :  { %v8334_v57 = vpop.f32.mrf.mxu2 }
 0x1a4   :  { %6410 = vmatmul.msk.f32.gmra.mxu0 %vm116_vm1, %v621_v48 }
 0x1a5   :  { %6089 = vmatmul.msk.f32.gmra.mxu1 %vm116_vm1, %v624_v11  ;;  %6281 = vmatmul.msk.f32.gmra.mxu3 %vm116_vm1, %v6215_v40  ;;  %v625_v40 = vld [vmem:[%s11270_s1 + $0x201] sm:$0xff] }
 0x1a8   :  { %v1987_v37 = vpop.f32.mrf.mxu3  ;;  %6156 = vmatmul.msk.f32.gmra.mxu2 %vm116_vm1, %v1159_v10 }
 0x1a9   :  { %v8346_v34 = vadd.f32 %v1987_v37, %v1608_v29  ;;  %v8348_v22 = vpop.f32.mrf.mxu0  ;;  %v1609_v29 = vadd.f32 %v8256_v45, %v1075_v53  ;;  %v6217_v45 = vld [vmem:[%s11270_s1 + $0x1f8] sm:$0xff]  ;;  %v1076_v53 = vadd.f32 %v8275_v63, %v542_v1  ;;  %v543_v63 = vadd.f32 %v7933_v12, %v7652_v43  ;;  %v1162_v43 = vld [vmem:[%s11270_s1 + $0x22a] sm:$0xff] }
 0x1aa   :  { %11353 = vst [vmem:[#allocation55_spill] sm:$0xff] %v8348_v22  ;;  %v8350_v48 = vpop.f32.mrf.mxu1 }
 0x1ab   :  { %v8359_v10 = vpop.f32.mrf.mxu2 }
 0x1ac   :  { %6411 = vmatmul.msk.f32.gmra.mxu0 %vm116_vm1, %v622_v4 }
 0x1ad   :  { %6090 = vmatmul.msk.f32.gmra.mxu1 %vm116_vm1, %v625_v40  ;;  %6282 = vmatmul.msk.f32.gmra.mxu3 %vm116_vm1, %v6216_v56  ;;  %v626_v56 = vld [vmem:[%s11270_s1 + $0x211] sm:$0xff] }
 0x1b0   :  { %v1990_v37 = vpop.f32.mrf.mxu3  ;;  %6157 = vmatmul.msk.f32.gmra.mxu2 %vm116_vm1, %v1160_v15 }
 0x1b1   :  { %v8371_v38 = vadd.f32 %v1990_v37, %v1609_v29  ;;  %v8373_v22 = vpop.f32.mrf.mxu0  ;;  %v1610_v29 = vadd.f32 %v8284_v18, %v1076_v53  ;;  %v6218_v18 = vld [vmem:[%s11270_s1 + $0x200] sm:$0xff]  ;;  %v1077_v53 = vadd.f32 %v8300_v42, %v543_v63  ;;  %v544_v42 = vadd.f32 %v7933_v12, %v7672_v51  ;;  %v1163_v51 = vld [vmem:[%s11270_s1 + $0x232] sm:$0xff] }
 0x1b2   :  { %11354 = vst [vmem:[#allocation56_spill] sm:$0xff] %v8373_v22  ;;  %v8375_v4 = vpop.f32.mrf.mxu1 }
 0x1b3   :  { %v8384_v15 = vpop.f32.mrf.mxu2 }
 0x1b4   :  { %6412 = vmatmul.msk.f32.gmra.mxu0 %vm116_vm1, %v623_v49 }
 0x1b5   :  { %6091 = vmatmul.msk.f32.gmra.mxu1 %vm116_vm1, %v626_v56  ;;  %6283 = vmatmul.msk.f32.gmra.mxu3 %vm116_vm1, %v6217_v45  ;;  %v627_v45 = vld [vmem:[%s11270_s1 + $0x219] sm:$0xff] }
 0x1b8   :  { %v1993_v37 = vpop.f32.mrf.mxu3  ;;  %6158 = vmatmul.msk.f32.gmra.mxu2 %vm116_vm1, %v1161_v28 }
 0x1b9   :  { %v8396_v1 = vadd.f32 %v1993_v37, %v1610_v29  ;;  %v8398_v22 = vpop.f32.mrf.mxu0  ;;  %v1611_v29 = vadd.f32 %v8309_v41, %v1077_v53  ;;  %v6219_v41 = vld [vmem:[%s11270_s1 + $0x210] sm:$0xff]  ;;  %v1078_v53 = vadd.f32 %v8325_v50, %v544_v42  ;;  %v545_v50 = vadd.f32 %v7933_v12, %v7691_v58  ;;  %v1164_v58 = vld [vmem:[%s11270_s1 + $0x242] sm:$0xff] }
 0x1ba   :  { %11355 = vst [vmem:[#allocation57_spill] sm:$0xff] %v8398_v22  ;;  %v8400_v49 = vpop.f32.mrf.mxu1 }
 0x1bb   :  { %v8409_v28 = vpop.f32.mrf.mxu2 }
 0x1bc   :  { %6413 = vmatmul.msk.f32.gmra.mxu0 %vm116_vm1, %v624_v11 }
 0x1bd   :  { %6092 = vmatmul.msk.f32.gmra.mxu1 %vm116_vm1, %v627_v45  ;;  %6284 = vmatmul.msk.f32.gmra.mxu3 %vm116_vm1, %v6218_v18  ;;  %v628_v18 = vld [vmem:[%s11270_s1 + $0x229] sm:$0xff] }
 0x1c0   :  { %v1996_v37 = vpop.f32.mrf.mxu3  ;;  %6159 = vmatmul.msk.f32.gmra.mxu2 %vm116_vm1, %v1162_v43 }
 0x1c1   :  { %v8421_v63 = vadd.f32 %v1996_v37, %v1611_v29  ;;  %v8423_v22 = vpop.f32.mrf.mxu0  ;;  %v1612_v29 = vadd.f32 %v8334_v57, %v1078_v53  ;;  %v6220_v57 = vld [vmem:[%s11270_s1 + $0x218] sm:$0xff]  ;;  %v1079_v53 = vadd.f32 %v8350_v48, %v545_v50  ;;  %v546_v48 = vadd.f32 %v7933_v12, %v7710_v0  ;;  %v1165_v0 = vld [vmem:[%s11270_s1 + $0x24a] sm:$0xff] }
 0x1c2   :  { %11356 = vst [vmem:[#allocation58_spill] sm:$0xff] %v8423_v22  ;;  %v8425_v11 = vpop.f32.mrf.mxu1 }
 0x1c3   :  { %v8434_v43 = vpop.f32.mrf.mxu2 }
 0x1c4   :  { %6414 = vmatmul.msk.f32.gmra.mxu0 %vm116_vm1, %v625_v40 }
 0x1c5   :  { %6093 = vmatmul.msk.f32.gmra.mxu1 %vm116_vm1, %v628_v18  ;;  %6285 = vmatmul.msk.f32.gmra.mxu3 %vm116_vm1, %v6219_v41  ;;  %v629_v41 = vld [vmem:[%s11270_s1 + $0x231] sm:$0xff] }
 0x1c8   :  { %v1999_v37 = vpop.f32.mrf.mxu3  ;;  %6160 = vmatmul.msk.f32.gmra.mxu2 %vm116_vm1, %v1163_v51 }
 0x1c9   :  { %v8446_v42 = vadd.f32 %v1999_v37, %v1612_v29  ;;  %v8448_v22 = vpop.f32.mrf.mxu0  ;;  %v1613_v29 = vadd.f32 %v8359_v10, %v1079_v53  ;;  %v6221_v10 = vld [vmem:[%s11270_s1 + $0x228] sm:$0xff]  ;;  %v1080_v53 = vadd.f32 %v8375_v4, %v546_v48  ;;  %v547_v4 = vadd.f32 %v7933_v12, %v7729_v7  ;;  %v1166_v7 = vld [vmem:[%s11270_s1 + $0x25a] sm:$0xff] }
 0x1ca   :  { %11357 = vst [vmem:[#allocation59_spill] sm:$0xff] %v8448_v22  ;;  %v8450_v40 = vpop.f32.mrf.mxu1 }
 0x1cb   :  { %v8459_v51 = vpop.f32.mrf.mxu2 }
 0x1cc   :  { %6415 = vmatmul.msk.f32.gmra.mxu0 %vm116_vm1, %v626_v56 }
 0x1cd   :  { %6094 = vmatmul.msk.f32.gmra.mxu1 %vm116_vm1, %v629_v41  ;;  %6286 = vmatmul.msk.f32.gmra.mxu3 %vm116_vm1, %v6220_v57  ;;  %v630_v57 = vld [vmem:[%s11270_s1 + $0x241] sm:$0xff] }
 0x1d0   :  { %v2002_v37 = vpop.f32.mrf.mxu3  ;;  %6161 = vmatmul.msk.f32.gmra.mxu2 %vm116_vm1, %v1164_v58 }
 0x1d1   :  { %v8471_v50 = vadd.f32 %v2002_v37, %v1613_v29  ;;  %v8473_v22 = vpop.f32.mrf.mxu0  ;;  %v1614_v29 = vadd.f32 %v8384_v15, %v1080_v53  ;;  %v6222_v15 = vld [vmem:[%s11270_s1 + $0x230] sm:$0xff]  ;;  %v1081_v53 = vadd.f32 %v8400_v49, %v547_v4  ;;  %v548_v49 = vadd.f32 %v7933_v12, %v7748_v20  ;;  %v1167_v20 = vld [vmem:[%s11270_s1 + $0x262] sm:$0xff] }
 0x1d2   :  { %11358 = vst [vmem:[#allocation60_spill] sm:$0xff] %v8473_v22  ;;  %v8475_v56 = vpop.f32.mrf.mxu1 }
 0x1d3   :  { %v8484_v58 = vpop.f32.mrf.mxu2 }
 0x1d4   :  { %6416 = vmatmul.msk.f32.gmra.mxu0 %vm116_vm1, %v627_v45 }
 0x1d5   :  { %6095 = vmatmul.msk.f32.gmra.mxu1 %vm116_vm1, %v630_v57  ;;  %6287 = vmatmul.msk.f32.gmra.mxu3 %vm116_vm1, %v6221_v10  ;;  %v631_v10 = vld [vmem:[%s11270_s1 + $0x249] sm:$0xff] }
 0x1d8   :  { %v2005_v37 = vpop.f32.mrf.mxu3  ;;  %6162 = vmatmul.msk.f32.gmra.mxu2 %vm116_vm1, %v1165_v0 }
 0x1d9   :  { %v8496_v48 = vadd.f32 %v2005_v37, %v1614_v29  ;;  %v8498_v22 = vpop.f32.mrf.mxu0  ;;  %v1615_v29 = vadd.f32 %v8409_v28, %v1081_v53  ;;  %v6223_v28 = vld [vmem:[%s11270_s1 + $0x240] sm:$0xff]  ;;  %v1082_v53 = vadd.f32 %v8425_v11, %v548_v49  ;;  %v549_v11 = vadd.f32 %v7933_v12, %v7767_v47  ;;  %v1168_v47 = vld [vmem:[%s11270_s1 + $0x272] sm:$0xff] }
 0x1da   :  { %11359 = vst [vmem:[#allocation61_spill] sm:$0xff] %v8498_v22  ;;  %v8500_v45 = vpop.f32.mrf.mxu1 }
 0x1db   :  { %v8509_v0 = vpop.f32.mrf.mxu2 }
 0x1dc   :  { %6417 = vmatmul.msk.f32.gmra.mxu0 %vm116_vm1, %v628_v18 }
 0x1dd   :  { %6096 = vmatmul.msk.f32.gmra.mxu1 %vm116_vm1, %v631_v10  ;;  %6288 = vmatmul.msk.f32.gmra.mxu3 %vm116_vm1, %v6222_v15  ;;  %v632_v15 = vld [vmem:[%s11270_s1 + $0x259] sm:$0xff] }
 0x1e0   :  { %v2008_v37 = vpop.f32.mrf.mxu3  ;;  %6163 = vmatmul.msk.f32.gmra.mxu2 %vm116_vm1, %v1166_v7 }
 0x1e1   :  { %v8521_v4 = vadd.f32 %v2008_v37, %v1615_v29  ;;  %v8523_v22 = vpop.f32.mrf.mxu0  ;;  %v1616_v29 = vadd.f32 %v8434_v43, %v1082_v53  ;;  %v6224_v43 = vld [vmem:[%s11270_s1 + $0x248] sm:$0xff]  ;;  %v1083_v53 = vadd.f32 %v8450_v40, %v549_v11  ;;  %v550_v40 = vadd.f32 %v7933_v12, %v7786_v21  ;;  %v1169_v21 = vld [vmem:[%s11270_s1 + $0x27a] sm:$0xff] }
 0x1e2   :  { %11360 = vst [vmem:[#allocation62_spill] sm:$0xff] %v8523_v22  ;;  %v8525_v18 = vpop.f32.mrf.mxu1 }
 0x1e3   :  { %v8534_v7 = vpop.f32.mrf.mxu2 }
 0x1e4   :  { %6418 = vmatmul.msk.f32.gmra.mxu0 %vm116_vm1, %v629_v41 }
 0x1e5   :  { %6097 = vmatmul.msk.f32.gmra.mxu1 %vm116_vm1, %v632_v15  ;;  %6289 = vmatmul.msk.f32.gmra.mxu3 %vm116_vm1, %v6223_v28  ;;  %v633_v28 = vld [vmem:[%s11270_s1 + $0x261] sm:$0xff] }
 0x1e8   :  { %v2011_v37 = vpop.f32.mrf.mxu3  ;;  %6164 = vmatmul.msk.f32.gmra.mxu2 %vm116_vm1, %v1167_v20 }
 0x1e9   :  { %v8546_v49 = vadd.f32 %v2011_v37, %v1616_v29  ;;  %v8548_v22 = vpop.f32.mrf.mxu0  ;;  %v1617_v29 = vadd.f32 %v8459_v51, %v1083_v53  ;;  %v6225_v51 = vld [vmem:[%s11270_s1 + $0x258] sm:$0xff]  ;;  %v1084_v53 = vadd.f32 %v8475_v56, %v550_v40  ;;  %v555_v56 = vadd.f32 %v7933_v12, %v7633_v35 }
 0x1ea   :  { %11361 = vst [vmem:[#allocation63_spill] sm:$0xff] %v8548_v22  ;;  %v8550_v41 = vpop.f32.mrf.mxu1  ;;  %v551_v40 = vadd.f32 %v7933_v12, %v7805_v59 }
 0x1eb   :  { %v8559_v20 = vpop.f32.mrf.mxu2 }
 0x1ec   :  { %6419 = vmatmul.msk.f32.gmra.mxu0 %vm116_vm1, %v630_v57 }
 0x1ed   :  { %6098 = vmatmul.msk.f32.gmra.mxu1 %vm116_vm1, %v633_v28  ;;  %6290 = vmatmul.msk.f32.gmra.mxu3 %vm116_vm1, %v6224_v43  ;;  %v634_v43 = vld [vmem:[%s11270_s1 + $0x271] sm:$0xff] }
 0x1f0   :  { %v2014_v37 = vpop.f32.mrf.mxu3  ;;  %6165 = vmatmul.msk.f32.gmra.mxu2 %vm116_vm1, %v1168_v47 }
 0x1f1   :  { %v8571_v11 = vadd.f32 %v2014_v37, %v1617_v29  ;;  %v8573_v22 = vpop.f32.mrf.mxu0  ;;  %v1618_v29 = vadd.f32 %v8484_v58, %v1084_v53  ;;  %v6226_v58 = vld [vmem:[%s11270_s1 + $0x260] sm:$0xff]  ;;  %v1085_v53 = vadd.f32 %v8500_v45, %v551_v40  ;;  %v556_v45 = vadd.f32 %v7933_v12, %v7657_v46 }
 0x1f2   :  { %11363 = vst [vmem:[#allocation65_spill] sm:$0xff] %v8573_v22  ;;  %v8575_v57 = vpop.f32.mrf.mxu1 }
 0x1f3   :  { %11362 = vst [vmem:[#allocation64_spill] sm:$0xff] %v8571_v11  ;;  %v8584_v47 = vpop.f32.mrf.mxu2  ;;  %v635_v11 = vld [vmem:[%s11270_s1 + $0x279] sm:$0xff] }
 0x1f4   :  { %6420 = vmatmul.msk.f32.gmra.mxu0 %vm116_vm1, %v631_v10 }
 0x1f5   :  { %6099 = vmatmul.msk.f32.gmra.mxu1 %vm116_vm1, %v634_v43  ;;  %6291 = vmatmul.msk.f32.gmra.mxu3 %vm116_vm1, %v6225_v51 }
 0x1f8   :  { %v2017_v37 = vpop.f32.mrf.mxu3  ;;  %6166 = vmatmul.msk.f32.gmra.mxu2 %vm116_vm1, %v1169_v21 }
 0x1f9   :  { %v8598_v10 = vadd.f32 %v2017_v37, %v1618_v29  ;;  %v8600_v22 = vpop.f32.mrf.mxu0  ;;  %v1170_v29 = vld [vmem:[%s11270_s1 + $0x28a] sm:$0xff]  ;;  %v1619_v37 = vadd.f32 %v8509_v0, %v1085_v53 }
 0x1fa   :  { %11364 = vst [vmem:[#allocation66_spill] sm:$0xff] %v8600_v22  ;;  %v963_v51 = vpop.f32.mrf.mxu1  ;;  %v6227_v0 = vld [vmem:[%s11270_s1 + $0x270] sm:$0xff] }
 0x1fb   :  { %v1089_v21 = vadd.f32 %v963_v51, %v555_v56  ;;  %v1497_v35 = vpop.f32.mrf.mxu2  ;;  %v11365_v56 = vld [vmem:[#allocation35_spill] sm:$0xff] }
 0x1fc   :  { %6421 = vmatmul.msk.f32.gmra.mxu0 %vm116_vm1, %v632_v15  ;;  %v552_v15 = vadd.f32 %v7933_v12, %v11365_v56 }
 0x1fd   :  { %v8610_v59 = vadd.f32 %v1497_v35, %v1089_v21  ;;  %6100 = vmatmul.msk.f32.gmra.mxu1 %vm116_vm1, %v635_v11  ;;  %6292 = vmatmul.msk.f32.gmra.mxu3 %vm116_vm1, %v6226_v58  ;;  %v636_v21 = vld [vmem:[%s11270_s1 + $0x289] sm:$0xff] }
 0x1fe   :  { %v1086_v53 = vadd.f32 %v8525_v18, %v552_v15  ;;  %v11366_v18 = vld [vmem:[#allocation19_spill] sm:$0xff]  ;;  %v11367_v15 = vld [vmem:[#allocation38_spill] sm:$0xff] }
 0x200   :  { %v2020_v22 = vpop.f32.mrf.mxu3  ;;  %6167 = vmatmul.msk.f32.gmra.mxu2 %vm116_vm1, %v1170_v29 }
 0x201   :  { %v8623_v40 = vadd.f32 %v2020_v22, %v1619_v37  ;;  %v8625_v51 = vpop.f32.mrf.mxu0  ;;  %v1171_v22 = vld [vmem:[%s11270_s1 + $0x292] sm:$0xff]  ;;  %v1620_v37 = vadd.f32 %v8534_v7, %v1086_v53 }
 0x202   :  { %v966_v58 = vpop.f32.mrf.mxu1  ;;  %v6228_v7 = vld [vmem:[%s11270_s1 + $0x278] sm:$0xff] }
 0x203   :  { %v1090_v35 = vadd.f32 %v966_v58, %v556_v45  ;;  %v1500_v46 = vpop.f32.mrf.mxu2  ;;  %v557_v45 = vadd.f32 %v7933_v12, %v11366_v18 }
 0x204   :  { %6422 = vmatmul.msk.f32.gmra.mxu0 %vm116_vm1, %v633_v28  ;;  %v553_v28 = vadd.f32 %v7933_v12, %v11367_v15 }
 0x205   :  { %v8635_v29 = vadd.f32 %v1500_v46, %v1090_v35  ;;  %6101 = vmatmul.msk.f32.gmra.mxu1 %vm116_vm1, %v636_v21  ;;  %6293 = vmatmul.msk.f32.gmra.mxu3 %vm116_vm1, %v6227_v0  ;;  %v637_v46 = vld [vmem:[%s11270_s1 + $0x291] sm:$0xff] }
 0x206   :  { %v1087_v53 = vadd.f32 %v8550_v41, %v553_v28  ;;  %v11369_v41 = vld [vmem:[#allocation21_spill] sm:$0xff] }
 0x207   :  { %v11370_v28 = vld [vmem:[#allocation41_spill] sm:$0xff] }
 0x208   :  { %v2023_v56 = vpop.f32.mrf.mxu3  ;;  %6168 = vmatmul.msk.f32.gmra.mxu2 %vm116_vm1, %v1171_v22 }
 0x209   :  { %v8648_v58 = vadd.f32 %v2023_v56, %v1620_v37  ;;  %v8650_v35 = vpop.f32.mrf.mxu0  ;;  %v1172_v37 = vld [vmem:[%s11270_s1 + $0x2a2] sm:$0xff]  ;;  %v1621_v56 = vadd.f32 %v8559_v20, %v1087_v53 }
 0x20a   :  { %11368 = vst [vmem:[#allocation35_spill] sm:$0xff] %v8650_v35  ;;  %v969_v0 = vpop.f32.mrf.mxu1  ;;  %v6229_v20 = vld [vmem:[%s11270_s1 + $0x288] sm:$0xff] }
 0x20b   :  { %v1091_v22 = vadd.f32 %v969_v0, %v557_v45  ;;  %v1503_v18 = vpop.f32.mrf.mxu2  ;;  %v558_v45 = vadd.f32 %v7933_v12, %v11369_v41 }
 0x20c   :  { %6423 = vmatmul.msk.f32.gmra.mxu0 %vm116_vm1, %v634_v43  ;;  %v554_v43 = vadd.f32 %v7933_v12, %v11370_v28 }
 0x20d   :  { %v8660_v15 = vadd.f32 %v1503_v18, %v1091_v22  ;;  %6102 = vmatmul.msk.f32.gmra.mxu1 %vm116_vm1, %v637_v46  ;;  %6294 = vmatmul.msk.f32.gmra.mxu3 %vm116_vm1, %v6228_v7  ;;  %v638_v18 = vld [vmem:[%s11270_s1 + $0x2a1] sm:$0xff] }
 0x20e   :  { %v1088_v53 = vadd.f32 %v8575_v57, %v554_v43  ;;  %v11372_v57 = vld [vmem:[#allocation23_spill] sm:$0xff] }
 0x210   :  { %v2026_v35 = vpop.f32.mrf.mxu3  ;;  %6169 = vmatmul.msk.f32.gmra.mxu2 %vm116_vm1, %v1172_v37 }
 0x211   :  { %v8673_v0 = vadd.f32 %v2026_v35, %v1621_v56  ;;  %v8675_v22 = vpop.f32.mrf.mxu0  ;;  %v1173_v35 = vld [vmem:[%s11270_s1 + $0x2aa] sm:$0xff]  ;;  %v1622_v56 = vadd.f32 %v8584_v47, %v1088_v53 }
 0x212   :  { %11371 = vst [vmem:[#allocation19_spill] sm:$0xff] %v8675_v22  ;;  %v972_v7 = vpop.f32.mrf.mxu1 }
 0x213   :  { %v1092_v37 = vadd.f32 %v972_v7, %v558_v45  ;;  %v1506_v41 = vpop.f32.mrf.mxu2  ;;  %v559_v45 = vadd.f32 %v7933_v12, %v11372_v57  ;;  %v1174_v12 = vld [vmem:[%s11270_s1 + $0x2ba] sm:$0xff] }
 0x214   :  { %6424 = vmatmul.msk.f32.gmra.mxu0 %vm116_vm1, %v635_v11 }
 0x215   :  { %v8685_v28 = vadd.f32 %v1506_v41, %v1092_v37  ;;  %6103 = vmatmul.msk.f32.gmra.mxu1 %vm116_vm1, %v638_v18  ;;  %6295 = vmatmul.msk.f32.gmra.mxu3 %vm116_vm1, %v6229_v20  ;;  %v639_v20 = vld [vmem:[%s11270_s1 + $0x2a9] sm:$0xff] }
 0x216   :  { %v6230_v37 = vld [vmem:[%s11270_s1 + $0x290] sm:$0xff] }
 0x218   :  { %v2029_v22 = vpop.f32.mrf.mxu3  ;;  %6170 = vmatmul.msk.f32.gmra.mxu2 %vm116_vm1, %v1173_v35  ;;  %v8718_v35 = vld [vmem:[%s11272_s3] ss:$0 sm:$0xff] }
 0x219   :  { %v8696_v43 = vadd.f32 %v2029_v22, %v1622_v56  ;;  %v8698_v11 = vpop.f32.mrf.mxu0  ;;  %v11374_v56 = vld [vmem:[#allocation25_spill] sm:$0xff] }
 0x21a   :  { %11373 = vst [vmem:[#allocation38_spill] sm:$0xff] %v8698_v11  ;;  %v975_v7 = vpop.f32.mrf.mxu1 }
 0x21b   :  { %v1093_v47 = vadd.f32 %v975_v7, %v559_v45  ;;  %v1509_v53 = vpop.f32.mrf.mxu2 }
 0x21c   :  { %6425 = vmatmul.msk.f32.gmra.mxu0 %vm116_vm1, %v636_v21  ;;  %v560_v21 = vadd.f32 %v8718_v35, %v11374_v56  ;;  %v11377_v56 = vld [vmem:[#allocation27_spill] sm:$0xff] }
 0x21d   :  { %v8707_v41 = vadd.f32 %v1509_v53, %v1093_v47  ;;  %6104 = vmatmul.msk.f32.gmra.mxu1 %vm116_vm1, %v639_v20  ;;  %6296 = vmatmul.msk.f32.gmra.mxu3 %vm116_vm1, %v6230_v37  ;;  %v640_v37 = vld [vmem:[%s11270_s1 + $0x2b9] sm:$0xff] }
 0x21e   :  { %v6231_v47 = vld [vmem:[%s11270_s1 + $0x2a0] sm:$0xff] }
 0x220   :  { %v2032_v22 = vpop.f32.mrf.mxu3  ;;  %6171 = vmatmul.msk.f32.gmra.mxu2 %vm116_vm1, %v1174_v12 }
 0x221   :  { %v8723_v57 = vadd.f32 %v2032_v22, %v8610_v59  ;;  %v8725_v45 = vpop.f32.mrf.mxu0  ;;  %v1175_v59 = vld [vmem:[%s11270_s1 + $0x2c2] sm:$0xff] }
 0x222   :  { %11376 = vst [vmem:[#allocation41_spill] sm:$0xff] %v8725_v45  ;;  %v978_v7 = vpop.f32.mrf.mxu1  ;;  %v561_v45 = vadd.f32 %v8718_v35, %v11377_v56  ;;  %v11380_v56 = vld [vmem:[#allocation29_spill] sm:$0xff] }
 0x223   :  { %11375 = vst [vmem:[#allocation21_spill] sm:$0xff] %v8723_v57  ;;  %v1094_v53 = vadd.f32 %v978_v7, %v560_v21  ;;  %v1512_v12 = vpop.f32.mrf.mxu2 }
 0x224   :  { %6426 = vmatmul.msk.f32.gmra.mxu0 %vm116_vm1, %v637_v46 }
 0x225   :  { %v8734_v11 = vadd.f32 %v1512_v12, %v1094_v53  ;;  %6105 = vmatmul.msk.f32.gmra.mxu1 %vm116_vm1, %v640_v37  ;;  %6297 = vmatmul.msk.f32.gmra.mxu3 %vm116_vm1, %v6231_v47  ;;  %v641_v47 = vld [vmem:[%s11270_s1 + $0x2c1] sm:$0xff] }
 0x226   :  { %v6232_v53 = vld [vmem:[%s11270_s1 + $0x2a8] sm:$0xff] }
 0x228   :  { %v2035_v22 = vpop.f32.mrf.mxu3  ;;  %6172 = vmatmul.msk.f32.gmra.mxu2 %vm116_vm1, %v1175_v59 }
 0x229   :  { %v8745_v21 = vadd.f32 %v2035_v22, %v8635_v29  ;;  %v8747_v46 = vpop.f32.mrf.mxu0  ;;  %v1176_v29 = vld [vmem:[%s11270_s1 + $0x2d2] sm:$0xff] }
 0x22a   :  { %11379 = vst [vmem:[#allocation25_spill] sm:$0xff] %v8747_v46  ;;  %v981_v7 = vpop.f32.mrf.mxu1  ;;  %v562_v46 = vadd.f32 %v8718_v35, %v11380_v56  ;;  %v11383_v56 = vld [vmem:[#allocation31_spill] sm:$0xff] }
 0x22b   :  { %11378 = vst [vmem:[#allocation23_spill] sm:$0xff] %v8745_v21  ;;  %v1095_v12 = vadd.f32 %v981_v7, %v561_v45  ;;  %v1515_v57 = vpop.f32.mrf.mxu2  ;;  %v642_v7 = vld [vmem:[%s11270_s1 + $0x2d1] sm:$0xff] }
 0x22c   :  { %6427 = vmatmul.msk.f32.gmra.mxu0 %vm116_vm1, %v638_v18 }
 0x22d   :  { %v8756_v59 = vadd.f32 %v1515_v57, %v1095_v12  ;;  %6106 = vmatmul.msk.f32.gmra.mxu1 %vm116_vm1, %v641_v47  ;;  %6298 = vmatmul.msk.f32.gmra.mxu3 %vm116_vm1, %v6232_v53  ;;  %v6233_v53 = vld [vmem:[%s11270_s1 + $0x2b8] sm:$0xff] }
 0x230   :  { %v2038_v22 = vpop.f32.mrf.mxu3  ;;  %6173 = vmatmul.msk.f32.gmra.mxu2 %vm116_vm1, %v1176_v29 }
 0x231   :  { %v8767_v45 = vadd.f32 %v2038_v22, %v8660_v15  ;;  %v8769_v18 = vpop.f32.mrf.mxu0  ;;  %v1177_v15 = vld [vmem:[%s11270_s1 + $0x2da] sm:$0xff] }
 0x232   :  { %11382 = vst [vmem:[#allocation29_spill] sm:$0xff] %v8769_v18  ;;  %v984_v57 = vpop.f32.mrf.mxu1  ;;  %v563_v18 = vadd.f32 %v8718_v35, %v11383_v56  ;;  %v11386_v56 = vld [vmem:[#allocation33_spill] sm:$0xff] }
 0x233   :  { %11381 = vst [vmem:[#allocation27_spill] sm:$0xff] %v8767_v45  ;;  %v1096_v12 = vadd.f32 %v984_v57, %v562_v46  ;;  %v1518_v21 = vpop.f32.mrf.mxu2  ;;  %v643_v57 = vld [vmem:[%s11270_s1 + $0x2d9] sm:$0xff] }
 0x234   :  { %6428 = vmatmul.msk.f32.gmra.mxu0 %vm116_vm1, %v639_v20 }
 0x235   :  { %v8778_v29 = vadd.f32 %v1518_v21, %v1096_v12  ;;  %6107 = vmatmul.msk.f32.gmra.mxu1 %vm116_vm1, %v642_v7  ;;  %6299 = vmatmul.msk.f32.gmra.mxu3 %vm116_vm1, %v6233_v53  ;;  %v6234_v53 = vld [vmem:[%s11270_s1 + $0x2c0] sm:$0xff] }
 0x238   :  { %v2041_v22 = vpop.f32.mrf.mxu3  ;;  %6174 = vmatmul.msk.f32.gmra.mxu2 %vm116_vm1, %v1177_v15 }
 0x239   :  { %v8789_v46 = vadd.f32 %v2041_v22, %v8685_v28  ;;  %v8791_v20 = vpop.f32.mrf.mxu0  ;;  %v1178_v28 = vld [vmem:[%s11270_s1 + $0x2ea] sm:$0xff] }
 0x23a   :  { %11385 = vst [vmem:[#allocation67_spill] sm:$0xff] %v8791_v20  ;;  %v987_v21 = vpop.f32.mrf.mxu1  ;;  %v564_v20 = vadd.f32 %v8718_v35, %v11386_v56  ;;  %v11389_v56 = vld [vmem:[#allocation36_spill] sm:$0xff] }
 0x23b   :  { %11384 = vst [vmem:[#allocation31_spill] sm:$0xff] %v8789_v46  ;;  %v1097_v12 = vadd.f32 %v987_v21, %v563_v18  ;;  %v1521_v45 = vpop.f32.mrf.mxu2  ;;  %v644_v21 = vld [vmem:[%s11270_s1 + $0x2e9] sm:$0xff] }
 0x23c   :  { %6429 = vmatmul.msk.f32.gmra.mxu0 %vm116_vm1, %v640_v37 }
 0x23d   :  { %v8800_v15 = vadd.f32 %v1521_v45, %v1097_v12  ;;  %6108 = vmatmul.msk.f32.gmra.mxu1 %vm116_vm1, %v643_v57  ;;  %6300 = vmatmul.msk.f32.gmra.mxu3 %vm116_vm1, %v6234_v53  ;;  %v6235_v53 = vld [vmem:[%s11270_s1 + $0x2d0] sm:$0xff] }
 0x240   :  { %v2044_v22 = vpop.f32.mrf.mxu3  ;;  %6175 = vmatmul.msk.f32.gmra.mxu2 %vm116_vm1, %v1178_v28 }
 0x241   :  { %v8811_v18 = vadd.f32 %v2044_v22, %v8707_v41  ;;  %v8813_v37 = vpop.f32.mrf.mxu0  ;;  %v1179_v41 = vld [vmem:[%s11270_s1 + $0x2f2] sm:$0xff] }
 0x242   :  { %11388 = vst [vmem:[#allocation68_spill] sm:$0xff] %v8813_v37  ;;  %v990_v45 = vpop.f32.mrf.mxu1  ;;  %v565_v37 = vadd.f32 %v8718_v35, %v11389_v56  ;;  %v11392_v56 = vld [vmem:[#allocation39_spill] sm:$0xff] }
 0x243   :  { %11387 = vst [vmem:[#allocation33_spill] sm:$0xff] %v8811_v18  ;;  %v1098_v12 = vadd.f32 %v990_v45, %v564_v20  ;;  %v1524_v46 = vpop.f32.mrf.mxu2  ;;  %v645_v45 = vld [vmem:[%s11270_s1 + $0x2f1] sm:$0xff] }
 0x244   :  { %6430 = vmatmul.msk.f32.gmra.mxu0 %vm116_vm1, %v641_v47 }
 0x245   :  { %v8822_v28 = vadd.f32 %v1524_v46, %v1098_v12  ;;  %6109 = vmatmul.msk.f32.gmra.mxu1 %vm116_vm1, %v644_v21  ;;  %6301 = vmatmul.msk.f32.gmra.mxu3 %vm116_vm1, %v6235_v53  ;;  %v6236_v53 = vld [vmem:[%s11270_s1 + $0x2d8] sm:$0xff] }
 0x248   :  { %v2047_v22 = vpop.f32.mrf.mxu3  ;;  %6176 = vmatmul.msk.f32.gmra.mxu2 %vm116_vm1, %v1179_v41 }
 0x249   :  { %v8833_v20 = vadd.f32 %v2047_v22, %v8734_v11  ;;  %v8835_v47 = vpop.f32.mrf.mxu0  ;;  %v1180_v11 = vld [vmem:[%s11270_s1 + $0x302] sm:$0xff] }
 0x24a   :  { %11391 = vst [vmem:[#allocation69_spill] sm:$0xff] %v8835_v47  ;;  %v993_v46 = vpop.f32.mrf.mxu1  ;;  %v566_v47 = vadd.f32 %v8718_v35, %v11392_v56  ;;  %v11395_v56 = vld [vmem:[#allocation42_spill] sm:$0xff] }
 0x24b   :  { %11390 = vst [vmem:[#allocation36_spill] sm:$0xff] %v8833_v20  ;;  %v1099_v12 = vadd.f32 %v993_v46, %v565_v37  ;;  %v1527_v18 = vpop.f32.mrf.mxu2  ;;  %v646_v46 = vld [vmem:[%s11270_s1 + $0x301] sm:$0xff] }
 0x24c   :  { %6431 = vmatmul.msk.f32.gmra.mxu0 %vm116_vm1, %v642_v7 }
 0x24d   :  { %v8844_v41 = vadd.f32 %v1527_v18, %v1099_v12  ;;  %6110 = vmatmul.msk.f32.gmra.mxu1 %vm116_vm1, %v645_v45  ;;  %6302 = vmatmul.msk.f32.gmra.mxu3 %vm116_vm1, %v6236_v53  ;;  %v6237_v53 = vld [vmem:[%s11270_s1 + $0x2e8] sm:$0xff] }
 0x250   :  { %v2050_v22 = vpop.f32.mrf.mxu3  ;;  %6177 = vmatmul.msk.f32.gmra.mxu2 %vm116_vm1, %v1180_v11 }
 0x251   :  { %v8855_v37 = vadd.f32 %v2050_v22, %v8756_v59  ;;  %v8857_v7 = vpop.f32.mrf.mxu0  ;;  %v1181_v59 = vld [vmem:[%s11270_s1 + $0x30a] sm:$0xff] }
 0x252   :  { %11394 = vst [vmem:[#allocation70_spill] sm:$0xff] %v8857_v7  ;;  %v996_v18 = vpop.f32.mrf.mxu1  ;;  %v567_v7 = vadd.f32 %v8718_v35, %v11395_v56  ;;  %v11398_v56 = vld [vmem:[#allocation16_spill] sm:$0xff] }
 0x253   :  { %11393 = vst [vmem:[#allocation39_spill] sm:$0xff] %v8855_v37  ;;  %v1100_v12 = vadd.f32 %v996_v18, %v566_v47  ;;  %v1530_v20 = vpop.f32.mrf.mxu2  ;;  %v647_v18 = vld [vmem:[%s11270_s1 + $0x309] sm:$0xff] }
 0x254   :  { %6432 = vmatmul.msk.f32.gmra.mxu0 %vm116_vm1, %v643_v57 }
 0x255   :  { %v8866_v11 = vadd.f32 %v1530_v20, %v1100_v12  ;;  %6111 = vmatmul.msk.f32.gmra.mxu1 %vm116_vm1, %v646_v46  ;;  %6303 = vmatmul.msk.f32.gmra.mxu3 %vm116_vm1, %v6237_v53  ;;  %v6238_v53 = vld [vmem:[%s11270_s1 + $0x2f0] sm:$0xff] }
 0x258   :  { %v2053_v22 = vpop.f32.mrf.mxu3  ;;  %6178 = vmatmul.msk.f32.gmra.mxu2 %vm116_vm1, %v1181_v59 }
 0x259   :  { %v8877_v47 = vadd.f32 %v2053_v22, %v8778_v29  ;;  %v8879_v57 = vpop.f32.mrf.mxu0  ;;  %v1182_v29 = vld [vmem:[%s11270_s1 + $0x31a] sm:$0xff] }
 0x25a   :  { %11397 = vst [vmem:[#allocation71_spill] sm:$0xff] %v8879_v57  ;;  %v999_v20 = vpop.f32.mrf.mxu1  ;;  %v568_v57 = vadd.f32 %v8718_v35, %v11398_v56  ;;  %v11401_v56 = vld [vmem:[#allocation17_spill] sm:$0xff] }
 0x25b   :  { %11396 = vst [vmem:[#allocation42_spill] sm:$0xff] %v8877_v47  ;;  %v1101_v12 = vadd.f32 %v999_v20, %v567_v7  ;;  %v1533_v37 = vpop.f32.mrf.mxu2  ;;  %v648_v20 = vld [vmem:[%s11270_s1 + $0x319] sm:$0xff] }
 0x25c   :  { %6433 = vmatmul.msk.f32.gmra.mxu0 %vm116_vm1, %v644_v21 }
 0x25d   :  { %v8888_v59 = vadd.f32 %v1533_v37, %v1101_v12  ;;  %6112 = vmatmul.msk.f32.gmra.mxu1 %vm116_vm1, %v647_v18  ;;  %6304 = vmatmul.msk.f32.gmra.mxu3 %vm116_vm1, %v6238_v53  ;;  %v6239_v53 = vld [vmem:[%s11270_s1 + $0x300] sm:$0xff] }
 0x260   :  { %v2056_v22 = vpop.f32.mrf.mxu3  ;;  %6179 = vmatmul.msk.f32.gmra.mxu2 %vm116_vm1, %v1182_v29 }
 0x261   :  { %v8899_v7 = vadd.f32 %v2056_v22, %v8800_v15  ;;  %v8901_v21 = vpop.f32.mrf.mxu0  ;;  %v1183_v15 = vld [vmem:[%s11270_s1 + $0x322] sm:$0xff] }
 0x262   :  { %11400 = vst [vmem:[#allocation72_spill] sm:$0xff] %v8901_v21  ;;  %v1002_v37 = vpop.f32.mrf.mxu1  ;;  %v569_v21 = vadd.f32 %v8718_v35, %v11401_v56  ;;  %v11404_v56 = vld [vmem:[#allocation18_spill] sm:$0xff] }
 0x263   :  { %11399 = vst [vmem:[#allocation16_spill] sm:$0xff] %v8899_v7  ;;  %v1102_v12 = vadd.f32 %v1002_v37, %v568_v57  ;;  %v1536_v47 = vpop.f32.mrf.mxu2  ;;  %v649_v37 = vld [vmem:[%s11270_s1 + $0x321] sm:$0xff] }
 0x264   :  { %6434 = vmatmul.msk.f32.gmra.mxu0 %vm116_vm1, %v645_v45 }
 0x265   :  { %v8910_v29 = vadd.f32 %v1536_v47, %v1102_v12  ;;  %6113 = vmatmul.msk.f32.gmra.mxu1 %vm116_vm1, %v648_v20  ;;  %6305 = vmatmul.msk.f32.gmra.mxu3 %vm116_vm1, %v6239_v53  ;;  %v6240_v53 = vld [vmem:[%s11270_s1 + $0x308] sm:$0xff] }
 0x268   :  { %v2059_v22 = vpop.f32.mrf.mxu3  ;;  %6180 = vmatmul.msk.f32.gmra.mxu2 %vm116_vm1, %v1183_v15 }
 0x269   :  { %v8921_v57 = vadd.f32 %v2059_v22, %v8822_v28  ;;  %v8923_v45 = vpop.f32.mrf.mxu0  ;;  %v6571_v28 = vld [vmem:[%s11270_s1 + $0x30] sm:$0xff] }
 0x26a   :  { %11403 = vst [vmem:[#allocation73_spill] sm:$0xff] %v8923_v45  ;;  %v1005_v47 = vpop.f32.mrf.mxu1  ;;  %v570_v45 = vadd.f32 %v8718_v35, %v11404_v56  ;;  %v11407_v56 = vld [vmem:[#allocation20_spill] sm:$0xff] }
 0x26b   :  { %11402 = vst [vmem:[#allocation17_spill] sm:$0xff] %v8921_v57  ;;  %v1103_v12 = vadd.f32 %v1005_v47, %v569_v21  ;;  %v1539_v7 = vpop.f32.mrf.mxu2  ;;  %v6241_v47 = vld [vmem:[%s11270_s1 + $0x318] sm:$0xff] }
 0x26c   :  { %6435 = vmatmul.msk.f32.gmra.mxu0 %vm116_vm1, %v646_v46 }
 0x26d   :  { %v8932_v15 = vadd.f32 %v1539_v7, %v1103_v12  ;;  %6114 = vmatmul.msk.f32.gmra.mxu1 %vm116_vm1, %v649_v37  ;;  %6306 = vmatmul.msk.f32.gmra.mxu3 %vm116_vm1, %v6240_v53  ;;  %v6441_v53 = vld [vmem:[%s11270_s1 + $0x1a] sm:$0xff] }
 0x270   :  { %v2062_v22 = vpop.f32.mrf.mxu3  ;;  %6637 = vmatmul.msk.f32.vlgmr.msra.gmra.mxu2 %vm116_vm1, %v6571_v28 }
 0x271   :  { %v8943_v21 = vadd.f32 %v2062_v22, %v8844_v41  ;;  %v8945_v46 = vpop.f32.mrf.mxu0  ;;  %v6572_v41 = vld [vmem:[%s11270_s1 + $0x38] sm:$0xff] }
 0x272   :  { %11406 = vst [vmem:[#allocation74_spill] sm:$0xff] %v8945_v46  ;;  %v1008_v7 = vpop.f32.mrf.mxu1  ;;  %v571_v46 = vadd.f32 %v8718_v35, %v11407_v56  ;;  %v11410_v56 = vld [vmem:[#allocation22_spill] sm:$0xff] }
 0x273   :  { %11405 = vst [vmem:[#allocation18_spill] sm:$0xff] %v8943_v21  ;;  %v1104_v12 = vadd.f32 %v1008_v7, %v570_v45  ;;  %v1542_v57 = vpop.f32.mrf.mxu2  ;;  %v6242_v7 = vld [vmem:[%s11270_s1 + $0x320] sm:$0xff] }
 0x274   :  { %6436 = vmatmul.msk.f32.gmra.mxu0 %vm116_vm1, %v647_v18 }
 0x275   :  { %v8954_v28 = vadd.f32 %v1542_v57, %v1104_v12  ;;  %6307 = vmatmul.msk.f32.gmra.mxu3 %vm116_vm1, %v6241_v47  ;;  %6507 = vmatmul.msk.f32.vlgmr.msra.gmra.mxu1 %vm116_vm1, %v6441_v53  ;;  %v6442_v47 = vld [vmem:[%s11270_s1 + $0x22] sm:$0xff] }
 0x278   :  { %v2065_v22 = vpop.f32.mrf.mxu3  ;;  %6638 = vmatmul.msk.f32.gmra.mxu2 %vm116_vm1, %v6572_v41 }
 0x279   :  { %v8965_v45 = vadd.f32 %v2065_v22, %v8866_v11  ;;  %v8967_v18 = vpop.f32.mrf.mxu0  ;;  %v6573_v11 = vld [vmem:[%s11270_s1 + $0x48] sm:$0xff] }
 0x27a   :  { %11409 = vst [vmem:[#allocation75_spill] sm:$0xff] %v8967_v18  ;;  %v1011_v57 = vpop.f32.mrf.mxu1  ;;  %v572_v18 = vadd.f32 %v8718_v35, %v11410_v56  ;;  %v11413_v56 = vld [vmem:[#allocation24_spill] sm:$0xff] }
 0x27b   :  { %11408 = vst [vmem:[#allocation20_spill] sm:$0xff] %v8965_v45  ;;  %v1105_v53 = vadd.f32 %v1011_v57, %v571_v46  ;;  %v1545_v12 = vpop.f32.mrf.mxu2 }
 0x27c   :  { %6437 = vmatmul.msk.f32.gmra.mxu0 %vm116_vm1, %v648_v20 }
 0x27d   :  { %v8976_v41 = vadd.f32 %v1545_v12, %v1105_v53  ;;  %6308 = vmatmul.msk.f32.gmra.mxu3 %vm116_vm1, %v6242_v7  ;;  %6508 = vmatmul.msk.f32.gmra.mxu1 %vm116_vm1, %v6442_v47  ;;  %v6243_v7 = vld [vmem:[%s11270_s1 + $0x330] sm:$0xff] }
 0x27e   :  { %v6443_v47 = vld [vmem:[%s11270_s1 + $0x32] sm:$0xff] }
 0x280   :  { %v2068_v22 = vpop.f32.mrf.mxu3  ;;  %6639 = vmatmul.msk.f32.gmra.mxu2 %vm116_vm1, %v6573_v11 }
 0x281   :  { %v8987_v46 = vadd.f32 %v2068_v22, %v8888_v59  ;;  %v8989_v20 = vpop.f32.mrf.mxu0  ;;  %v6574_v59 = vld [vmem:[%s11270_s1 + $0x50] sm:$0xff] }
 0x282   :  { %11412 = vst [vmem:[#allocation76_spill] sm:$0xff] %v8989_v20  ;;  %v1014_v57 = vpop.f32.mrf.mxu1  ;;  %v573_v20 = vadd.f32 %v8718_v35, %v11413_v56 }
 0x283   :  { %11411 = vst [vmem:[#allocation22_spill] sm:$0xff] %v8987_v46  ;;  %v1106_v53 = vadd.f32 %v1014_v57, %v572_v18  ;;  %v1548_v12 = vpop.f32.mrf.mxu2  ;;  %v6373_v57 = vld [vmem:[%s11270_s1 + $0x331] sm:$0xff] }
 0x284   :  { %6438 = vmatmul.msk.f32.gmra.mxu0 %vm116_vm1, %v649_v37 }
 0x285   :  { %v8998_v11 = vadd.f32 %v1548_v12, %v1106_v53  ;;  %6309 = vmatmul.msk.f32.gmra.mxu3 %vm116_vm1, %v6243_v7  ;;  %6509 = vmatmul.msk.f32.gmra.mxu1 %vm116_vm1, %v6443_v47  ;;  %v6244_v53 = vld [vmem:[%s11270_s1 + $0x338] sm:$0xff] }
 0x286   :  { %v6444_v12 = vld [vmem:[%s11270_s1 + $0x3a] sm:$0xff] }
 0x288   :  { %v2071_v22 = vpop.f32.mrf.mxu3  ;;  %6640 = vmatmul.msk.f32.gmra.mxu2 %vm116_vm1, %v6574_v59 }
 0x289   :  { %v9009_v18 = vadd.f32 %v2071_v22, %v8910_v29  ;;  %v9011_v37 = vpop.f32.mrf.mxu0  ;;  %v6575_v22 = vld [vmem:[%s11270_s1 + $0x60] sm:$0xff] }
 0x28a   :  { %11415 = vst [vmem:[#allocation77_spill] sm:$0xff] %v9011_v37  ;;  %v1017_v7 = vpop.f32.mrf.mxu1 }
 0x28b   :  { %11414 = vst [vmem:[#allocation24_spill] sm:$0xff] %v9009_v18  ;;  %v1107_v59 = vadd.f32 %v1017_v7, %v573_v20  ;;  %v1551_v56 = vpop.f32.mrf.mxu2  ;;  %v11416_v18 = vld [vmem:[#allocation26_spill] sm:$0xff] }
 0x28c   :  { %6439 = vmatmul.msk.f32.gmra.mxu0 %vm116_vm1, %v6373_v57  ;;  %v574_v46 = vadd.f32 %v8718_v35, %v11416_v18  ;;  %v6374_v7 = vld [vmem:[%s11270_s1 + $0x339] sm:$0xff] }
 0x28d   :  { %v9023_v29 = vadd.f32 %v1551_v56, %v1107_v59  ;;  %6310 = vmatmul.msk.f32.gmra.mxu3 %vm116_vm1, %v6244_v53  ;;  %6510 = vmatmul.msk.f32.gmra.mxu1 %vm116_vm1, %v6444_v12  ;;  %v6445_v59 = vld [vmem:[%s11270_s1 + $0x4a] sm:$0xff] }
 0x28e   :  { %v6701_v56 = vld [vmem:[%s11270_s1 + $0x31] sm:$0xff] }
 0x290   :  { %v2074_v37 = vpop.f32.mrf.mxu3  ;;  %6641 = vmatmul.msk.f32.gmra.mxu2 %vm116_vm1, %v6575_v22 }
 0x291   :  { %v9034_v20 = vadd.f32 %v2074_v37, %v8932_v15  ;;  %v9036_v57 = vpop.f32.mrf.mxu0  ;;  %v6576_v37 = vld [vmem:[%s11270_s1 + $0x68] sm:$0xff] }
 0x292   :  { %11418 = vst [vmem:[#allocation78_spill] sm:$0xff] %v9036_v57  ;;  %v1020_v53 = vpop.f32.mrf.mxu1 }
 0x293   :  { %11417 = vst [vmem:[#allocation26_spill] sm:$0xff] %v9034_v20  ;;  %v1108_v22 = vadd.f32 %v1020_v53, %v574_v46  ;;  %v1554_v18 = vpop.f32.mrf.mxu2  ;;  %v11419_v20 = vld [vmem:[#allocation28_spill] sm:$0xff] }
 0x294   :  { %6440 = vmatmul.msk.f32.gmra.mxu0 %vm116_vm1, %v6374_v7  ;;  %v575_v45 = vadd.f32 %v8718_v35, %v11419_v20 }
 0x295   :  { %v9048_v15 = vadd.f32 %v1554_v18, %v1108_v22  ;;  %6511 = vmatmul.msk.f32.gmra.mxu1 %vm116_vm1, %v6445_v59  ;;  %6767 = vmatmul.msk.f32.vlgmr.msra.gmra.mxu3 %vm116_vm1, %v6701_v56  ;;  %v6446_v56 = vld [vmem:[%s11270_s1 + $0x52] sm:$0xff] }
 0x296   :  { %v6702_v22 = vld [vmem:[%s11270_s1 + $0x39] sm:$0xff] }
 0x298   :  { %v2077_v57 = vpop.f32.mrf.mxu3  ;;  %6642 = vmatmul.msk.f32.gmra.mxu2 %vm116_vm1, %v6576_v37 }
 0x299   :  { %v9059_v46 = vadd.f32 %v2077_v57, %v8954_v28  ;;  %v9061_v7 = vpop.f32.mrf.mxu0  ;;  %v6577_v28 = vld [vmem:[%s11270_s1 + $0x78] sm:$0xff] }
 0x29a   :  { %11421 = vst [vmem:[#allocation79_spill] sm:$0xff] %v9061_v7  ;;  %v1023_v53 = vpop.f32.mrf.mxu1  ;;  %v11422_v57 = vld [vmem:[#allocation30_spill] sm:$0xff] }
 0x29b   :  { %11420 = vst [vmem:[#allocation28_spill] sm:$0xff] %v9059_v46  ;;  %v1109_v18 = vadd.f32 %v1023_v53, %v575_v45  ;;  %v1557_v21 = vpop.f32.mrf.mxu2  ;;  %v576_v7 = vadd.f32 %v8718_v35, %v11422_v57  ;;  %v6447_v53 = vld [vmem:[%s11270_s1 + $0x62] sm:$0xff]  ;;  %v11425_v57 = vld [vmem:[#allocation32_spill] sm:$0xff] }
 0x29c   :  { %6897 = vmatmul.msk.f32.vlgmr.msra.gmra.mxu0 %vm116_vm1, %v6443_v47 }
 0x29d   :  { %v9070_v37 = vadd.f32 %v1557_v21, %v1109_v18  ;;  %6512 = vmatmul.msk.f32.gmra.mxu1 %vm116_vm1, %v6446_v56  ;;  %6768 = vmatmul.msk.f32.gmra.mxu3 %vm116_vm1, %v6702_v22  ;;  %v6703_v22 = vld [vmem:[%s11270_s1 + $0x49] sm:$0xff] }
 0x2a0   :  { %v2080_v20 = vpop.f32.mrf.mxu3  ;;  %6643 = vmatmul.msk.f32.gmra.mxu2 %vm116_vm1, %v6577_v28 }
 0x2a1   :  { %v9081_v45 = vadd.f32 %v2080_v20, %v8976_v41  ;;  %v9083_v47 = vpop.f32.mrf.mxu0  ;;  %v6578_v41 = vld [vmem:[%s11270_s1 + $0x80] sm:$0xff] }
 0x2a2   :  { %11424 = vst [vmem:[#allocation80_spill] sm:$0xff] %v9083_v47  ;;  %v1026_v21 = vpop.f32.mrf.mxu1  ;;  %v577_v47 = vadd.f32 %v8718_v35, %v11425_v57  ;;  %v11428_v57 = vld [vmem:[#allocation34_spill] sm:$0xff] }
 0x2a3   :  { %11423 = vst [vmem:[#allocation30_spill] sm:$0xff] %v9081_v45  ;;  %v1110_v18 = vadd.f32 %v1026_v21, %v576_v7  ;;  %v1560_v46 = vpop.f32.mrf.mxu2  ;;  %v6448_v21 = vld [vmem:[%s11270_s1 + $0x6a] sm:$0xff] }
 0x2a4   :  { %6898 = vmatmul.msk.f32.gmra.mxu0 %vm116_vm1, %v6444_v12 }
 0x2a5   :  { %v9092_v28 = vadd.f32 %v1560_v46, %v1110_v18  ;;  %6513 = vmatmul.msk.f32.gmra.mxu1 %vm116_vm1, %v6447_v53  ;;  %6769 = vmatmul.msk.f32.gmra.mxu3 %vm116_vm1, %v6703_v22  ;;  %v6704_v22 = vld [vmem:[%s11270_s1 + $0x51] sm:$0xff] }
 0x2a8   :  { %v2083_v20 = vpop.f32.mrf.mxu3  ;;  %6644 = vmatmul.msk.f32.gmra.mxu2 %vm116_vm1, %v6578_v41 }
 0x2a9   :  { %v9103_v7 = vadd.f32 %v2083_v20, %v8998_v11  ;;  %v9105_v12 = vpop.f32.mrf.mxu0  ;;  %v6579_v11 = vld [vmem:[%s11270_s1 + $0x90] sm:$0xff] }
 0x2aa   :  { %11427 = vst [vmem:[#allocation81_spill] sm:$0xff] %v9105_v12  ;;  %v1029_v46 = vpop.f32.mrf.mxu1  ;;  %v578_v12 = vadd.f32 %v8718_v35, %v11428_v57  ;;  %v11431_v57 = vld [vmem:[#allocation37_spill] sm:$0xff] }
 0x2ab   :  { %11426 = vst [vmem:[#allocation32_spill] sm:$0xff] %v9103_v7  ;;  %v1111_v18 = vadd.f32 %v1029_v46, %v577_v47  ;;  %v1563_v45 = vpop.f32.mrf.mxu2  ;;  %v6449_v46 = vld [vmem:[%s11270_s1 + $0x7a] sm:$0xff] }
 0x2ac   :  { %6899 = vmatmul.msk.f32.gmra.mxu0 %vm116_vm1, %v6445_v59 }
 0x2ad   :  { %v9114_v41 = vadd.f32 %v1563_v45, %v1111_v18  ;;  %6514 = vmatmul.msk.f32.gmra.mxu1 %vm116_vm1, %v6448_v21  ;;  %6770 = vmatmul.msk.f32.gmra.mxu3 %vm116_vm1, %v6704_v22  ;;  %v6705_v22 = vld [vmem:[%s11270_s1 + $0x61] sm:$0xff] }
 0x2b0   :  { %v2086_v20 = vpop.f32.mrf.mxu3  ;;  %6645 = vmatmul.msk.f32.gmra.mxu2 %vm116_vm1, %v6579_v11 }
 0x2b1   :  { %v9125_v47 = vadd.f32 %v2086_v20, %v9023_v29  ;;  %v9127_v59 = vpop.f32.mrf.mxu0  ;;  %v6580_v29 = vld [vmem:[%s11270_s1 + $0x98] sm:$0xff] }
 0x2b2   :  { %11430 = vst [vmem:[#allocation82_spill] sm:$0xff] %v9127_v59  ;;  %v1032_v45 = vpop.f32.mrf.mxu1  ;;  %v579_v59 = vadd.f32 %v8718_v35, %v11431_v57  ;;  %v11434_v57 = vld [vmem:[#allocation40_spill] sm:$0xff] }
 0x2b3   :  { %11429 = vst [vmem:[#allocation34_spill] sm:$0xff] %v9125_v47  ;;  %v1112_v18 = vadd.f32 %v1032_v45, %v578_v12  ;;  %v1566_v7 = vpop.f32.mrf.mxu2  ;;  %v6450_v45 = vld [vmem:[%s11270_s1 + $0x82] sm:$0xff] }
 0x2b4   :  { %6900 = vmatmul.msk.f32.gmra.mxu0 %vm116_vm1, %v6446_v56 }
 0x2b5   :  { %v9136_v11 = vadd.f32 %v1566_v7, %v1112_v18  ;;  %6515 = vmatmul.msk.f32.gmra.mxu1 %vm116_vm1, %v6449_v46  ;;  %6771 = vmatmul.msk.f32.gmra.mxu3 %vm116_vm1, %v6705_v22  ;;  %v6706_v22 = vld [vmem:[%s11270_s1 + $0x69] sm:$0xff] }
 0x2b8   :  { %v2089_v20 = vpop.f32.mrf.mxu3  ;;  %6646 = vmatmul.msk.f32.gmra.mxu2 %vm116_vm1, %v6580_v29 }
 0x2b9   :  { %v9147_v12 = vadd.f32 %v2089_v20, %v9048_v15  ;;  %v9149_v56 = vpop.f32.mrf.mxu0  ;;  %v6581_v15 = vld [vmem:[%s11270_s1 + $0xa8] sm:$0xff] }
 0x2ba   :  { %11433 = vst [vmem:[#allocation83_spill] sm:$0xff] %v9149_v56  ;;  %v1035_v7 = vpop.f32.mrf.mxu1  ;;  %v580_v56 = vadd.f32 %v8718_v35, %v11434_v57  ;;  %v11437_v57 = vld [vmem:[#allocation43_spill] sm:$0xff] }
 0x2bb   :  { %11432 = vst [vmem:[#allocation37_spill] sm:$0xff] %v9147_v12  ;;  %v1113_v18 = vadd.f32 %v1035_v7, %v579_v59  ;;  %v1569_v47 = vpop.f32.mrf.mxu2  ;;  %v6451_v7 = vld [vmem:[%s11270_s1 + $0x92] sm:$0xff] }
 0x2bc   :  { %6901 = vmatmul.msk.f32.gmra.mxu0 %vm116_vm1, %v6447_v53 }
 0x2bd   :  { %v9158_v29 = vadd.f32 %v1569_v47, %v1113_v18  ;;  %6516 = vmatmul.msk.f32.gmra.mxu1 %vm116_vm1, %v6450_v45  ;;  %6772 = vmatmul.msk.f32.gmra.mxu3 %vm116_vm1, %v6706_v22  ;;  %v6707_v22 = vld [vmem:[%s11270_s1 + $0x79] sm:$0xff] }
 0x2c0   :  { %v2092_v20 = vpop.f32.mrf.mxu3  ;;  %6647 = vmatmul.msk.f32.gmra.mxu2 %vm116_vm1, %v6581_v15 }
 0x2c1   :  { %v9169_v59 = vadd.f32 %v2092_v20, %v9070_v37  ;;  %v9171_v53 = vpop.f32.mrf.mxu0  ;;  %v6582_v37 = vld [vmem:[%s11270_s1 + $0xb0] sm:$0xff] }
 0x2c2   :  { %11436 = vst [vmem:[#allocation84_spill] sm:$0xff] %v9171_v53  ;;  %v1038_v47 = vpop.f32.mrf.mxu1  ;;  %v581_v53 = vadd.f32 %v8718_v35, %v11437_v57  ;;  %v11440_v57 = vld [vmem:[#allocation44_spill] sm:$0xff] }
 0x2c3   :  { %11435 = vst [vmem:[#allocation40_spill] sm:$0xff] %v9169_v59  ;;  %v1114_v18 = vadd.f32 %v1038_v47, %v580_v56  ;;  %v1572_v12 = vpop.f32.mrf.mxu2  ;;  %v6452_v47 = vld [vmem:[%s11270_s1 + $0x9a] sm:$0xff] }
 0x2c4   :  { %6902 = vmatmul.msk.f32.gmra.mxu0 %vm116_vm1, %v6448_v21 }
 0x2c5   :  { %v9180_v15 = vadd.f32 %v1572_v12, %v1114_v18  ;;  %6517 = vmatmul.msk.f32.gmra.mxu1 %vm116_vm1, %v6451_v7  ;;  %6773 = vmatmul.msk.f32.gmra.mxu3 %vm116_vm1, %v6707_v22  ;;  %v6708_v22 = vld [vmem:[%s11270_s1 + $0x81] sm:$0xff] }
 0x2c8   :  { %v2095_v20 = vpop.f32.mrf.mxu3  ;;  %6648 = vmatmul.msk.f32.gmra.mxu2 %vm116_vm1, %v6582_v37 }
 0x2c9   :  { %v9191_v56 = vadd.f32 %v2095_v20, %v9092_v28  ;;  %v9193_v21 = vpop.f32.mrf.mxu0  ;;  %v6583_v28 = vld [vmem:[%s11270_s1 + $0xc0] sm:$0xff] }
 0x2ca   :  { %11439 = vst [vmem:[#allocation85_spill] sm:$0xff] %v9193_v21  ;;  %v1041_v12 = vpop.f32.mrf.mxu1  ;;  %v582_v21 = vadd.f32 %v8718_v35, %v11440_v57  ;;  %v11443_v57 = vld [vmem:[#allocation45_spill] sm:$0xff] }
 0x2cb   :  { %11438 = vst [vmem:[#allocation43_spill] sm:$0xff] %v9191_v56  ;;  %v1115_v18 = vadd.f32 %v1041_v12, %v581_v53  ;;  %v1575_v59 = vpop.f32.mrf.mxu2  ;;  %v6453_v12 = vld [vmem:[%s11270_s1 + $0xaa] sm:$0xff] }
 0x2cc   :  { %6903 = vmatmul.msk.f32.gmra.mxu0 %vm116_vm1, %v6449_v46 }
 0x2cd   :  { %v9202_v37 = vadd.f32 %v1575_v59, %v1115_v18  ;;  %6518 = vmatmul.msk.f32.gmra.mxu1 %vm116_vm1, %v6452_v47  ;;  %6774 = vmatmul.msk.f32.gmra.mxu3 %vm116_vm1, %v6708_v22  ;;  %v6709_v22 = vld [vmem:[%s11270_s1 + $0x91] sm:$0xff] }
 0x2d0   :  { %v2098_v20 = vpop.f32.mrf.mxu3  ;;  %6649 = vmatmul.msk.f32.gmra.mxu2 %vm116_vm1, %v6583_v28 }
 0x2d1   :  { %v9213_v53 = vadd.f32 %v2098_v20, %v9114_v41  ;;  %v9215_v46 = vpop.f32.mrf.mxu0  ;;  %v6584_v41 = vld [vmem:[%s11270_s1 + $0xc8] sm:$0xff] }
 0x2d2   :  { %11442 = vst [vmem:[#allocation86_spill] sm:$0xff] %v9215_v46  ;;  %v1044_v59 = vpop.f32.mrf.mxu1  ;;  %v583_v46 = vadd.f32 %v8718_v35, %v11443_v57  ;;  %v11446_v57 = vld [vmem:[#allocation46_spill] sm:$0xff] }
 0x2d3   :  { %11441 = vst [vmem:[#allocation44_spill] sm:$0xff] %v9213_v53  ;;  %v1116_v18 = vadd.f32 %v1044_v59, %v582_v21  ;;  %v1578_v56 = vpop.f32.mrf.mxu2  ;;  %v6454_v59 = vld [vmem:[%s11270_s1 + $0xb2] sm:$0xff] }
 0x2d4   :  { %6904 = vmatmul.msk.f32.gmra.mxu0 %vm116_vm1, %v6450_v45 }
 0x2d5   :  { %v9224_v28 = vadd.f32 %v1578_v56, %v1116_v18  ;;  %6519 = vmatmul.msk.f32.gmra.mxu1 %vm116_vm1, %v6453_v12  ;;  %6775 = vmatmul.msk.f32.gmra.mxu3 %vm116_vm1, %v6709_v22  ;;  %v6710_v22 = vld [vmem:[%s11270_s1 + $0x99] sm:$0xff] }
 0x2d8   :  { %v2101_v20 = vpop.f32.mrf.mxu3  ;;  %6650 = vmatmul.msk.f32.gmra.mxu2 %vm116_vm1, %v6584_v41 }
 0x2d9   :  { %v9235_v21 = vadd.f32 %v2101_v20, %v9136_v11  ;;  %v9237_v45 = vpop.f32.mrf.mxu0  ;;  %v6585_v11 = vld [vmem:[%s11270_s1 + $0xd8] sm:$0xff] }
 0x2da   :  { %11445 = vst [vmem:[#allocation87_spill] sm:$0xff] %v9237_v45  ;;  %v1047_v56 = vpop.f32.mrf.mxu1  ;;  %v584_v45 = vadd.f32 %v8718_v35, %v11446_v57  ;;  %v11449_v57 = vld [vmem:[#allocation47_spill] sm:$0xff] }
 0x2db   :  { %11444 = vst [vmem:[#allocation45_spill] sm:$0xff] %v9235_v21  ;;  %v1117_v18 = vadd.f32 %v1047_v56, %v583_v46  ;;  %v1581_v53 = vpop.f32.mrf.mxu2  ;;  %v6455_v56 = vld [vmem:[%s11270_s1 + $0xc2] sm:$0xff] }
 0x2dc   :  { %6905 = vmatmul.msk.f32.gmra.mxu0 %vm116_vm1, %v6451_v7 }
 0x2dd   :  { %v9246_v41 = vadd.f32 %v1581_v53, %v1117_v18  ;;  %6520 = vmatmul.msk.f32.gmra.mxu1 %vm116_vm1, %v6454_v59  ;;  %6776 = vmatmul.msk.f32.gmra.mxu3 %vm116_vm1, %v6710_v22  ;;  %v6711_v22 = vld [vmem:[%s11270_s1 + $0xa9] sm:$0xff] }
 0x2e0   :  { %v2104_v20 = vpop.f32.mrf.mxu3  ;;  %6651 = vmatmul.msk.f32.gmra.mxu2 %vm116_vm1, %v6585_v11 }
 0x2e1   :  { %v9257_v46 = vadd.f32 %v2104_v20, %v9158_v29  ;;  %v9259_v7 = vpop.f32.mrf.mxu0  ;;  %v6586_v29 = vld [vmem:[%s11270_s1 + $0xe0] sm:$0xff] }
 0x2e2   :  { %11448 = vst [vmem:[#allocation88_spill] sm:$0xff] %v9259_v7  ;;  %v1050_v53 = vpop.f32.mrf.mxu1  ;;  %v585_v7 = vadd.f32 %v8718_v35, %v11449_v57  ;;  %v6587_v35 = vld [vmem:[%s11270_s1 + $0xf0] sm:$0xff]  ;;  %v6457_v57 = vld [vmem:[%s11270_s1 + $0xda] sm:$0xff] }
 0x2e3   :  { %11447 = vst [vmem:[#allocation46_spill] sm:$0xff] %v9257_v46  ;;  %v1118_v18 = vadd.f32 %v1050_v53, %v584_v45  ;;  %v1584_v21 = vpop.f32.mrf.mxu2  ;;  %v6456_v53 = vld [vmem:[%s11270_s1 + $0xca] sm:$0xff] }
 0x2e4   :  { %6906 = vmatmul.msk.f32.gmra.mxu0 %vm116_vm1, %v6452_v47 }
 0x2e5   :  { %v9268_v11 = vadd.f32 %v1584_v21, %v1118_v18  ;;  %6521 = vmatmul.msk.f32.gmra.mxu1 %vm116_vm1, %v6455_v56  ;;  %6777 = vmatmul.msk.f32.gmra.mxu3 %vm116_vm1, %v6711_v22  ;;  %v6712_v22 = vld [vmem:[%s11270_s1 + $0xb1] sm:$0xff] }
 0x2e8   :  { %v2107_v20 = vpop.f32.mrf.mxu3  ;;  %6652 = vmatmul.msk.f32.gmra.mxu2 %vm116_vm1, %v6586_v29 }
 0x2e9   :  { %v9279_v45 = vadd.f32 %v2107_v20, %v9180_v15  ;;  %v9281_v47 = vpop.f32.mrf.mxu0  ;;  %v2659_v20 = vadd.f32 %v7963_v8, %v7961_v23  ;;  %v6588_v23 = vld [vmem:[%s11270_s1 + $0xf8] sm:$0xff] }
 0x2ea   :  { %v1053_v21 = vpop.f32.mrf.mxu1 }
 0x2eb   :  { %v1119_v18 = vadd.f32 %v1053_v21, %v585_v7  ;;  %v1587_v46 = vpop.f32.mrf.mxu2  ;;  %v6713_v21 = vld [vmem:[%s11270_s1 + $0xc1] sm:$0xff] }
 0x2ec   :  { %6907 = vmatmul.msk.f32.gmra.mxu0 %vm116_vm1, %v6453_v12 }
 0x2ed   :  { %v9290_v29 = vadd.f32 %v1587_v46, %v1119_v18  ;;  %6522 = vmatmul.msk.f32.gmra.mxu1 %vm116_vm1, %v6456_v53  ;;  %6778 = vmatmul.msk.f32.gmra.mxu3 %vm116_vm1, %v6712_v22 }
 0x2f0   :  { %v2110_v15 = vpop.f32.mrf.mxu3  ;;  %6653 = vmatmul.msk.f32.gmra.mxu2 %vm116_vm1, %v6587_v35 }
 0x2f1   :  { %v9301_v7 = vadd.f32 %v2110_v15, %v9202_v37  ;;  %v9303_v12 = vpop.f32.mrf.mxu0  ;;  %v2660_v37 = vadd.f32 %v7980_v62, %v7978_v55  ;;  %v6589_v55 = vld [vmem:[%s11270_s1 + $0x108] sm:$0xff] }
 0x2f2   :  { %v3001_v46 = vpop.f32.mrf.mxu1 }
 0x2f3   :  { %v3193_v22 = vadd.f32 %v3001_v46, %v2659_v20  ;;  %v3536_v18 = vpop.f32.mrf.mxu2  ;;  %v6458_v46 = vld [vmem:[%s11270_s1 + $0xe2] sm:$0xff] }
 0x2f4   :  { %6908 = vmatmul.msk.f32.gmra.mxu0 %vm116_vm1, %v6454_v59 }
 0x2f5   :  { %v9312_v35 = vadd.f32 %v3536_v18, %v3193_v22  ;;  %6523 = vmatmul.msk.f32.gmra.mxu1 %vm116_vm1, %v6457_v57  ;;  %6779 = vmatmul.msk.f32.gmra.mxu3 %vm116_vm1, %v6713_v21  ;;  %v6714_v21 = vld [vmem:[%s11270_s1 + $0xc9] sm:$0xff] }
 0x2f8   :  { %v2113_v8 = vpop.f32.mrf.mxu3  ;;  %6654 = vmatmul.msk.f32.gmra.mxu2 %vm116_vm1, %v6588_v23 }
 0x2f9   :  { %v9323_v15 = vadd.f32 %v2113_v8, %v9224_v28  ;;  %v9325_v59 = vpop.f32.mrf.mxu0  ;;  %v2661_v28 = vadd.f32 %v7997_v39, %v7995_v36  ;;  %v6590_v36 = vld [vmem:[%s11270_s1 + $0x110] sm:$0xff] }
 0x2fa   :  { %v3004_v20 = vpop.f32.mrf.mxu1 }
 0x2fb   :  { %v3194_v22 = vadd.f32 %v3004_v20, %v2660_v37  ;;  %v3539_v18 = vpop.f32.mrf.mxu2  ;;  %v6459_v20 = vld [vmem:[%s11270_s1 + $0xf2] sm:$0xff] }
 0x2fc   :  { %6909 = vmatmul.msk.f32.gmra.mxu0 %vm116_vm1, %v6455_v56 }
 0x2fd   :  { %v9334_v23 = vadd.f32 %v3539_v18, %v3194_v22  ;;  %6524 = vmatmul.msk.f32.gmra.mxu1 %vm116_vm1, %v6458_v46  ;;  %6780 = vmatmul.msk.f32.gmra.mxu3 %vm116_vm1, %v6714_v21  ;;  %v6715_v21 = vld [vmem:[%s11270_s1 + $0xd9] sm:$0xff] }
 0x300   :  { %v2116_v62 = vpop.f32.mrf.mxu3  ;;  %6655 = vmatmul.msk.f32.gmra.mxu2 %vm116_vm1, %v6589_v55 }
 0x301   :  { %v9345_v8 = vadd.f32 %v2116_v62, %v9246_v41  ;;  %v9347_v56 = vpop.f32.mrf.mxu0  ;;  %v2662_v41 = vadd.f32 %v8014_v54, %v8012_v13  ;;  %v6591_v13 = vld [vmem:[%s11270_s1 + $0x120] sm:$0xff] }
 0x302   :  { %v3007_v37 = vpop.f32.mrf.mxu1 }
 0x303   :  { %v3195_v22 = vadd.f32 %v3007_v37, %v2661_v28  ;;  %v3542_v18 = vpop.f32.mrf.mxu2  ;;  %v6460_v37 = vld [vmem:[%s11270_s1 + $0xfa] sm:$0xff] }
 0x304   :  { %6910 = vmatmul.msk.f32.gmra.mxu0 %vm116_vm1, %v6456_v53 }
 0x305   :  { %v9356_v55 = vadd.f32 %v3542_v18, %v3195_v22  ;;  %6525 = vmatmul.msk.f32.gmra.mxu1 %vm116_vm1, %v6459_v20  ;;  %6781 = vmatmul.msk.f32.gmra.mxu3 %vm116_vm1, %v6715_v21  ;;  %v6716_v21 = vld [vmem:[%s11270_s1 + $0xe1] sm:$0xff] }
 0x308   :  { %v2119_v39 = vpop.f32.mrf.mxu3  ;;  %6656 = vmatmul.msk.f32.gmra.mxu2 %vm116_vm1, %v6590_v36 }
 0x309   :  { %v9367_v62 = vadd.f32 %v2119_v39, %v9268_v11  ;;  %v9369_v53 = vpop.f32.mrf.mxu0  ;;  %v2663_v11 = vadd.f32 %v8031_v25, %v8029_v3  ;;  %v6592_v3 = vld [vmem:[%s11270_s1 + $0x128] sm:$0xff] }
 0x30a   :  { %v3010_v28 = vpop.f32.mrf.mxu1 }
 0x30b   :  { %v3196_v22 = vadd.f32 %v3010_v28, %v2662_v41  ;;  %v3545_v18 = vpop.f32.mrf.mxu2  ;;  %v6461_v28 = vld [vmem:[%s11270_s1 + $0x10a] sm:$0xff] }
 0x30c   :  { %6911 = vmatmul.msk.f32.gmra.mxu0 %vm116_vm1, %v6457_v57 }
 0x30d   :  { %v9378_v36 = vadd.f32 %v3545_v18, %v3196_v22  ;;  %6526 = vmatmul.msk.f32.gmra.mxu1 %vm116_vm1, %v6460_v37  ;;  %6782 = vmatmul.msk.f32.gmra.mxu3 %vm116_vm1, %v6716_v21  ;;  %v6717_v21 = vld [vmem:[%s11270_s1 + $0xf1] sm:$0xff] }
 0x310   :  { %v2122_v54 = vpop.f32.mrf.mxu3  ;;  %6657 = vmatmul.msk.f32.gmra.mxu2 %vm116_vm1, %v6591_v13 }
 0x311   :  { %v9389_v39 = vadd.f32 %v2122_v54, %v9290_v29  ;;  %v9391_v57 = vpop.f32.mrf.mxu0  ;;  %v2664_v29 = vadd.f32 %v8048_v32, %v8046_v31  ;;  %v6593_v31 = vld [vmem:[%s11270_s1 + $0x138] sm:$0xff] }
 0x312   :  { %v3013_v41 = vpop.f32.mrf.mxu1 }
 0x313   :  { %v3197_v22 = vadd.f32 %v3013_v41, %v2663_v11  ;;  %v3548_v18 = vpop.f32.mrf.mxu2  ;;  %v6462_v41 = vld [vmem:[%s11270_s1 + $0x112] sm:$0xff] }
 0x314   :  { %6912 = vmatmul.msk.f32.gmra.mxu0 %vm116_vm1, %v6458_v46 }
 0x315   :  { %v9400_v13 = vadd.f32 %v3548_v18, %v3197_v22  ;;  %6527 = vmatmul.msk.f32.gmra.mxu1 %vm116_vm1, %v6461_v28  ;;  %6783 = vmatmul.msk.f32.gmra.mxu3 %vm116_vm1, %v6717_v21  ;;  %v6718_v21 = vld [vmem:[%s11270_s1 + $0xf9] sm:$0xff] }
 0x318   :  { %v4070_v25 = vpop.f32.mrf.mxu3  ;;  %6658 = vmatmul.msk.f32.gmra.mxu2 %vm116_vm1, %v6592_v3 }
 0x319   :  { %v4262_v54 = vadd.f32 %v4070_v25, %v9312_v35  ;;  %v4604_v11 = vpop.f32.mrf.mxu0  ;;  %v2665_v25 = vadd.f32 %v8065_v27, %v8063_v52 }
 0x31a   :  { %v3016_v46 = vpop.f32.mrf.mxu1 }
 0x31b   :  { %v3198_v22 = vadd.f32 %v3016_v46, %v2664_v29  ;;  %v3551_v18 = vpop.f32.mrf.mxu2  ;;  %v9425_v32 = vadd.f32 %v4604_v11, %v4262_v54  ;;  %v6719_v54 = vld [vmem:[%s11270_s1 + $0x109] sm:$0xff] }
 0x31c   :  { %6913 = vmatmul.msk.f32.gmra.mxu0 %vm116_vm1, %v6459_v20 }
 0x31d   :  { %v9418_v3 = vadd.f32 %v3551_v18, %v3198_v22  ;;  %6528 = vmatmul.msk.f32.gmra.mxu1 %vm116_vm1, %v6462_v41  ;;  %6784 = vmatmul.msk.f32.gmra.mxu3 %vm116_vm1, %v6718_v21  ;;  %11450 = vst [vmem:[#allocation47_spill] sm:$0xff] %v9425_v32  ;;  %v9434_v21 = vld [vmem:[%s11270_s1 + $0x122] sm:$0xff]  ;;  %v4930_v52 = vmul.f32 %v9425_v32, %v9425_v32 }
 0x320   :  { %v4073_v35 = vpop.f32.mrf.mxu3  ;;  %6659 = vmatmul.msk.f32.gmra.mxu2 %vm116_vm1, %v6593_v31 }
 0x321   :  { %v4263_v20 = vadd.f32 %v4073_v35, %v9334_v23  ;;  %v4607_v29 = vpop.f32.mrf.mxu0  ;;  %v6594_v35 = vld [vmem:[%s11270_s1 + $0x140] sm:$0xff] }
 0x322   :  { %v3019_v46 = vpop.f32.mrf.mxu1 }
 0x323   :  { %v3199_v11 = vadd.f32 %v3019_v46, %v2665_v25  ;;  %v9439_v22 = vadd.f32 %v4607_v29, %v4263_v20  ;;  %v3554_v18 = vpop.f32.mrf.mxu2 }
 0x324   :  { %6914 = vmatmul.msk.f32.gmra.mxu0 %vm116_vm1, %v6460_v37  ;;  %v2666_v37 = vadd.f32 %v8084_v16, %v8082_v6 }
 0x325   :  { %11451 = vst [vmem:[#allocation89_spill] sm:$0xff] %v9439_v22  ;;  %v4860_v27 = vadd.f32 %v9439_v22, %v9425_v32  ;;  %v4931_v23 = vmul.f32 %v9439_v22, %v9439_v22  ;;  %v9448_v31 = vadd.f32 %v3554_v18, %v3199_v11  ;;  %6529 = vmatmul.msk.f32.gmra.mxu1 %vm116_vm1, %v9434_v21  ;;  %v6464_v18 = vld [vmem:[%s11270_s1 + $0x12a] sm:$0xff] }
 0x326   :  { %6785 = vmatmul.msk.f32.gmra.mxu3 %vm116_vm1, %v6719_v54  ;;  %v6720_v54 = vld [vmem:[%s11270_s1 + $0x111] sm:$0xff] }
 0x327   :  { %v4994_v25 = vadd.f32 %v4931_v23, %v4930_v52 }
 0x328   :  { %v4076_v20 = vpop.f32.mrf.mxu3  ;;  %6660 = vmatmul.msk.f32.gmra.mxu2 %vm116_vm1, %v6594_v35  ;;  %v6595_v35 = vld [vmem:[%s11270_s1 + $0x150] sm:$0xff] }
 0x329   :  { %v4264_v29 = vadd.f32 %v4076_v20, %v9356_v55  ;;  %v4610_v46 = vpop.f32.mrf.mxu0 }
 0x32a   :  { %v3022_v11 = vpop.f32.mrf.mxu1 }
 0x32b   :  { %v3200_v32 = vadd.f32 %v3022_v11, %v2666_v37  ;;  %v9466_v52 = vadd.f32 %v4610_v46, %v4264_v29  ;;  %v3557_v23 = vpop.f32.mrf.mxu2  ;;  %v6465_v46 = vld [vmem:[%s11270_s1 + $0x13a] sm:$0xff] }
 0x32c   :  { %6915 = vmatmul.msk.f32.gmra.mxu0 %vm116_vm1, %v6461_v28  ;;  %v2667_v28 = vadd.f32 %v8103_v5, %v8101_v19  ;;  %v6721_v11 = vld [vmem:[%s11270_s1 + $0x121] sm:$0xff] }
 0x32d   :  { %v4861_v6 = vadd.f32 %v4860_v27, %v9466_v52  ;;  %v4932_v16 = vmul.f32 %v9466_v52, %v9466_v52  ;;  %v9472_v55 = vadd.f32 %v3557_v23, %v3200_v32  ;;  %6530 = vmatmul.msk.f32.gmra.mxu1 %vm116_vm1, %v6464_v18 }
 0x32e   :  { %6786 = vmatmul.msk.f32.gmra.mxu3 %vm116_vm1, %v6720_v54 }
 0x32f   :  { %v4995_v20 = vadd.f32 %v4994_v25, %v4932_v16  ;;  %v6596_v16 = vld [vmem:[%s11270_s1 + $0x158] sm:$0xff] }
 0x330   :  { %v4079_v37 = vpop.f32.mrf.mxu3  ;;  %6661 = vmatmul.msk.f32.gmra.mxu2 %vm116_vm1, %v6595_v35 }
 0x331   :  { %v4265_v27 = vadd.f32 %v4079_v37, %v9378_v36  ;;  %v4613_v29 = vpop.f32.mrf.mxu0 }
 0x332   :  { %v3025_v32 = vpop.f32.mrf.mxu1 }
 0x333   :  { %v3201_v54 = vadd.f32 %v3025_v32, %v2667_v28  ;;  %v9489_v25 = vadd.f32 %v4613_v29, %v4265_v27  ;;  %v3560_v23 = vpop.f32.mrf.mxu2  ;;  %v6466_v29 = vld [vmem:[%s11270_s1 + $0x142] sm:$0xff] }
 0x334   :  { %6916 = vmatmul.msk.f32.gmra.mxu0 %vm116_vm1, %v6462_v41  ;;  %v2668_v41 = vadd.f32 %v8122_v61, %v8120_v44  ;;  %v6722_v32 = vld [vmem:[%s11270_s1 + $0x129] sm:$0xff] }
 0x335   :  { %v4862_v19 = vadd.f32 %v4861_v6, %v9489_v25  ;;  %v4933_v5 = vmul.f32 %v9489_v25, %v9489_v25  ;;  %v9495_v36 = vadd.f32 %v3560_v23, %v3201_v54  ;;  %6531 = vmatmul.msk.f32.gmra.mxu1 %vm116_vm1, %v6465_v46  ;;  %v6597_v23 = vld [vmem:[%s11270_s1 + $0x168] sm:$0xff] }
 0x336   :  { %6787 = vmatmul.msk.f32.gmra.mxu3 %vm116_vm1, %v6721_v11 }
 0x337   :  { %v4996_v35 = vadd.f32 %v4995_v20, %v4933_v5 }
 0x338   :  { %v4082_v37 = vpop.f32.mrf.mxu3  ;;  %6662 = vmatmul.msk.f32.gmra.mxu2 %vm116_vm1, %v6596_v16 }
 0x339   :  { %v4266_v6 = vadd.f32 %v4082_v37, %v9400_v13  ;;  %v4616_v28 = vpop.f32.mrf.mxu0 }
 0x33a   :  { %v3028_v27 = vpop.f32.mrf.mxu1 }
 0x33b   :  { %v3202_v11 = vadd.f32 %v3028_v27, %v2668_v41  ;;  %v9512_v20 = vadd.f32 %v4616_v28, %v4266_v6  ;;  %v3563_v54 = vpop.f32.mrf.mxu2  ;;  %v6467_v28 = vld [vmem:[%s11270_s1 + $0x152] sm:$0xff] }
 0x33c   :  { %6917 = vmatmul.msk.f32.gmra.mxu0 %vm116_vm1, %v9434_v21  ;;  %v11452_v21 = vld [vmem:[#allocation48_spill] sm:$0xff]  ;;  %v6723_v27 = vld [vmem:[%s11270_s1 + $0x139] sm:$0xff] }
 0x33d   :  { %v4863_v44 = vadd.f32 %v4862_v19, %v9512_v20  ;;  %v4934_v61 = vmul.f32 %v9512_v20, %v9512_v20  ;;  %v9519_v13 = vadd.f32 %v3563_v54, %v3202_v11  ;;  %6532 = vmatmul.msk.f32.gmra.mxu1 %vm116_vm1, %v6466_v29  ;;  %v2669_v19 = vadd.f32 %v11452_v21, %v8143_v2 }
 0x33e   :  { %6788 = vmatmul.msk.f32.gmra.mxu3 %vm116_vm1, %v6722_v32 }
 0x33f   :  { %v4997_v5 = vadd.f32 %v4996_v35, %v4934_v61  ;;  %v6598_v61 = vld [vmem:[%s11270_s1 + $0x170] sm:$0xff] }
 0x340   :  { %v4085_v16 = vpop.f32.mrf.mxu3  ;;  %6663 = vmatmul.msk.f32.gmra.mxu2 %vm116_vm1, %v6597_v23 }
 0x341   :  { %v4267_v37 = vadd.f32 %v4085_v16, %v9418_v3  ;;  %v4619_v41 = vpop.f32.mrf.mxu0 }
 0x342   :  { %v3031_v6 = vpop.f32.mrf.mxu1 }
 0x343   :  { %v3203_v32 = vadd.f32 %v3031_v6, %v2669_v19  ;;  %v9536_v35 = vadd.f32 %v4619_v41, %v4267_v37  ;;  %v3566_v11 = vpop.f32.mrf.mxu2  ;;  %v6468_v37 = vld [vmem:[%s11270_s1 + $0x15a] sm:$0xff] }
 0x344   :  { %6918 = vmatmul.msk.f32.gmra.mxu0 %vm116_vm1, %v6464_v18  ;;  %v2670_v18 = vadd.f32 %v8169_v24, %v8167_v17  ;;  %v6724_v41 = vld [vmem:[%s11270_s1 + $0x141] sm:$0xff] }
 0x345   :  { %v4864_v2 = vadd.f32 %v4863_v44, %v9536_v35  ;;  %v4935_v3 = vmul.f32 %v9536_v35, %v9536_v35  ;;  %v9542_v54 = vadd.f32 %v3566_v11, %v3203_v32  ;;  %6533 = vmatmul.msk.f32.gmra.mxu1 %vm116_vm1, %v6467_v28  ;;  %v6599_v32 = vld [vmem:[%s11270_s1 + $0x180] sm:$0xff] }
 0x346   :  { %6789 = vmatmul.msk.f32.gmra.mxu3 %vm116_vm1, %v6723_v27 }
 0x347   :  { %v4998_v23 = vadd.f32 %v4997_v5, %v4935_v3 }
 0x348   :  { %v4088_v16 = vpop.f32.mrf.mxu3  ;;  %6664 = vmatmul.msk.f32.gmra.mxu2 %vm116_vm1, %v6598_v61 }
 0x349   :  { %v4268_v44 = vadd.f32 %v4088_v16, %v9448_v31  ;;  %v4622_v21 = vpop.f32.mrf.mxu0 }
 0x34a   :  { %v3034_v19 = vpop.f32.mrf.mxu1 }
 0x34b   :  { %v3204_v6 = vadd.f32 %v3034_v19, %v2670_v18  ;;  %v9559_v5 = vadd.f32 %v4622_v21, %v4268_v44  ;;  %v3569_v27 = vpop.f32.mrf.mxu2  ;;  %v6469_v18 = vld [vmem:[%s11270_s1 + $0x16a] sm:$0xff] }
 0x34c   :  { %6919 = vmatmul.msk.f32.gmra.mxu0 %vm116_vm1, %v6465_v46  ;;  %v2671_v46 = vadd.f32 %v8193_v9, %v8191_v60  ;;  %v6725_v44 = vld [vmem:[%s11270_s1 + $0x151] sm:$0xff] }
 0x34d   :  { %v4865_v17 = vadd.f32 %v4864_v2, %v9559_v5  ;;  %v4936_v24 = vmul.f32 %v9559_v5, %v9559_v5  ;;  %v9565_v31 = vadd.f32 %v3569_v27, %v3204_v6  ;;  %6534 = vmatmul.msk.f32.gmra.mxu1 %vm116_vm1, %v6468_v37 }
 0x34e   :  { %6790 = vmatmul.msk.f32.gmra.mxu3 %vm116_vm1, %v6724_v41  ;;  %v6600_v41 = vld [vmem:[%s11270_s1 + $0x188] sm:$0xff] }
 0x34f   :  { %v4999_v11 = vadd.f32 %v4998_v23, %v4936_v24 }
 0x350   :  { %v4091_v3 = vpop.f32.mrf.mxu3  ;;  %6665 = vmatmul.msk.f32.gmra.mxu2 %vm116_vm1, %v6599_v32 }
 0x351   :  { %v4269_v2 = vadd.f32 %v4091_v3, %v9472_v55  ;;  %v4625_v61 = vpop.f32.mrf.mxu0  ;;  %v6470_v3 = vld [vmem:[%s11270_s1 + $0x172] sm:$0xff] }
 0x352   :  { %v3037_v16 = vpop.f32.mrf.mxu1 }
 0x353   :  { %v3205_v21 = vadd.f32 %v3037_v16, %v2671_v46  ;;  %v9582_v23 = vadd.f32 %v4625_v61, %v4269_v2  ;;  %v3572_v19 = vpop.f32.mrf.mxu2  ;;  %v6726_v46 = vld [vmem:[%s11270_s1 + $0x159] sm:$0xff] }
 0x354   :  { %6920 = vmatmul.msk.f32.gmra.mxu0 %vm116_vm1, %v6466_v29  ;;  %v2672_v29 = vadd.f32 %v8217_v14, %v8215_v33  ;;  %v6601_v16 = vld [vmem:[%s11270_s1 + $0x198] sm:$0xff] }
 0x355   :  { %v4866_v60 = vadd.f32 %v4865_v17, %v9582_v23  ;;  %v4937_v9 = vmul.f32 %v9582_v23, %v9582_v23  ;;  %v9588_v55 = vadd.f32 %v3572_v19, %v3205_v21  ;;  %6535 = vmatmul.msk.f32.gmra.mxu1 %vm116_vm1, %v6469_v18  ;;  %v11454_v19 = vld [vmem:[#allocation50_spill] sm:$0xff] }
 0x356   :  { %6791 = vmatmul.msk.f32.gmra.mxu3 %vm116_vm1, %v6725_v44 }
 0x357   :  { %v5000_v6 = vadd.f32 %v4999_v11, %v4937_v9 }
 0x358   :  { %v4094_v27 = vpop.f32.mrf.mxu3  ;;  %6666 = vmatmul.msk.f32.gmra.mxu2 %vm116_vm1, %v6600_v41 }
 0x359   :  { %v4270_v17 = vadd.f32 %v4094_v27, %v9495_v36  ;;  %v4628_v24 = vpop.f32.mrf.mxu0 }
 0x35a   :  { %v3040_v32 = vpop.f32.mrf.mxu1 }
 0x35b   :  { %v3206_v2 = vadd.f32 %v3040_v32, %v2672_v29  ;;  %v9605_v11 = vadd.f32 %v4628_v24, %v4270_v17  ;;  %v3575_v61 = vpop.f32.mrf.mxu2  ;;  %v6471_v29 = vld [vmem:[%s11270_s1 + $0x182] sm:$0xff] }
 0x35c   :  { %6921 = vmatmul.msk.f32.gmra.mxu0 %vm116_vm1, %v6467_v28  ;;  %v11453_v28 = vld [vmem:[#allocation49_spill] sm:$0xff]  ;;  %v6727_v17 = vld [vmem:[%s11270_s1 + $0x169] sm:$0xff] }
 0x35d   :  { %v4867_v33 = vadd.f32 %v4866_v60, %v9605_v11  ;;  %v4938_v14 = vmul.f32 %v9605_v11, %v9605_v11  ;;  %v9611_v36 = vadd.f32 %v3575_v61, %v3206_v2  ;;  %6536 = vmatmul.msk.f32.gmra.mxu1 %vm116_vm1, %v6470_v3  ;;  %v2673_v60 = vadd.f32 %v11454_v19, %v11453_v28  ;;  %v6602_v61 = vld [vmem:[%s11270_s1 + $0x1a0] sm:$0xff] }
 0x35e   :  { %6792 = vmatmul.msk.f32.gmra.mxu3 %vm116_vm1, %v6726_v46 }
 0x35f   :  { %v5001_v44 = vadd.f32 %v5000_v6, %v4938_v14 }
 0x360   :  { %v4097_v21 = vpop.f32.mrf.mxu3  ;;  %6667 = vmatmul.msk.f32.gmra.mxu2 %vm116_vm1, %v6601_v16 }
 0x361   :  { %v4271_v9 = vadd.f32 %v4097_v21, %v9519_v13  ;;  %v4631_v41 = vpop.f32.mrf.mxu0  ;;  %v11456_v21 = vld [vmem:[#allocation52_spill] sm:$0xff] }
 0x362   :  { %v3043_v27 = vpop.f32.mrf.mxu1 }
 0x363   :  { %v3207_v24 = vadd.f32 %v3043_v27, %v2673_v60  ;;  %v9628_v6 = vadd.f32 %v4631_v41, %v4271_v9  ;;  %v3578_v32 = vpop.f32.mrf.mxu2  ;;  %v6472_v9 = vld [vmem:[%s11270_s1 + $0x18a] sm:$0xff] }
 0x364   :  { %6922 = vmatmul.msk.f32.gmra.mxu0 %vm116_vm1, %v6468_v37  ;;  %v11455_v37 = vld [vmem:[#allocation51_spill] sm:$0xff]  ;;  %v6728_v41 = vld [vmem:[%s11270_s1 + $0x171] sm:$0xff] }
 0x365   :  { %v4868_v46 = vadd.f32 %v4867_v33, %v9628_v6  ;;  %v4939_v13 = vmul.f32 %v9628_v6, %v9628_v6  ;;  %v9634_v2 = vadd.f32 %v3578_v32, %v3207_v24  ;;  %6537 = vmatmul.msk.f32.gmra.mxu1 %vm116_vm1, %v6471_v29  ;;  %v2674_v33 = vadd.f32 %v11456_v21, %v11455_v37 }
 0x366   :  { %6793 = vmatmul.msk.f32.gmra.mxu3 %vm116_vm1, %v6727_v17 }
 0x367   :  { %v5002_v14 = vadd.f32 %v5001_v44, %v4939_v13  ;;  %v6603_v13 = vld [vmem:[%s11270_s1 + $0x1e0] sm:$0xff] }
 0x368   :  { %v4100_v16 = vpop.f32.mrf.mxu3  ;;  %6668 = vmatmul.msk.f32.gmra.mxu2 %vm116_vm1, %v6602_v61 }
 0x369   :  { %v4272_v28 = vadd.f32 %v4100_v16, %v9542_v54  ;;  %v4634_v19 = vpop.f32.mrf.mxu0 }
 0x36a   :  { %v3046_v60 = vpop.f32.mrf.mxu1 }
 0x36b   :  { %v3208_v27 = vadd.f32 %v3046_v60, %v2674_v33  ;;  %v9651_v44 = vadd.f32 %v4634_v19, %v4272_v28  ;;  %v3581_v17 = vpop.f32.mrf.mxu2  ;;  %v6473_v28 = vld [vmem:[%s11270_s1 + $0x1ca] sm:$0xff]  ;;  %v6729_v19 = vld [vmem:[%s11270_s1 + $0x181] sm:$0xff] }
 0x36c   :  { %6923 = vmatmul.msk.f32.gmra.mxu0 %vm116_vm1, %v6469_v18  ;;  %v11457_v18 = vld [vmem:[#allocation53_spill] sm:$0xff] }
 0x36d   :  { %v4869_v24 = vadd.f32 %v4868_v46, %v9651_v44  ;;  %v4940_v54 = vmul.f32 %v9651_v44, %v9651_v44  ;;  %v9657_v32 = vadd.f32 %v3581_v17, %v3208_v27  ;;  %6538 = vmatmul.msk.f32.gmra.mxu1 %vm116_vm1, %v6472_v9  ;;  %v2675_v46 = vadd.f32 %v11457_v18, %v8296_v26  ;;  %v6604_v17 = vld [vmem:[%s11270_s1 + $0x1e8] sm:$0xff] }
 0x36e   :  { %6794 = vmatmul.msk.f32.gmra.mxu3 %vm116_vm1, %v6728_v41 }
 0x36f   :  { %v5003_v61 = vadd.f32 %v5002_v14, %v4940_v54 }
 0x370   :  { %v4103_v16 = vpop.f32.mrf.mxu3  ;;  %6669 = vmatmul.msk.f32.gmra.mxu2 %vm116_vm1, %v6603_v13 }
 0x371   :  { %v4273_v37 = vadd.f32 %v4103_v16, %v9565_v31  ;;  %v4637_v21 = vpop.f32.mrf.mxu0 }
 0x372   :  { %v3049_v33 = vpop.f32.mrf.mxu1 }
 0x373   :  { %v3209_v60 = vadd.f32 %v3049_v33, %v2675_v46  ;;  %v9674_v14 = vadd.f32 %v4637_v21, %v4273_v37  ;;  %v3584_v41 = vpop.f32.mrf.mxu2  ;;  %v6474_v37 = vld [vmem:[%s11270_s1 + $0x1d2] sm:$0xff]  ;;  %v6730_v21 = vld [vmem:[%s11270_s1 + $0x189] sm:$0xff] }
 0x374   :  { %6924 = vmatmul.msk.f32.gmra.mxu0 %vm116_vm1, %v6470_v3  ;;  %v11458_v3 = vld [vmem:[#allocation54_spill] sm:$0xff] }
 0x375   :  { %v4870_v26 = vadd.f32 %v4869_v24, %v9674_v14  ;;  %v4941_v31 = vmul.f32 %v9674_v14, %v9674_v14  ;;  %v9680_v27 = vadd.f32 %v3584_v41, %v3209_v60  ;;  %6539 = vmatmul.msk.f32.gmra.mxu1 %vm116_vm1, %v6473_v28  ;;  %v2676_v24 = vadd.f32 %v11458_v3, %v8321_v30  ;;  %v6605_v60 = vld [vmem:[%s11270_s1 + $0x1f8] sm:$0xff] }
 0x376   :  { %6795 = vmatmul.msk.f32.gmra.mxu3 %vm116_vm1, %v6729_v19 }
 0x377   :  { %v5004_v54 = vadd.f32 %v5003_v61, %v4941_v31 }
 0x378   :  { %v4106_v13 = vpop.f32.mrf.mxu3  ;;  %6670 = vmatmul.msk.f32.gmra.mxu2 %vm116_vm1, %v6604_v17 }
 0x379   :  { %v4274_v16 = vadd.f32 %v4106_v13, %v9588_v55  ;;  %v4640_v18 = vpop.f32.mrf.mxu0 }
 0x37a   :  { %v3052_v46 = vpop.f32.mrf.mxu1 }
 0x37b   :  { %v3210_v33 = vadd.f32 %v3052_v46, %v2676_v24  ;;  %v9697_v61 = vadd.f32 %v4640_v18, %v4274_v16  ;;  %v3587_v28 = vpop.f32.mrf.mxu2  ;;  %v9717_v24 = vld [vmem:[%s11270_s1 + $0x1e2] sm:$0xff]  ;;  %v6731_v16 = vld [vmem:[%s11270_s1 + $0x199] sm:$0xff] }
 0x37c   :  { %6925 = vmatmul.msk.f32.gmra.mxu0 %vm116_vm1, %v6471_v29  ;;  %v11459_v29 = vld [vmem:[#allocation55_spill] sm:$0xff] }
 0x37d   :  { %v4871_v30 = vadd.f32 %v4870_v26, %v9697_v61  ;;  %v4942_v55 = vmul.f32 %v9697_v61, %v9697_v61  ;;  %v9703_v19 = vadd.f32 %v3587_v28, %v3210_v33  ;;  %6540 = vmatmul.msk.f32.gmra.mxu1 %vm116_vm1, %v6474_v37  ;;  %v2677_v26 = vadd.f32 %v11459_v29, %v8346_v34 }
 0x37e   :  { %6796 = vmatmul.msk.f32.gmra.mxu3 %vm116_vm1, %v6730_v21  ;;  %v6606_v21 = vld [vmem:[%s11270_s1 + $0x200] sm:$0xff] }
 0x37f   :  { %v5005_v41 = vadd.f32 %v5004_v54, %v4942_v55 }
 0x380   :  { %v4109_v31 = vpop.f32.mrf.mxu3  ;;  %6671 = vmatmul.msk.f32.gmra.mxu2 %vm116_vm1, %v6605_v60 }
 0x381   :  { %v4275_v17 = vadd.f32 %v4109_v31, %v9611_v36  ;;  %v4643_v13 = vpop.f32.mrf.mxu0  ;;  %v6861_v31 = vld [vmem:[%s11270_s1 + $0x19a] sm:$0xff] }
 0x382   :  { %v3055_v3 = vpop.f32.mrf.mxu1 }
 0x383   :  { %v3211_v54 = vadd.f32 %v3055_v3, %v2677_v26  ;;  %v9722_v18 = vadd.f32 %v4643_v13, %v4275_v17  ;;  %v3590_v46 = vpop.f32.mrf.mxu2  ;;  %v9746_v26 = vld [vmem:[%s11270_s1 + $0x1ea] sm:$0xff] }
 0x384   :  { %6926 = vmatmul.msk.f32.gmra.mxu0 %vm116_vm1, %v6472_v9  ;;  %v11460_v9 = vld [vmem:[#allocation56_spill] sm:$0xff] }
 0x385   :  { %v4872_v34 = vadd.f32 %v4871_v30, %v9722_v18  ;;  %v4943_v36 = vmul.f32 %v9722_v18, %v9722_v18  ;;  %v9728_v37 = vadd.f32 %v3590_v46, %v3211_v54  ;;  %6541 = vmatmul.msk.f32.gmra.mxu1 %vm116_vm1, %v9717_v24  ;;  %v2678_v30 = vadd.f32 %v11460_v9, %v8371_v38  ;;  %v6607_v54 = vld [vmem:[%s11270_s1 + $0x210] sm:$0xff] }
 0x386   :  { %6797 = vmatmul.msk.f32.gmra.mxu3 %vm116_vm1, %v6731_v16 }
 0x387   :  { %v5006_v33 = vadd.f32 %v5005_v41, %v4943_v36  ;;  %v6732_v41 = vld [vmem:[%s11270_s1 + $0x1a1] sm:$0xff] }
 0x388   :  { %v4112_v28 = vpop.f32.mrf.mxu3  ;;  %6672 = vmatmul.msk.f32.gmra.mxu2 %vm116_vm1, %v6606_v21 }
 0x389   :  { %v4276_v55 = vadd.f32 %v4112_v28, %v9634_v2  ;;  %v4646_v60 = vpop.f32.mrf.mxu0 }
 0x38a   :  { %v3058_v29 = vpop.f32.mrf.mxu1 }
 0x38b   :  { %v3212_v17 = vadd.f32 %v3058_v29, %v2678_v30  ;;  %v9751_v13 = vadd.f32 %v4646_v60, %v4276_v55  ;;  %v3593_v38 = vpop.f32.mrf.mxu2  ;;  %v6862_v30 = vld [vmem:[%s11270_s1 + $0x1a2] sm:$0xff]  ;;  %v6477_v60 = vld [vmem:[%s11270_s1 + $0x1fa] sm:$0xff] }
 0x38c   :  { %6927 = vmatmul.msk.f32.gmra.mxu0 %vm116_vm1, %v6861_v31 }
 0x38d   :  { %v4873_v2 = vadd.f32 %v4872_v34, %v9751_v13  ;;  %v4944_v3 = vmul.f32 %v9751_v13, %v9751_v13  ;;  %v9757_v16 = vadd.f32 %v3593_v38, %v3212_v17  ;;  %6542 = vmatmul.msk.f32.gmra.mxu1 %vm116_vm1, %v9746_v26  ;;  %v11461_v34 = vld [vmem:[#allocation57_spill] sm:$0xff] }
 0x38e   :  { %6798 = vmatmul.msk.f32.gmra.mxu3 %vm116_vm1, %v6732_v41  ;;  %v2679_v21 = vadd.f32 %v11461_v34, %v8396_v1  ;;  %v6608_v38 = vld [vmem:[%s11270_s1 + $0x218] sm:$0xff] }
 0x38f   :  { %v5007_v46 = vadd.f32 %v5006_v33, %v4944_v3  ;;  %v6733_v33 = vld [vmem:[%s11270_s1 + $0x1e1] sm:$0xff] }
 0x390   :  { %v4115_v36 = vpop.f32.mrf.mxu3  ;;  %6673 = vmatmul.msk.f32.gmra.mxu2 %vm116_vm1, %v6607_v54 }
 0x391   :  { %v4277_v28 = vadd.f32 %v4115_v36, %v9657_v32  ;;  %v4649_v9 = vpop.f32.mrf.mxu0  ;;  %v11462_v36 = vld [vmem:[#allocation58_spill] sm:$0xff] }
 0x392   :  { %v3061_v55 = vpop.f32.mrf.mxu1 }
 0x393   :  { %v3213_v31 = vadd.f32 %v3061_v55, %v2679_v21  ;;  %v9778_v29 = vadd.f32 %v4649_v9, %v4277_v28  ;;  %v3596_v1 = vpop.f32.mrf.mxu2  ;;  %v6478_v9 = vld [vmem:[%s11270_s1 + $0x202] sm:$0xff] }
 0x394   :  { %6928 = vmatmul.msk.f32.gmra.mxu0 %vm116_vm1, %v6862_v30  ;;  %v6734_v30 = vld [vmem:[%s11270_s1 + $0x1e9] sm:$0xff] }
 0x395   :  { %v4874_v32 = vadd.f32 %v4873_v2, %v9778_v29  ;;  %v4945_v41 = vmul.f32 %v9778_v29, %v9778_v29  ;;  %v9784_v17 = vadd.f32 %v3596_v1, %v3213_v31  ;;  %6543 = vmatmul.msk.f32.gmra.mxu1 %vm116_vm1, %v6477_v60  ;;  %v2680_v2 = vadd.f32 %v11462_v36, %v8421_v63  ;;  %v6609_v1 = vld [vmem:[%s11270_s1 + $0x228] sm:$0xff] }
 0x396   :  { %6799 = vmatmul.msk.f32.gmra.mxu3 %vm116_vm1, %v6733_v33 }
 0x397   :  { %v5008_v3 = vadd.f32 %v5007_v46, %v4945_v41 }
 0x398   :  { %v4118_v54 = vpop.f32.mrf.mxu3  ;;  %6674 = vmatmul.msk.f32.gmra.mxu2 %vm116_vm1, %v6608_v38 }
 0x399   :  { %v4278_v34 = vadd.f32 %v4118_v54, %v9680_v27  ;;  %v4652_v21 = vpop.f32.mrf.mxu0 }
 0x39a   :  { %v3064_v28 = vpop.f32.mrf.mxu1 }
 0x39b   :  { %v3214_v55 = vadd.f32 %v3064_v28, %v2680_v2  ;;  %v9801_v46 = vadd.f32 %v4652_v21, %v4278_v34  ;;  %v3599_v33 = vpop.f32.mrf.mxu2  ;;  %v6479_v34 = vld [vmem:[%s11270_s1 + $0x212] sm:$0xff] }
 0x39c   :  { %6929 = vmatmul.msk.f32.gmra.mxu0 %vm116_vm1, %v9717_v24  ;;  %v11464_v24 = vld [vmem:[#allocation59_spill] sm:$0xff]  ;;  %v6735_v21 = vld [vmem:[%s11270_s1 + $0x1f9] sm:$0xff] }
 0x39d   :  { %11463 = vst [vmem:[#allocation48_spill] sm:$0xff] %v9801_v46  ;;  %v4875_v63 = vadd.f32 %v4874_v32, %v9801_v46  ;;  %v4946_v27 = vmul.f32 %v9801_v46, %v9801_v46  ;;  %v9808_v31 = vadd.f32 %v3599_v33, %v3214_v55  ;;  %6544 = vmatmul.msk.f32.gmra.mxu1 %vm116_vm1, %v6478_v9  ;;  %v6610_v33 = vld [vmem:[%s11270_s1 + $0x230] sm:$0xff] }
 0x39e   :  { %6800 = vmatmul.msk.f32.gmra.mxu3 %vm116_vm1, %v6734_v30  ;;  %v2681_v32 = vadd.f32 %v11464_v24, %v8446_v42 }
 0x39f   :  { %v5009_v41 = vadd.f32 %v5008_v3, %v4946_v27 }
 0x3a0   :  { %v4121_v38 = vpop.f32.mrf.mxu3  ;;  %6675 = vmatmul.msk.f32.gmra.mxu2 %vm116_vm1, %v6609_v1 }
 0x3a1   :  { %v4279_v54 = vadd.f32 %v4121_v38, %v9703_v19  ;;  %v4655_v36 = vpop.f32.mrf.mxu0 }
 0x3a2   :  { %v3067_v2 = vpop.f32.mrf.mxu1 }
 0x3a3   :  { %v3215_v28 = vadd.f32 %v3067_v2, %v2681_v32  ;;  %v9825_v3 = vadd.f32 %v4655_v36, %v4279_v54  ;;  %v3602_v30 = vpop.f32.mrf.mxu2  ;;  %v6480_v54 = vld [vmem:[%s11270_s1 + $0x21a] sm:$0xff] }
 0x3a4   :  { %6930 = vmatmul.msk.f32.gmra.mxu0 %vm116_vm1, %v9746_v26  ;;  %v11466_v26 = vld [vmem:[#allocation60_spill] sm:$0xff]  ;;  %v6736_v36 = vld [vmem:[%s11270_s1 + $0x201] sm:$0xff] }
 0x3a5   :  { %11465 = vst [vmem:[#allocation49_spill] sm:$0xff] %v9825_v3  ;;  %v4876_v42 = vadd.f32 %v4875_v63, %v9825_v3  ;;  %v4947_v19 = vmul.f32 %v9825_v3, %v9825_v3  ;;  %v9832_v55 = vadd.f32 %v3602_v30, %v3215_v28  ;;  %6545 = vmatmul.msk.f32.gmra.mxu1 %vm116_vm1, %v6479_v34  ;;  %v6611_v30 = vld [vmem:[%s11270_s1 + $0x240] sm:$0xff] }
 0x3a6   :  { %6801 = vmatmul.msk.f32.gmra.mxu3 %vm116_vm1, %v6735_v21  ;;  %v2682_v63 = vadd.f32 %v11466_v26, %v8471_v50 }
 0x3a7   :  { %v5010_v27 = vadd.f32 %v5009_v41, %v4947_v19 }
 0x3a8   :  { %6676 = vmatmul.msk.f32.gmra.mxu2 %vm116_vm1, %v6610_v33 }
 0x3a9   :  { %v4124_v1 = vpop.f32.mrf.mxu3  ;;  %v4658_v24 = vpop.f32.mrf.mxu0 }
 0x3aa   :  { %v4280_v38 = vadd.f32 %v4124_v1, %v9728_v37  ;;  %v3070_v32 = vpop.f32.mrf.mxu1 }
 0x3ab   :  { %v3216_v2 = vadd.f32 %v3070_v32, %v2682_v63  ;;  %v3605_v21 = vpop.f32.mrf.mxu2 }
 0x3ac   :  { %v9849_v41 = vadd.f32 %v4658_v24, %v4280_v38  ;;  %6931 = vmatmul.msk.f32.gmra.mxu0 %vm116_vm1, %v6477_v60  ;;  %v11468_v60 = vld [vmem:[#allocation61_spill] sm:$0xff]  ;;  %v6481_v38 = vld [vmem:[%s11270_s1 + $0x22a] sm:$0xff] }
 0x3ad   :  { %v9855_v28 = vadd.f32 %v3605_v21, %v3216_v2  ;;  %6546 = vmatmul.msk.f32.gmra.mxu1 %vm116_vm1, %v6480_v54  ;;  %v6737_v24 = vld [vmem:[%s11270_s1 + $0x211] sm:$0xff]  ;;  %v6612_v21 = vld [vmem:[%s11270_s1 + $0x248] sm:$0xff] }
 0x3ae   :  { %11467 = vst [vmem:[#allocation50_spill] sm:$0xff] %v9849_v41  ;;  %v4877_v50 = vadd.f32 %v4876_v42, %v9849_v41  ;;  %v4948_v37 = vmul.f32 %v9849_v41, %v9849_v41  ;;  %6802 = vmatmul.msk.f32.gmra.mxu3 %vm116_vm1, %v6736_v36  ;;  %v2683_v42 = vadd.f32 %v11468_v60, %v8496_v48 }
 0x3b0   :  { %v5011_v19 = vadd.f32 %v5010_v27, %v4948_v37  ;;  %6677 = vmatmul.msk.f32.gmra.mxu2 %vm116_vm1, %v6611_v30 }
 0x3b1   :  { %v4127_v33 = vpop.f32.mrf.mxu3  ;;  %v4661_v26 = vpop.f32.mrf.mxu0 }
 0x3b2   :  { %v4281_v1 = vadd.f32 %v4127_v33, %v9757_v16  ;;  %v3073_v63 = vpop.f32.mrf.mxu1 }
 0x3b3   :  { %v3217_v32 = vadd.f32 %v3073_v63, %v2683_v42  ;;  %v3608_v36 = vpop.f32.mrf.mxu2 }
 0x3b4   :  { %v9872_v27 = vadd.f32 %v4661_v26, %v4281_v1  ;;  %6932 = vmatmul.msk.f32.gmra.mxu0 %vm116_vm1, %v6478_v9  ;;  %v11470_v9 = vld [vmem:[#allocation62_spill] sm:$0xff]  ;;  %v6482_v1 = vld [vmem:[%s11270_s1 + $0x232] sm:$0xff] }
 0x3b5   :  { %v9878_v2 = vadd.f32 %v3608_v36, %v3217_v32  ;;  %6547 = vmatmul.msk.f32.gmra.mxu1 %vm116_vm1, %v6481_v38  ;;  %v6738_v26 = vld [vmem:[%s11270_s1 + $0x219] sm:$0xff] }
 0x3b6   :  { %11469 = vst [vmem:[#allocation51_spill] sm:$0xff] %v9872_v27  ;;  %v4878_v48 = vadd.f32 %v4877_v50, %v9872_v27  ;;  %v4949_v16 = vmul.f32 %v9872_v27, %v9872_v27  ;;  %6803 = vmatmul.msk.f32.gmra.mxu3 %vm116_vm1, %v6737_v24  ;;  %v2684_v50 = vadd.f32 %v11470_v9, %v8521_v4  ;;  %v6613_v36 = vld [vmem:[%s11270_s1 + $0x258] sm:$0xff] }
 0x3b8   :  { %v5012_v37 = vadd.f32 %v5011_v19, %v4949_v16  ;;  %6678 = vmatmul.msk.f32.gmra.mxu2 %vm116_vm1, %v6612_v21 }
 0x3b9   :  { %v4130_v30 = vpop.f32.mrf.mxu3  ;;  %v4664_v60 = vpop.f32.mrf.mxu0 }
 0x3ba   :  { %v4282_v33 = vadd.f32 %v4130_v30, %v9784_v17  ;;  %v3076_v42 = vpop.f32.mrf.mxu1 }
 0x3bb   :  { %v3218_v63 = vadd.f32 %v3076_v42, %v2684_v50  ;;  %v3611_v24 = vpop.f32.mrf.mxu2 }
 0x3bc   :  { %v9895_v19 = vadd.f32 %v4664_v60, %v4282_v33  ;;  %6933 = vmatmul.msk.f32.gmra.mxu0 %vm116_vm1, %v6479_v34  ;;  %v11472_v34 = vld [vmem:[#allocation63_spill] sm:$0xff] }
 0x3bd   :  { %v9901_v32 = vadd.f32 %v3611_v24, %v3218_v63  ;;  %6548 = vmatmul.msk.f32.gmra.mxu1 %vm116_vm1, %v6482_v1  ;;  %v6483_v33 = vld [vmem:[%s11270_s1 + $0x242] sm:$0xff] }
 0x3be   :  { %11471 = vst [vmem:[#allocation52_spill] sm:$0xff] %v9895_v19  ;;  %v4879_v4 = vadd.f32 %v4878_v48, %v9895_v19  ;;  %v4950_v17 = vmul.f32 %v9895_v19, %v9895_v19  ;;  %6804 = vmatmul.msk.f32.gmra.mxu3 %vm116_vm1, %v6738_v26  ;;  %v2685_v48 = vadd.f32 %v11472_v34, %v8546_v49  ;;  %v6739_v60 = vld [vmem:[%s11270_s1 + $0x229] sm:$0xff]  ;;  %v6614_v24 = vld [vmem:[%s11270_s1 + $0x260] sm:$0xff] }
 0x3c0   :  { %v5013_v16 = vadd.f32 %v5012_v37, %v4950_v17  ;;  %6679 = vmatmul.msk.f32.gmra.mxu2 %vm116_vm1, %v6613_v36 }
 0x3c1   :  { %v4133_v21 = vpop.f32.mrf.mxu3  ;;  %v4667_v9 = vpop.f32.mrf.mxu0 }
 0x3c2   :  { %v4283_v30 = vadd.f32 %v4133_v21, %v9808_v31  ;;  %v3079_v50 = vpop.f32.mrf.mxu1  ;;  %v11475_v21 = vld [vmem:[#allocation65_spill] sm:$0xff] }
 0x3c3   :  { %v3219_v42 = vadd.f32 %v3079_v50, %v2685_v48  ;;  %v3614_v26 = vpop.f32.mrf.mxu2  ;;  %v6740_v50 = vld [vmem:[%s11270_s1 + $0x231] sm:$0xff] }
 0x3c4   :  { %v9918_v37 = vadd.f32 %v4667_v9, %v4283_v30  ;;  %6934 = vmatmul.msk.f32.gmra.mxu0 %vm116_vm1, %v6480_v54  ;;  %v11474_v54 = vld [vmem:[#allocation64_spill] sm:$0xff] }
 0x3c5   :  { %v9924_v63 = vadd.f32 %v3614_v26, %v3219_v42  ;;  %6549 = vmatmul.msk.f32.gmra.mxu1 %vm116_vm1, %v6483_v33  ;;  %v6484_v9 = vld [vmem:[%s11270_s1 + $0x24a] sm:$0xff] }
 0x3c6   :  { %11473 = vst [vmem:[#allocation53_spill] sm:$0xff] %v9918_v37  ;;  %v4880_v49 = vadd.f32 %v4879_v4, %v9918_v37  ;;  %v4951_v31 = vmul.f32 %v9918_v37, %v9918_v37  ;;  %6805 = vmatmul.msk.f32.gmra.mxu3 %vm116_vm1, %v6739_v60  ;;  %v2686_v4 = vadd.f32 %v11475_v21, %v11474_v54  ;;  %v11525_v37 = vld [vmem:[#allocation28_spill] sm:$0xff] }
 0x3c8   :  { %v5014_v17 = vadd.f32 %v5013_v16, %v4951_v31  ;;  %6680 = vmatmul.msk.f32.gmra.mxu2 %vm116_vm1, %v6614_v24  ;;  %v6615_v24 = vld [vmem:[%s11270_s1 + $0x270] sm:$0xff] }
 0x3c9   :  { %v4136_v36 = vpop.f32.mrf.mxu3  ;;  %v4670_v48 = vpop.f32.mrf.mxu0 }
 0x3ca   :  { %v4284_v34 = vadd.f32 %v4136_v36, %v9832_v55  ;;  %v3082_v30 = vpop.f32.mrf.mxu1 }
 0x3cb   :  { %v3220_v60 = vadd.f32 %v3082_v30, %v2686_v4  ;;  %v3617_v42 = vpop.f32.mrf.mxu2  ;;  %v6741_v30 = vld [vmem:[%s11270_s1 + $0x241] sm:$0xff] }
 0x3cc   :  { %v9941_v16 = vadd.f32 %v4670_v48, %v4284_v34  ;;  %6935 = vmatmul.msk.f32.gmra.mxu0 %vm116_vm1, %v6481_v38  ;;  %v11477_v38 = vld [vmem:[#allocation66_spill] sm:$0xff] }
 0x3cd   :  { %v9947_v31 = vadd.f32 %v3617_v42, %v3220_v60  ;;  %6550 = vmatmul.msk.f32.gmra.mxu1 %vm116_vm1, %v6484_v9  ;;  %v6485_v48 = vld [vmem:[%s11270_s1 + $0x25a] sm:$0xff] }
 0x3ce   :  { %11476 = vst [vmem:[#allocation54_spill] sm:$0xff] %v9941_v16  ;;  %v4881_v26 = vadd.f32 %v4880_v49, %v9941_v16  ;;  %v4952_v55 = vmul.f32 %v9941_v16, %v9941_v16  ;;  %6806 = vmatmul.msk.f32.gmra.mxu3 %vm116_vm1, %v6740_v50  ;;  %v2687_v49 = vadd.f32 %v11477_v38, %v8598_v10 }
 0x3d0   :  { %v5015_v36 = vadd.f32 %v5014_v17, %v4952_v55  ;;  %6681 = vmatmul.msk.f32.gmra.mxu2 %vm116_vm1, %v6615_v24  ;;  %v6616_v55 = vld [vmem:[%s11270_s1 + $0x278] sm:$0xff] }
 0x3d1   :  { %v4139_v54 = vpop.f32.mrf.mxu3  ;;  %v4673_v4 = vpop.f32.mrf.mxu0 }
 0x3d2   :  { %v4285_v21 = vadd.f32 %v4139_v54, %v9855_v28  ;;  %v3085_v34 = vpop.f32.mrf.mxu1 }
 0x3d3   :  { %v3221_v50 = vadd.f32 %v3085_v34, %v2687_v49  ;;  %v3620_v60 = vpop.f32.mrf.mxu2 }
 0x3d4   :  { %v9964_v17 = vadd.f32 %v4673_v4, %v4285_v21  ;;  %6936 = vmatmul.msk.f32.gmra.mxu0 %vm116_vm1, %v6482_v1  ;;  %v2688_v1 = vadd.f32 %v8625_v51, %v8623_v40  ;;  %v6486_v21 = vld [vmem:[%s11270_s1 + $0x262] sm:$0xff] }
 0x3d5   :  { %v9970_v42 = vadd.f32 %v3620_v60, %v3221_v50  ;;  %6551 = vmatmul.msk.f32.gmra.mxu1 %vm116_vm1, %v6485_v48  ;;  %v6742_v4 = vld [vmem:[%s11270_s1 + $0x249] sm:$0xff] }
 0x3d6   :  { %11478 = vst [vmem:[#allocation55_spill] sm:$0xff] %v9964_v17  ;;  %v4882_v10 = vadd.f32 %v4881_v26, %v9964_v17  ;;  %v4953_v28 = vmul.f32 %v9964_v17, %v9964_v17  ;;  %6807 = vmatmul.msk.f32.gmra.mxu3 %vm116_vm1, %v6741_v30  ;;  %v6617_v50 = vld [vmem:[%s11270_s1 + $0x288] sm:$0xff] }
 0x3d8   :  { %v5016_v24 = vadd.f32 %v5015_v36, %v4953_v28  ;;  %6682 = vmatmul.msk.f32.gmra.mxu2 %vm116_vm1, %v6616_v55 }
 0x3d9   :  { %v4142_v54 = vpop.f32.mrf.mxu3  ;;  %v4676_v38 = vpop.f32.mrf.mxu0 }
 0x3da   :  { %v4286_v26 = vadd.f32 %v4142_v54, %v9878_v2  ;;  %v3088_v49 = vpop.f32.mrf.mxu1 }
 0x3db   :  { %v3222_v34 = vadd.f32 %v3088_v49, %v2688_v1  ;;  %v3623_v30 = vpop.f32.mrf.mxu2 }
 0x3dc   :  { %v9987_v36 = vadd.f32 %v4676_v38, %v4286_v26  ;;  %6937 = vmatmul.msk.f32.gmra.mxu0 %vm116_vm1, %v6483_v33  ;;  %v11480_v33 = vld [vmem:[#allocation35_spill] sm:$0xff]  ;;  %v6487_v26 = vld [vmem:[%s11270_s1 + $0x272] sm:$0xff] }
 0x3dd   :  { %v9993_v2 = vadd.f32 %v3623_v30, %v3222_v34  ;;  %6552 = vmatmul.msk.f32.gmra.mxu1 %vm116_vm1, %v6486_v21  ;;  %v6743_v38 = vld [vmem:[%s11270_s1 + $0x259] sm:$0xff]  ;;  %v6618_v30 = vld [vmem:[%s11270_s1 + $0x290] sm:$0xff] }
 0x3de   :  { %11479 = vst [vmem:[#allocation56_spill] sm:$0xff] %v9987_v36  ;;  %v4883_v40 = vadd.f32 %v4882_v10, %v9987_v36  ;;  %v4954_v51 = vmul.f32 %v9987_v36, %v9987_v36  ;;  %6808 = vmatmul.msk.f32.gmra.mxu3 %vm116_vm1, %v6742_v4  ;;  %v2689_v10 = vadd.f32 %v11480_v33, %v8648_v58 }
 0x3e0   :  { %v5017_v60 = vadd.f32 %v5016_v24, %v4954_v51  ;;  %6683 = vmatmul.msk.f32.gmra.mxu2 %vm116_vm1, %v6617_v50 }
 0x3e1   :  { %v4145_v28 = vpop.f32.mrf.mxu3  ;;  %v4679_v54 = vpop.f32.mrf.mxu0 }
 0x3e2   :  { %v4287_v55 = vadd.f32 %v4145_v28, %v9901_v32  ;;  %v3091_v1 = vpop.f32.mrf.mxu1 }
 0x3e3   :  { %v3223_v49 = vadd.f32 %v3091_v1, %v2689_v10  ;;  %v3626_v4 = vpop.f32.mrf.mxu2 }
 0x3e4   :  { %v10010_v24 = vadd.f32 %v4679_v54, %v4287_v55  ;;  %6938 = vmatmul.msk.f32.gmra.mxu0 %vm116_vm1, %v6484_v9  ;;  %v11482_v9 = vld [vmem:[#allocation19_spill] sm:$0xff]  ;;  %v6488_v55 = vld [vmem:[%s11270_s1 + $0x27a] sm:$0xff] }
 0x3e5   :  { %v10016_v34 = vadd.f32 %v3626_v4, %v3223_v49  ;;  %6553 = vmatmul.msk.f32.gmra.mxu1 %vm116_vm1, %v6487_v26  ;;  %v6744_v54 = vld [vmem:[%s11270_s1 + $0x261] sm:$0xff] }
 0x3e6   :  { %11481 = vst [vmem:[#allocation57_spill] sm:$0xff] %v10010_v24  ;;  %v4884_v58 = vadd.f32 %v4883_v40, %v10010_v24  ;;  %v4955_v32 = vmul.f32 %v10010_v24, %v10010_v24  ;;  %6809 = vmatmul.msk.f32.gmra.mxu3 %vm116_vm1, %v6743_v38  ;;  %v2690_v40 = vadd.f32 %v11482_v9, %v8673_v0  ;;  %v6619_v4 = vld [vmem:[%s11270_s1 + $0x2a0] sm:$0xff] }
 0x3e8   :  { %v5018_v51 = vadd.f32 %v5017_v60, %v4955_v32  ;;  %6684 = vmatmul.msk.f32.gmra.mxu2 %vm116_vm1, %v6618_v30 }
 0x3e9   :  { %v4148_v50 = vpop.f32.mrf.mxu3  ;;  %v4682_v33 = vpop.f32.mrf.mxu0 }
 0x3ea   :  { %v4288_v28 = vadd.f32 %v4148_v50, %v9924_v63  ;;  %v3094_v10 = vpop.f32.mrf.mxu1 }
 0x3eb   :  { %v3224_v1 = vadd.f32 %v3094_v10, %v2690_v40  ;;  %v3629_v38 = vpop.f32.mrf.mxu2 }
 0x3ec   :  { %v10033_v60 = vadd.f32 %v4682_v33, %v4288_v28  ;;  %6939 = vmatmul.msk.f32.gmra.mxu0 %vm116_vm1, %v6485_v48  ;;  %v11483_v48 = vld [vmem:[#allocation38_spill] sm:$0xff]  ;;  %v6489_v28 = vld [vmem:[%s11270_s1 + $0x28a] sm:$0xff] }
 0x3ed   :  { %v10039_v49 = vadd.f32 %v3629_v38, %v3224_v1  ;;  %6554 = vmatmul.msk.f32.gmra.mxu1 %vm116_vm1, %v6488_v55  ;;  %v6745_v33 = vld [vmem:[%s11270_s1 + $0x271] sm:$0xff]  ;;  %v6620_v38 = vld [vmem:[%s11270_s1 + $0x2a8] sm:$0xff] }
 0x3ee   :  { %v4885_v0 = vadd.f32 %v4884_v58, %v10033_v60  ;;  %v4956_v63 = vmul.f32 %v10033_v60, %v10033_v60  ;;  %6810 = vmatmul.msk.f32.gmra.mxu3 %vm116_vm1, %v6744_v54  ;;  %v2691_v58 = vadd.f32 %v11483_v48, %v8696_v43 }
 0x3f0   :  { %v5019_v32 = vadd.f32 %v5018_v51, %v4956_v63  ;;  %6685 = vmatmul.msk.f32.gmra.mxu2 %vm116_vm1, %v6619_v4 }
 0x3f1   :  { %v4151_v30 = vpop.f32.mrf.mxu3  ;;  %v4685_v9 = vpop.f32.mrf.mxu0 }
 0x3f2   :  { %v4289_v50 = vadd.f32 %v4151_v30, %v9947_v31  ;;  %v3097_v40 = vpop.f32.mrf.mxu1  ;;  %v11485_v30 = vld [vmem:[#allocation41_spill] sm:$0xff] }
 0x3f3   :  { %v3225_v10 = vadd.f32 %v3097_v40, %v2691_v58  ;;  %v3632_v54 = vpop.f32.mrf.mxu2  ;;  %v6746_v40 = vld [vmem:[%s11270_s1 + $0x279] sm:$0xff] }
 0x3f4   :  { %v10056_v51 = vadd.f32 %v4685_v9, %v4289_v50  ;;  %6940 = vmatmul.msk.f32.gmra.mxu0 %vm116_vm1, %v6486_v21  ;;  %v11484_v21 = vld [vmem:[#allocation21_spill] sm:$0xff] }
 0x3f5   :  { %v10062_v1 = vadd.f32 %v3632_v54, %v3225_v10  ;;  %6555 = vmatmul.msk.f32.gmra.mxu1 %vm116_vm1, %v6489_v28  ;;  %v6490_v9 = vld [vmem:[%s11270_s1 + $0x292] sm:$0xff] }
 0x3f6   :  { %v4886_v43 = vadd.f32 %v4885_v0, %v10056_v51  ;;  %v4957_v31 = vmul.f32 %v10056_v51, %v10056_v51  ;;  %6811 = vmatmul.msk.f32.gmra.mxu3 %vm116_vm1, %v6745_v33  ;;  %v2692_v0 = vadd.f32 %v11485_v30, %v11484_v21  ;;  %v11487_v30 = vld [vmem:[#allocation25_spill] sm:$0xff] }
 0x3f8   :  { %v5020_v63 = vadd.f32 %v5019_v32, %v4957_v31  ;;  %6686 = vmatmul.msk.f32.gmra.mxu2 %vm116_vm1, %v6620_v38  ;;  %v6621_v38 = vld [vmem:[%s11270_s1 + $0x2b8] sm:$0xff] }
 0x3f9   :  { %v4154_v4 = vpop.f32.mrf.mxu3  ;;  %v4688_v58 = vpop.f32.mrf.mxu0 }
 0x3fa   :  { %v4290_v48 = vadd.f32 %v4154_v4, %v9970_v42  ;;  %v3100_v50 = vpop.f32.mrf.mxu1 }
 0x3fb   :  { %v3226_v33 = vadd.f32 %v3100_v50, %v2692_v0  ;;  %v3635_v10 = vpop.f32.mrf.mxu2  ;;  %v6491_v50 = vld [vmem:[%s11270_s1 + $0x2a2] sm:$0xff] }
 0x3fc   :  { %v10079_v32 = vadd.f32 %v4688_v58, %v4290_v48  ;;  %6941 = vmatmul.msk.f32.gmra.mxu0 %vm116_vm1, %v6487_v26  ;;  %v11486_v26 = vld [vmem:[#allocation23_spill] sm:$0xff] }
 0x3fd   :  { %v10085_v31 = vadd.f32 %v3635_v10, %v3226_v33  ;;  %6556 = vmatmul.msk.f32.gmra.mxu1 %vm116_vm1, %v6490_v9 }
 0x3fe   :  { %v4887_v54 = vadd.f32 %v4886_v43, %v10079_v32  ;;  %v4958_v42 = vmul.f32 %v10079_v32, %v10079_v32  ;;  %6812 = vmatmul.msk.f32.gmra.mxu3 %vm116_vm1, %v6746_v40  ;;  %v2693_v43 = vadd.f32 %v11487_v30, %v11486_v26  ;;  %v6747_v40 = vld [vmem:[%s11270_s1 + $0x289] sm:$0xff] }
 0x400   :  { %v5021_v4 = vadd.f32 %v5020_v63, %v4958_v42  ;;  %6687 = vmatmul.msk.f32.gmra.mxu2 %vm116_vm1, %v6621_v38 }
 0x401   :  { %v4157_v21 = vpop.f32.mrf.mxu3  ;;  %v4691_v48 = vpop.f32.mrf.mxu0 }
 0x402   :  { %v4291_v0 = vadd.f32 %v4157_v21, %v9993_v2  ;;  %v3103_v58 = vpop.f32.mrf.mxu1  ;;  %v6622_v21 = vld [vmem:[%s11270_s1 + $0x2c0] sm:$0xff] }
 0x403   :  { %v3227_v33 = vadd.f32 %v3103_v58, %v2693_v43  ;;  %v3638_v10 = vpop.f32.mrf.mxu2  ;;  %v11489_v43 = vld [vmem:[#allocation29_spill] sm:$0xff] }
 0x404   :  { %v10102_v63 = vadd.f32 %v4691_v48, %v4291_v0  ;;  %6942 = vmatmul.msk.f32.gmra.mxu0 %vm116_vm1, %v6488_v55  ;;  %v11488_v55 = vld [vmem:[#allocation27_spill] sm:$0xff] }
 0x405   :  { %v10108_v38 = vadd.f32 %v3638_v10, %v3227_v33  ;;  %6557 = vmatmul.msk.f32.gmra.mxu1 %vm116_vm1, %v6491_v50  ;;  %v6492_v33 = vld [vmem:[%s11270_s1 + $0x2aa] sm:$0xff] }
 0x406   :  { %v4888_v42 = vadd.f32 %v4887_v54, %v10102_v63  ;;  %v4959_v2 = vmul.f32 %v10102_v63, %v10102_v63  ;;  %6813 = vmatmul.msk.f32.gmra.mxu3 %vm116_vm1, %v6747_v40  ;;  %v2694_v54 = vadd.f32 %v11489_v43, %v11488_v55  ;;  %v6748_v40 = vld [vmem:[%s11270_s1 + $0x291] sm:$0xff] }
 0x407   :  { %v6623_v55 = vld [vmem:[%s11270_s1 + $0x2d0] sm:$0xff] }
 0x408   :  { %v5022_v26 = vadd.f32 %v5021_v4, %v4959_v2  ;;  %6688 = vmatmul.msk.f32.gmra.mxu2 %vm116_vm1, %v6622_v21 }
 0x409   :  { %v4160_v30 = vpop.f32.mrf.mxu3  ;;  %v4694_v48 = vpop.f32.mrf.mxu0 }
 0x40a   :  { %v4292_v0 = vadd.f32 %v4160_v30, %v10016_v34  ;;  %v3106_v58 = vpop.f32.mrf.mxu1 }
 0x40b   :  { %v3228_v10 = vadd.f32 %v3106_v58, %v2694_v54  ;;  %v3641_v2 = vpop.f32.mrf.mxu2 }
 0x40c   :  { %v10125_v4 = vadd.f32 %v4694_v48, %v4292_v0  ;;  %6943 = vmatmul.msk.f32.gmra.mxu0 %vm116_vm1, %v6489_v28  ;;  %v11490_v28 = vld [vmem:[#allocation31_spill] sm:$0xff] }
 0x40d   :  { %v10131_v30 = vadd.f32 %v3641_v2, %v3228_v10  ;;  %6558 = vmatmul.msk.f32.gmra.mxu1 %vm116_vm1, %v6492_v33  ;;  %v11491_v0 = vld [vmem:[#allocation67_spill] sm:$0xff]  ;;  %v6493_v2 = vld [vmem:[%s11270_s1 + $0x2ba] sm:$0xff] }
 0x40e   :  { %v4889_v21 = vadd.f32 %v4888_v42, %v10125_v4  ;;  %v4960_v34 = vmul.f32 %v10125_v4, %v10125_v4  ;;  %6814 = vmatmul.msk.f32.gmra.mxu3 %vm116_vm1, %v6748_v40  ;;  %v2695_v42 = vadd.f32 %v11491_v0, %v11490_v28  ;;  %v6749_v40 = vld [vmem:[%s11270_s1 + $0x2a1] sm:$0xff]  ;;  %v6624_v28 = vld [vmem:[%s11270_s1 + $0x2d8] sm:$0xff] }
 0x410   :  { %v5023_v43 = vadd.f32 %v5022_v26, %v4960_v34  ;;  %6689 = vmatmul.msk.f32.gmra.mxu2 %vm116_vm1, %v6623_v55 }
 0x411   :  { %v4163_v54 = vpop.f32.mrf.mxu3  ;;  %v4697_v58 = vpop.f32.mrf.mxu0 }
 0x412   :  { %v4293_v48 = vadd.f32 %v4163_v54, %v10039_v49  ;;  %v3109_v10 = vpop.f32.mrf.mxu1 }
 0x413   :  { %v3229_v46 = vadd.f32 %v3109_v10, %v2695_v42  ;;  %v3644_v34 = vpop.f32.mrf.mxu2 }
 0x414   :  { %v10148_v26 = vadd.f32 %v4697_v58, %v4293_v48  ;;  %6944 = vmatmul.msk.f32.gmra.mxu0 %vm116_vm1, %v6490_v9  ;;  %v11492_v9 = vld [vmem:[#allocation33_spill] sm:$0xff]  ;;  %v11493_v48 = vld [vmem:[#allocation68_spill] sm:$0xff] }
 0x415   :  { %v10154_v54 = vadd.f32 %v3644_v34, %v3229_v46  ;;  %6559 = vmatmul.msk.f32.gmra.mxu1 %vm116_vm1, %v6493_v2  ;;  %v6494_v34 = vld [vmem:[%s11270_s1 + $0x2c2] sm:$0xff] }
 0x416   :  { %v4890_v55 = vadd.f32 %v4889_v21, %v10148_v26  ;;  %v4961_v49 = vmul.f32 %v10148_v26, %v10148_v26  ;;  %6815 = vmatmul.msk.f32.gmra.mxu3 %vm116_vm1, %v6749_v40  ;;  %v2696_v21 = vadd.f32 %v11493_v48, %v11492_v9  ;;  %v6750_v40 = vld [vmem:[%s11270_s1 + $0x2a9] sm:$0xff] }
 0x417   :  { %v6625_v9 = vld [vmem:[%s11270_s1 + $0x2e8] sm:$0xff] }
 0x418   :  { %v5024_v0 = vadd.f32 %v5023_v43, %v4961_v49  ;;  %6690 = vmatmul.msk.f32.gmra.mxu2 %vm116_vm1, %v6624_v28 }
 0x419   :  { %v4166_v42 = vpop.f32.mrf.mxu3  ;;  %v4700_v10 = vpop.f32.mrf.mxu0 }
 0x41a   :  { %v4294_v58 = vadd.f32 %v4166_v42, %v10062_v1  ;;  %v3112_v46 = vpop.f32.mrf.mxu1 }
 0x41b   :  { %v3230_v3 = vadd.f32 %v3112_v46, %v2696_v21  ;;  %v3647_v49 = vpop.f32.mrf.mxu2 }
 0x41c   :  { %v10171_v43 = vadd.f32 %v4700_v10, %v4294_v58  ;;  %6945 = vmatmul.msk.f32.gmra.mxu0 %vm116_vm1, %v6491_v50  ;;  %v11495_v50 = vld [vmem:[#allocation36_spill] sm:$0xff]  ;;  %v11496_v58 = vld [vmem:[#allocation69_spill] sm:$0xff] }
 0x41d   :  { %v10177_v42 = vadd.f32 %v3647_v49, %v3230_v3  ;;  %6560 = vmatmul.msk.f32.gmra.mxu1 %vm116_vm1, %v6494_v34  ;;  %v6495_v49 = vld [vmem:[%s11270_s1 + $0x2d2] sm:$0xff] }
 0x41e   :  { %11494 = vst [vmem:[#allocation58_spill] sm:$0xff] %v10171_v43  ;;  %v4891_v28 = vadd.f32 %v4890_v55, %v10171_v43  ;;  %v4962_v1 = vmul.f32 %v10171_v43, %v10171_v43  ;;  %6816 = vmatmul.msk.f32.gmra.mxu3 %vm116_vm1, %v6750_v40  ;;  %v2697_v55 = vadd.f32 %v11496_v58, %v11495_v50  ;;  %v6751_v40 = vld [vmem:[%s11270_s1 + $0x2b9] sm:$0xff]  ;;  %v6626_v50 = vld [vmem:[%s11270_s1 + $0x2f0] sm:$0xff] }
 0x420   :  { %v5025_v48 = vadd.f32 %v5024_v0, %v4962_v1  ;;  %6691 = vmatmul.msk.f32.gmra.mxu2 %vm116_vm1, %v6625_v9 }
 0x421   :  { %v4169_v21 = vpop.f32.mrf.mxu3  ;;  %v4703_v46 = vpop.f32.mrf.mxu0 }
 0x422   :  { %v4295_v10 = vadd.f32 %v4169_v21, %v10085_v31  ;;  %v3115_v3 = vpop.f32.mrf.mxu1 }
 0x423   :  { %v3231_v43 = vadd.f32 %v3115_v3, %v2697_v55  ;;  %v3650_v1 = vpop.f32.mrf.mxu2 }
 0x424   :  { %v10194_v0 = vadd.f32 %v4703_v46, %v4295_v10  ;;  %6946 = vmatmul.msk.f32.gmra.mxu0 %vm116_vm1, %v6492_v33  ;;  %v11498_v33 = vld [vmem:[#allocation39_spill] sm:$0xff]  ;;  %v11499_v10 = vld [vmem:[#allocation70_spill] sm:$0xff] }
 0x425   :  { %v10200_v21 = vadd.f32 %v3650_v1, %v3231_v43  ;;  %6561 = vmatmul.msk.f32.gmra.mxu1 %vm116_vm1, %v6495_v49  ;;  %v6496_v1 = vld [vmem:[%s11270_s1 + $0x2da] sm:$0xff] }
 0x426   :  { %11497 = vst [vmem:[#allocation59_spill] sm:$0xff] %v10194_v0  ;;  %v4892_v9 = vadd.f32 %v4891_v28, %v10194_v0  ;;  %v4963_v31 = vmul.f32 %v10194_v0, %v10194_v0  ;;  %6817 = vmatmul.msk.f32.gmra.mxu3 %vm116_vm1, %v6751_v40  ;;  %v2698_v28 = vadd.f32 %v11499_v10, %v11498_v33  ;;  %v6752_v40 = vld [vmem:[%s11270_s1 + $0x2c1] sm:$0xff] }
 0x427   :  { %v6627_v33 = vld [vmem:[%s11270_s1 + $0x300] sm:$0xff] }
 0x428   :  { %v5026_v58 = vadd.f32 %v5025_v48, %v4963_v31  ;;  %6692 = vmatmul.msk.f32.gmra.mxu2 %vm116_vm1, %v6626_v50 }
 0x429   :  { %v4172_v55 = vpop.f32.mrf.mxu3  ;;  %v4706_v3 = vpop.f32.mrf.mxu0 }
 0x42a   :  { %v4296_v46 = vadd.f32 %v4172_v55, %v10108_v38  ;;  %v3118_v43 = vpop.f32.mrf.mxu1 }
 0x42b   :  { %v3232_v0 = vadd.f32 %v3118_v43, %v2698_v28  ;;  %v3653_v31 = vpop.f32.mrf.mxu2 }
 0x42c   :  { %v10217_v48 = vadd.f32 %v4706_v3, %v4296_v46  ;;  %6947 = vmatmul.msk.f32.gmra.mxu0 %vm116_vm1, %v6493_v2  ;;  %v11501_v2 = vld [vmem:[#allocation42_spill] sm:$0xff]  ;;  %v11502_v46 = vld [vmem:[#allocation71_spill] sm:$0xff] }
 0x42d   :  { %v10223_v55 = vadd.f32 %v3653_v31, %v3232_v0  ;;  %6562 = vmatmul.msk.f32.gmra.mxu1 %vm116_vm1, %v6496_v1  ;;  %v6497_v31 = vld [vmem:[%s11270_s1 + $0x2ea] sm:$0xff] }
 0x42e   :  { %11500 = vst [vmem:[#allocation60_spill] sm:$0xff] %v10217_v48  ;;  %v4893_v50 = vadd.f32 %v4892_v9, %v10217_v48  ;;  %v4964_v38 = vmul.f32 %v10217_v48, %v10217_v48  ;;  %6818 = vmatmul.msk.f32.gmra.mxu3 %vm116_vm1, %v6752_v40  ;;  %v2699_v9 = vadd.f32 %v11502_v46, %v11501_v2  ;;  %v6753_v40 = vld [vmem:[%s11270_s1 + $0x2d1] sm:$0xff]  ;;  %v6628_v2 = vld [vmem:[%s11270_s1 + $0x308] sm:$0xff] }
 0x430   :  { %v5027_v10 = vadd.f32 %v5026_v58, %v4964_v38  ;;  %6693 = vmatmul.msk.f32.gmra.mxu2 %vm116_vm1, %v6627_v33 }
 0x431   :  { %v4175_v28 = vpop.f32.mrf.mxu3  ;;  %v4709_v43 = vpop.f32.mrf.mxu0 }
 0x432   :  { %v4297_v3 = vadd.f32 %v4175_v28, %v10131_v30  ;;  %v3121_v0 = vpop.f32.mrf.mxu1 }
 0x433   :  { %v3233_v48 = vadd.f32 %v3121_v0, %v2699_v9  ;;  %v3656_v38 = vpop.f32.mrf.mxu2 }
 0x434   :  { %v10240_v58 = vadd.f32 %v4709_v43, %v4297_v3  ;;  %6948 = vmatmul.msk.f32.gmra.mxu0 %vm116_vm1, %v6494_v34  ;;  %v11504_v34 = vld [vmem:[#allocation16_spill] sm:$0xff] }
 0x435   :  { %v10246_v28 = vadd.f32 %v3656_v38, %v3233_v48  ;;  %6563 = vmatmul.msk.f32.gmra.mxu1 %vm116_vm1, %v6497_v31  ;;  %v11505_v3 = vld [vmem:[#allocation72_spill] sm:$0xff] }
 0x436   :  { %11503 = vst [vmem:[#allocation61_spill] sm:$0xff] %v10240_v58  ;;  %v4894_v33 = vadd.f32 %v4893_v50, %v10240_v58  ;;  %v4965_v30 = vmul.f32 %v10240_v58, %v10240_v58  ;;  %6819 = vmatmul.msk.f32.gmra.mxu3 %vm116_vm1, %v6753_v40  ;;  %v2700_v50 = vadd.f32 %v11505_v3, %v11504_v34  ;;  %v6498_v38 = vld [vmem:[%s11270_s1 + $0x2f2] sm:$0xff] }
 0x437   :  { %v6754_v40 = vld [vmem:[%s11270_s1 + $0x2d9] sm:$0xff] }
 0x438   :  { %v5028_v46 = vadd.f32 %v5027_v10, %v4965_v30  ;;  %6694 = vmatmul.msk.f32.gmra.mxu2 %vm116_vm1, %v6628_v2  ;;  %v6629_v34 = vld [vmem:[%s11270_s1 + $0x318] sm:$0xff] }
 0x439   :  { %v4178_v9 = vpop.f32.mrf.mxu3  ;;  %v4712_v0 = vpop.f32.mrf.mxu0 }
 0x43a   :  { %v4298_v43 = vadd.f32 %v4178_v9, %v10154_v54  ;;  %v3124_v48 = vpop.f32.mrf.mxu1 }
 0x43b   :  { %v3234_v58 = vadd.f32 %v3124_v48, %v2700_v50  ;;  %v3659_v30 = vpop.f32.mrf.mxu2 }
 0x43c   :  { %v10263_v10 = vadd.f32 %v4712_v0, %v4298_v43  ;;  %6949 = vmatmul.msk.f32.gmra.mxu0 %vm116_vm1, %v6495_v49  ;;  %v11507_v49 = vld [vmem:[#allocation17_spill] sm:$0xff] }
 0x43d   :  { %v10269_v9 = vadd.f32 %v3659_v30, %v3234_v58  ;;  %6564 = vmatmul.msk.f32.gmra.mxu1 %vm116_vm1, %v6498_v38  ;;  %v11508_v43 = vld [vmem:[#allocation73_spill] sm:$0xff]  ;;  %v6499_v30 = vld [vmem:[%s11270_s1 + $0x302] sm:$0xff] }
 0x43e   :  { %11506 = vst [vmem:[#allocation62_spill] sm:$0xff] %v10263_v10  ;;  %v4895_v2 = vadd.f32 %v4894_v33, %v10263_v10  ;;  %v4966_v54 = vmul.f32 %v10263_v10, %v10263_v10  ;;  %6820 = vmatmul.msk.f32.gmra.mxu3 %vm116_vm1, %v6754_v40  ;;  %v2701_v33 = vadd.f32 %v11508_v43, %v11507_v49  ;;  %v6755_v40 = vld [vmem:[%s11270_s1 + $0x2e9] sm:$0xff]  ;;  %v6630_v49 = vld [vmem:[%s11270_s1 + $0x320] sm:$0xff] }
 0x440   :  { %v5029_v3 = vadd.f32 %v5028_v46, %v4966_v54  ;;  %6695 = vmatmul.msk.f32.gmra.mxu2 %vm116_vm1, %v6629_v34 }
 0x441   :  { %v4181_v50 = vpop.f32.mrf.mxu3  ;;  %v4715_v48 = vpop.f32.mrf.mxu0 }
 0x442   :  { %v4299_v0 = vadd.f32 %v4181_v50, %v10177_v42  ;;  %v3127_v58 = vpop.f32.mrf.mxu1 }
 0x443   :  { %v3235_v41 = vadd.f32 %v3127_v58, %v2701_v33  ;;  %v3662_v54 = vpop.f32.mrf.mxu2 }
 0x444   :  { %v10286_v46 = vadd.f32 %v4715_v48, %v4299_v0  ;;  %6950 = vmatmul.msk.f32.gmra.mxu0 %vm116_vm1, %v6496_v1  ;;  %v11510_v1 = vld [vmem:[#allocation18_spill] sm:$0xff] }
 0x445   :  { %v10292_v50 = vadd.f32 %v3662_v54, %v3235_v41  ;;  %6565 = vmatmul.msk.f32.gmra.mxu1 %vm116_vm1, %v6499_v30  ;;  %v11511_v0 = vld [vmem:[#allocation74_spill] sm:$0xff]  ;;  %v6500_v54 = vld [vmem:[%s11270_s1 + $0x30a] sm:$0xff] }
 0x446   :  { %11509 = vst [vmem:[#allocation63_spill] sm:$0xff] %v10286_v46  ;;  %v4896_v34 = vadd.f32 %v4895_v2, %v10286_v46  ;;  %v4967_v42 = vmul.f32 %v10286_v46, %v10286_v46  ;;  %6821 = vmatmul.msk.f32.gmra.mxu3 %vm116_vm1, %v6755_v40  ;;  %v2702_v2 = vadd.f32 %v11511_v0, %v11510_v1  ;;  %v6756_v40 = vld [vmem:[%s11270_s1 + $0x2f1] sm:$0xff] }
 0x447   :  { %v6631_v1 = vld [vmem:[%s11270_s1 + $0x330] sm:$0xff] }
 0x448   :  { %v5030_v43 = vadd.f32 %v5029_v3, %v4967_v42  ;;  %6696 = vmatmul.msk.f32.gmra.mxu2 %vm116_vm1, %v6630_v49 }
 0x449   :  { %v4184_v33 = vpop.f32.mrf.mxu3  ;;  %v4718_v58 = vpop.f32.mrf.mxu0 }
 0x44a   :  { %v4300_v48 = vadd.f32 %v4184_v33, %v10200_v21  ;;  %v3130_v41 = vpop.f32.mrf.mxu1 }
 0x44b   :  { %v3236_v10 = vadd.f32 %v3130_v41, %v2702_v2  ;;  %v3665_v42 = vpop.f32.mrf.mxu2 }
 0x44c   :  { %v10309_v3 = vadd.f32 %v4718_v58, %v4300_v48  ;;  %6951 = vmatmul.msk.f32.gmra.mxu0 %vm116_vm1, %v6497_v31  ;;  %v11513_v31 = vld [vmem:[#allocation20_spill] sm:$0xff]  ;;  %v11514_v48 = vld [vmem:[#allocation75_spill] sm:$0xff] }
 0x44d   :  { %v10315_v33 = vadd.f32 %v3665_v42, %v3236_v10  ;;  %6566 = vmatmul.msk.f32.gmra.mxu1 %vm116_vm1, %v6500_v54  ;;  %v6501_v42 = vld [vmem:[%s11270_s1 + $0x31a] sm:$0xff] }
 0x44e   :  { %11512 = vst [vmem:[#allocation64_spill] sm:$0xff] %v10309_v3  ;;  %v4897_v49 = vadd.f32 %v4896_v34, %v10309_v3  ;;  %v4968_v21 = vmul.f32 %v10309_v3, %v10309_v3  ;;  %6822 = vmatmul.msk.f32.gmra.mxu3 %vm116_vm1, %v6756_v40  ;;  %v2703_v34 = vadd.f32 %v11514_v48, %v11513_v31  ;;  %v6757_v40 = vld [vmem:[%s11270_s1 + $0x301] sm:$0xff]  ;;  %v6632_v31 = vld [vmem:[%s11270_s1 + $0x338] sm:$0xff] }
 0x450   :  { %v5031_v0 = vadd.f32 %v5030_v43, %v4968_v21  ;;  %6697 = vmatmul.msk.f32.gmra.mxu2 %vm116_vm1, %v6631_v1 }
 0x451   :  { %v4187_v2 = vpop.f32.mrf.mxu3  ;;  %v4721_v41 = vpop.f32.mrf.mxu0 }
 0x452   :  { %v4301_v58 = vadd.f32 %v4187_v2, %v10223_v55  ;;  %v3133_v10 = vpop.f32.mrf.mxu1 }
 0x453   :  { %v3237_v27 = vadd.f32 %v3133_v10, %v2703_v34  ;;  %v3668_v21 = vpop.f32.mrf.mxu2 }
 0x454   :  { %v10332_v43 = vadd.f32 %v4721_v41, %v4301_v58  ;;  %6952 = vmatmul.msk.f32.gmra.mxu0 %vm116_vm1, %v6498_v38  ;;  %v11516_v38 = vld [vmem:[#allocation22_spill] sm:$0xff]  ;;  %v11517_v58 = vld [vmem:[#allocation76_spill] sm:$0xff] }
 0x455   :  { %v10338_v2 = vadd.f32 %v3668_v21, %v3237_v27  ;;  %6567 = vmatmul.msk.f32.gmra.mxu1 %vm116_vm1, %v6501_v42  ;;  %v6502_v21 = vld [vmem:[%s11270_s1 + $0x322] sm:$0xff] }
 0x456   :  { %11515 = vst [vmem:[#allocation65_spill] sm:$0xff] %v10332_v43  ;;  %v4898_v1 = vadd.f32 %v4897_v49, %v10332_v43  ;;  %v4969_v55 = vmul.f32 %v10332_v43, %v10332_v43  ;;  %6823 = vmatmul.msk.f32.gmra.mxu3 %vm116_vm1, %v6757_v40  ;;  %v2704_v49 = vadd.f32 %v11517_v58, %v11516_v38  ;;  %v6758_v40 = vld [vmem:[%s11270_s1 + $0x309] sm:$0xff] }
 0x457   :  { %v6633_v38 = vld [vmem:[%s11270_s1 + $0x348] sm:$0xff] }
 0x458   :  { %v5032_v48 = vadd.f32 %v5031_v0, %v4969_v55  ;;  %6698 = vmatmul.msk.f32.gmra.mxu2 %vm116_vm1, %v6632_v31 }
 0x459   :  { %v4190_v34 = vpop.f32.mrf.mxu3  ;;  %v4724_v10 = vpop.f32.mrf.mxu0 }
 0x45a   :  { %v4302_v41 = vadd.f32 %v4190_v34, %v10246_v28  ;;  %v3136_v27 = vpop.f32.mrf.mxu1 }
 0x45b   :  { %v3238_v46 = vadd.f32 %v3136_v27, %v2704_v49  ;;  %v3671_v55 = vpop.f32.mrf.mxu2 }
 0x45c   :  { %v10355_v0 = vadd.f32 %v4724_v10, %v4302_v41  ;;  %6953 = vmatmul.msk.f32.gmra.mxu0 %vm116_vm1, %v6499_v30  ;;  %v11519_v30 = vld [vmem:[#allocation24_spill] sm:$0xff]  ;;  %v11520_v41 = vld [vmem:[#allocation77_spill] sm:$0xff] }
 0x45d   :  { %v10361_v34 = vadd.f32 %v3671_v55, %v3238_v46  ;;  %6568 = vmatmul.msk.f32.gmra.mxu1 %vm116_vm1, %v6502_v21  ;;  %v6503_v55 = vld [vmem:[%s11270_s1 + $0x332] sm:$0xff] }
 0x45e   :  { %11518 = vst [vmem:[#allocation66_spill] sm:$0xff] %v10355_v0  ;;  %v4899_v31 = vadd.f32 %v4898_v1, %v10355_v0  ;;  %v4970_v28 = vmul.f32 %v10355_v0, %v10355_v0  ;;  %6824 = vmatmul.msk.f32.gmra.mxu3 %vm116_vm1, %v6758_v40  ;;  %v2705_v1 = vadd.f32 %v11520_v41, %v11519_v30  ;;  %v6759_v40 = vld [vmem:[%s11270_s1 + $0x319] sm:$0xff]  ;;  %v6634_v30 = vld [vmem:[%s11270_s1 + $0x350] sm:$0xff] }
 0x460   :  { %v5033_v58 = vadd.f32 %v5032_v48, %v4970_v28  ;;  %6699 = vmatmul.msk.f32.gmra.mxu2 %vm116_vm1, %v6633_v38 }
 0x461   :  { %v4193_v49 = vpop.f32.mrf.mxu3  ;;  %v4727_v27 = vpop.f32.mrf.mxu0 }
 0x462   :  { %v4303_v10 = vadd.f32 %v4193_v49, %v10269_v9  ;;  %v3139_v46 = vpop.f32.mrf.mxu1 }
 0x463   :  { %v3239_v19 = vadd.f32 %v3139_v46, %v2705_v1  ;;  %v3674_v28 = vpop.f32.mrf.mxu2 }
 0x464   :  { %v10378_v48 = vadd.f32 %v4727_v27, %v4303_v10  ;;  %6954 = vmatmul.msk.f32.gmra.mxu0 %vm116_vm1, %v6500_v54  ;;  %v11522_v54 = vld [vmem:[#allocation26_spill] sm:$0xff] }
 0x465   :  { %v10384_v49 = vadd.f32 %v3674_v28, %v3239_v19  ;;  %6569 = vmatmul.msk.f32.gmra.mxu1 %vm116_vm1, %v6503_v55  ;;  %v11523_v10 = vld [vmem:[#allocation78_spill] sm:$0xff] }
 0x466   :  { %11521 = vst [vmem:[#allocation35_spill] sm:$0xff] %v10378_v48  ;;  %v4900_v38 = vadd.f32 %v4899_v31, %v10378_v48  ;;  %v4971_v9 = vmul.f32 %v10378_v48, %v10378_v48  ;;  %6825 = vmatmul.msk.f32.gmra.mxu3 %vm116_vm1, %v6759_v40  ;;  %v2706_v31 = vadd.f32 %v11523_v10, %v11522_v54  ;;  %v6504_v28 = vld [vmem:[%s11270_s1 + $0x33a] sm:$0xff] }
 0x467   :  { %v6760_v40 = vld [vmem:[%s11270_s1 + $0x321] sm:$0xff] }
 0x468   :  { %v5034_v41 = vadd.f32 %v5033_v58, %v4971_v9  ;;  %6700 = vmatmul.msk.f32.gmra.mxu2 %vm116_vm1, %v6634_v30 }
 0x469   :  { %v4196_v1 = vpop.f32.mrf.mxu3  ;;  %v4730_v46 = vpop.f32.mrf.mxu0 }
 0x46a   :  { %v4304_v27 = vadd.f32 %v4196_v1, %v10292_v50  ;;  %v3142_v19 = vpop.f32.mrf.mxu1 }
 0x46b   :  { %v3240_v3 = vadd.f32 %v3142_v19, %v2706_v31  ;;  %v3677_v9 = vpop.f32.mrf.mxu2  ;;  %v11526_v31 = vld [vmem:[#allocation79_spill] sm:$0xff] }
 0x46c   :  { %v10401_v58 = vadd.f32 %v4730_v46, %v4304_v27  ;;  %6955 = vmatmul.msk.f32.gmra.mxu0 %vm116_vm1, %v6501_v42  ;;  %v2707_v27 = vadd.f32 %v11526_v31, %v11525_v37  ;;  %v11528_v31 = vld [vmem:[#allocation80_spill] sm:$0xff] }
 0x46d   :  { %v10407_v1 = vadd.f32 %v3677_v9, %v3240_v3  ;;  %6570 = vmatmul.msk.f32.gmra.mxu1 %vm116_vm1, %v6504_v28 }
 0x46e   :  { %11524 = vst [vmem:[#allocation19_spill] sm:$0xff] %v10401_v58  ;;  %v4901_v30 = vadd.f32 %v4900_v38, %v10401_v58  ;;  %v4972_v50 = vmul.f32 %v10401_v58, %v10401_v58  ;;  %6826 = vmatmul.msk.f32.gmra.mxu3 %vm116_vm1, %v6760_v40  ;;  %v6761_v38 = vld [vmem:[%s11270_s1 + $0x331] sm:$0xff] }
 0x470   :  { %v5035_v54 = vadd.f32 %v5034_v41, %v4972_v50 }
 0x471   :  { %v4199_v10 = vpop.f32.mrf.mxu3  ;;  %v4733_v19 = vpop.f32.mrf.mxu0 }
 0x472   :  { %v4305_v46 = vadd.f32 %v4199_v10, %v10315_v33  ;;  %v3145_v42 = vpop.f32.mrf.mxu1  ;;  %v11527_v10 = vld [vmem:[#allocation30_spill] sm:$0xff] }
 0x473   :  { %v3241_v43 = vadd.f32 %v3145_v42, %v2707_v27  ;;  %v3680_v9 = vpop.f32.mrf.mxu2  ;;  %v2708_v16 = vadd.f32 %v11528_v31, %v11527_v10  ;;  %v11530_v10 = vld [vmem:[#allocation81_spill] sm:$0xff] }
 0x474   :  { %v10417_v3 = vadd.f32 %v4733_v19, %v4305_v46  ;;  %6956 = vmatmul.msk.f32.gmra.mxu0 %vm116_vm1, %v6502_v21  ;;  %v6762_v21 = vld [vmem:[%s11270_s1 + $0x339] sm:$0xff] }
 0x475   :  { %v10423_v37 = vadd.f32 %v3680_v9, %v3241_v43 }
 0x476   :  { %v4902_v41 = vadd.f32 %v4901_v30, %v10417_v3  ;;  %v4973_v40 = vmul.f32 %v10417_v3, %v10417_v3  ;;  %6827 = vmatmul.msk.f32.gmra.mxu3 %vm116_vm1, %v6761_v38 }
 0x478   :  { %v5036_v33 = vadd.f32 %v5035_v54, %v4973_v40 }
 0x479   :  { %v4202_v50 = vpop.f32.mrf.mxu3  ;;  %v4736_v46 = vpop.f32.mrf.mxu0 }
 0x47a   :  { %v4306_v27 = vadd.f32 %v4202_v50, %v10338_v2  ;;  %v3148_v19 = vpop.f32.mrf.mxu1  ;;  %v11529_v50 = vld [vmem:[#allocation32_spill] sm:$0xff] }
 0x47b   :  { %v3242_v30 = vadd.f32 %v3148_v19, %v2708_v16  ;;  %v3683_v43 = vpop.f32.mrf.mxu2  ;;  %v2709_v31 = vadd.f32 %v11530_v10, %v11529_v50 }
 0x47c   :  { %v10432_v42 = vadd.f32 %v4736_v46, %v4306_v27  ;;  %6957 = vmatmul.msk.f32.gmra.mxu0 %vm116_vm1, %v6503_v55  ;;  %v6763_v55 = vld [vmem:[%s11270_s1 + $0x349] sm:$0xff] }
 0x47d   :  { %v3777_v9 = vadd.f32 %v3683_v43, %v3242_v30 }
 0x47e   :  { %v4903_v54 = vadd.f32 %v4902_v41, %v10432_v42  ;;  %v4974_v38 = vmul.f32 %v10432_v42, %v10432_v42  ;;  %6828 = vmatmul.msk.f32.gmra.mxu3 %vm116_vm1, %v6762_v21 }
 0x480   :  { %v5037_v2 = vadd.f32 %v5036_v33, %v4974_v38  ;;  %v11531_v38 = vld [vmem:[#allocation34_spill] sm:$0xff] }
 0x481   :  { %v4205_v40 = vpop.f32.mrf.mxu3  ;;  %v4739_v27 = vpop.f32.mrf.mxu0 }
 0x482   :  { %v4307_v16 = vadd.f32 %v4205_v40, %v10361_v34  ;;  %v3151_v46 = vpop.f32.mrf.mxu1  ;;  %v11532_v40 = vld [vmem:[#allocation82_spill] sm:$0xff] }
 0x483   :  { %v3243_v41 = vadd.f32 %v3151_v46, %v2709_v31  ;;  %v3686_v0 = vpop.f32.mrf.mxu2  ;;  %v2710_v50 = vadd.f32 %v11532_v40, %v11531_v38  ;;  %v11534_v38 = vld [vmem:[#allocation83_spill] sm:$0xff] }
 0x484   :  { %v10445_v19 = vadd.f32 %v4739_v27, %v4307_v16  ;;  %6958 = vmatmul.msk.f32.gmra.mxu0 %vm116_vm1, %v6504_v28  ;;  %v6893_v28 = vld [vmem:[%s11270_s1 + $0x34a] sm:$0xff] }
 0x485   :  { %v3778_v30 = vadd.f32 %v3686_v0, %v3243_v41 }
 0x486   :  { %v4904_v33 = vadd.f32 %v4903_v54, %v10445_v19  ;;  %v4975_v21 = vmul.f32 %v10445_v19, %v10445_v19  ;;  %6829 = vmatmul.msk.f32.gmra.mxu3 %vm116_vm1, %v6763_v55  ;;  %v6764_v54 = vld [vmem:[%s11270_s1 + $0x351] sm:$0xff] }
 0x488   :  { %v5038_v34 = vadd.f32 %v5037_v2, %v4975_v21 }
 0x489   :  { %v4208_v43 = vpop.f32.mrf.mxu3  ;;  %v4742_v31 = vpop.f32.mrf.mxu0 }
 0x48a   :  { %v4308_v10 = vadd.f32 %v4208_v43, %v10384_v49  ;;  %v3154_v16 = vpop.f32.mrf.mxu1  ;;  %v11533_v43 = vld [vmem:[#allocation37_spill] sm:$0xff] }
 0x48b   :  { %v3244_v0 = vadd.f32 %v3154_v16, %v2710_v50  ;;  %v3689_v2 = vpop.f32.mrf.mxu2  ;;  %v2711_v40 = vadd.f32 %v11534_v38, %v11533_v43 }
 0x48c   :  { %v10461_v27 = vadd.f32 %v4742_v31, %v4308_v10  ;;  %6959 = vmatmul.msk.f32.gmra.mxu0 %vm116_vm1, %v6893_v28  ;;  %v6894_v31 = vld [vmem:[%s11270_s1 + $0x352] sm:$0xff] }
 0x48d   :  { %v3779_v55 = vadd.f32 %v3689_v2, %v3244_v0 }
 0x48e   :  { %v4905_v46 = vadd.f32 %v4904_v33, %v10461_v27  ;;  %v4976_v49 = vmul.f32 %v10461_v27, %v10461_v27  ;;  %6830 = vmatmul.msk.f32.gmra.mxu3 %vm116_vm1, %v6764_v54 }
 0x490   :  { %v5039_v41 = vadd.f32 %v5038_v34, %v4976_v49 }
 0x491   :  { %v4211_v21 = vpop.f32.mrf.mxu3  ;;  %v4745_v10 = vpop.f32.mrf.mxu0 }
 0x492   :  { %v4309_v50 = vadd.f32 %v4211_v21, %v10407_v1  ;;  %v3157_v28 = vpop.f32.mrf.mxu1 }
 0x493   :  { %v3245_v33 = vadd.f32 %v3157_v28, %v2711_v40  ;;  %v3692_v17 = vpop.f32.mrf.mxu2 }
 0x494   :  { %v10474_v16 = vadd.f32 %v4745_v10, %v4309_v50  ;;  %6960 = vmatmul.msk.f32.gmra.mxu0 %vm116_vm1, %v6894_v31 }
 0x495   :  { %v3780_v0 = vadd.f32 %v3692_v17, %v3245_v33 }
 0x496   :  { %v4906_v34 = vadd.f32 %v4905_v46, %v10474_v16  ;;  %v4977_v54 = vmul.f32 %v10474_v16, %v10474_v16 }
 0x498   :  { %v5040_v2 = vadd.f32 %v5039_v41, %v4977_v54 }
 0x499   :  { %v4214_v1 = vpop.f32.mrf.mxu3  ;;  %v4748_v21 = vpop.f32.mrf.mxu0 }
 0x49a   :  { %v4310_v49 = vadd.f32 %v4214_v1, %v10423_v37  ;;  %v3160_v48 = vpop.f32.mrf.mxu1 }
 0x49b   :  { %v3695_v33 = vpop.f32.mrf.mxu2 }
 0x49c   :  { %v10481_v43 = vadd.f32 %v4748_v21, %v4310_v49 }
 0x49e   :  { %11535 = vst [vmem:[#allocation38_spill] sm:$0xff] %v10481_v43  ;;  %v4907_v38 = vadd.f32 %v4906_v34, %v10481_v43  ;;  %v4978_v40 = vmul.f32 %v10481_v43, %v10481_v43 }
 0x4a0   :  { %v5041_v50 = vadd.f32 %v5040_v2, %v4978_v40 }
 0x4a1   :  { %v4217_v10 = vpop.f32.mrf.mxu3  ;;  %v4751_v46 = vpop.f32.mrf.mxu0 }
 0x4a2   :  { %v4311_v31 = vadd.f32 %v4217_v10, %v3777_v9  ;;  %v3163_v21 = vpop.f32.mrf.mxu1 }
 0x4a4   :  { %v10486_v28 = vadd.f32 %v4751_v46, %v4311_v31  ;;  %v3698_v46 = vpop.f32.mrf.mxu2 }
 0x4a6   :  { %11536 = vst [vmem:[#allocation21_spill] sm:$0xff] %v10486_v28  ;;  %v4908_v17 = vadd.f32 %v4907_v38, %v10486_v28  ;;  %v4979_v37 = vmul.f32 %v10486_v28, %v10486_v28 }
 0x4a8   :  { %v5042_v41 = vadd.f32 %v5041_v50, %v4979_v37 }
 0x4a9   :  { %v4220_v54 = vpop.f32.mrf.mxu3  ;;  %v4754_v34 = vpop.f32.mrf.mxu0 }
 0x4aa   :  { %v4312_v1 = vadd.f32 %v4220_v54, %v3778_v30  ;;  %v3166_v54 = vpop.f32.mrf.mxu1 }
 0x4ac   :  { %v10491_v49 = vadd.f32 %v4754_v34, %v4312_v1  ;;  %v11540_v34 = vld [vmem:[#allocation84_spill] sm:$0xff] }
 0x4ae   :  { %11537 = vst [vmem:[#allocation41_spill] sm:$0xff] %v10491_v49  ;;  %v4909_v2 = vadd.f32 %v4908_v17, %v10491_v49  ;;  %v4980_v9 = vmul.f32 %v10491_v49, %v10491_v49  ;;  %v11539_v17 = vld [vmem:[#allocation40_spill] sm:$0xff] }
 0x4af   :  { %v2712_v28 = vadd.f32 %v11540_v34, %v11539_v17  ;;  %v11546_v34 = vld [vmem:[#allocation86_spill] sm:$0xff] }
 0x4b0   :  { %v5043_v40 = vadd.f32 %v5042_v41, %v4980_v9 }
 0x4b1   :  { %v4223_v10 = vpop.f32.mrf.mxu3  ;;  %v4757_v38 = vpop.f32.mrf.mxu0  ;;  %v3246_v41 = vadd.f32 %v3160_v48, %v2712_v28 }
 0x4b2   :  { %v4313_v31 = vadd.f32 %v4223_v10, %v3779_v55  ;;  %v3701_v55 = vpop.f32.mrf.mxu2  ;;  %v3169_v17 = vpop.f32.mrf.mxu1 }
 0x4b4   :  { %v10496_v43 = vadd.f32 %v4757_v38, %v4313_v31  ;;  %v3781_v31 = vadd.f32 %v3695_v33, %v3246_v41 }
 0x4b6   :  { %11538 = vst [vmem:[#allocation23_spill] sm:$0xff] %v10496_v43  ;;  %v4910_v50 = vadd.f32 %v4909_v2, %v10496_v43  ;;  %v4981_v30 = vmul.f32 %v10496_v43, %v10496_v43 }
 0x4b8   :  { %v5044_v37 = vadd.f32 %v5043_v40, %v4981_v30  ;;  %v11542_v40 = vld [vmem:[#allocation43_spill] sm:$0xff]  ;;  %v11543_v30 = vld [vmem:[#allocation85_spill] sm:$0xff] }
 0x4b9   :  { %v4226_v1 = vpop.f32.mrf.mxu3  ;;  %v4760_v36 = vpop.f32.mrf.mxu0  ;;  %v2713_v58 = vadd.f32 %v11543_v30, %v11542_v40 }
 0x4ba   :  { %v4314_v49 = vadd.f32 %v4226_v1, %v3780_v0  ;;  %v3704_v28 = vpop.f32.mrf.mxu2 }
 0x4bb   :  { %v3247_v0 = vadd.f32 %v3163_v21, %v2713_v58  ;;  %v3172_v58 = vpop.f32.mrf.mxu1 }
 0x4bc   :  { %v10503_v9 = vadd.f32 %v4760_v36, %v4314_v49 }
 0x4bd   :  { %v3782_v49 = vadd.f32 %v3698_v46, %v3247_v0  ;;  %v11548_v0 = vld [vmem:[#allocation87_spill] sm:$0xff] }
 0x4be   :  { %11541 = vst [vmem:[#allocation25_spill] sm:$0xff] %v10503_v9  ;;  %v4911_v10 = vadd.f32 %v4910_v50, %v10503_v9  ;;  %v4982_v2 = vmul.f32 %v10503_v9, %v10503_v9 }
 0x4c0   :  { %v5045_v38 = vadd.f32 %v5044_v37, %v4982_v2  ;;  %v11545_v37 = vld [vmem:[#allocation44_spill] sm:$0xff] }
 0x4c1   :  { %v4229_v43 = vpop.f32.mrf.mxu3  ;;  %v4763_v22 = vpop.f32.mrf.mxu0  ;;  %v2714_v41 = vadd.f32 %v11546_v34, %v11545_v37 }
 0x4c2   :  { %v4315_v24 = vadd.f32 %v4229_v43, %v3781_v31  ;;  %v3707_v30 = vpop.f32.mrf.mxu2 }
 0x4c3   :  { %v3248_v43 = vadd.f32 %v3166_v54, %v2714_v41  ;;  %v3175_v34 = vpop.f32.mrf.mxu1 }
 0x4c4   :  { %v10510_v1 = vadd.f32 %v4763_v22, %v4315_v24 }
 0x4c5   :  { %v3783_v21 = vadd.f32 %v3701_v55, %v3248_v43 }
 0x4c6   :  { %11544 = vst [vmem:[#allocation27_spill] sm:$0xff] %v10510_v1  ;;  %v4912_v36 = vadd.f32 %v4911_v10, %v10510_v1  ;;  %v4983_v48 = vmul.f32 %v10510_v1, %v10510_v1 }
 0x4c8   :  { %v5046_v50 = vadd.f32 %v5045_v38, %v4983_v48  ;;  %v11547_v38 = vld [vmem:[#allocation45_spill] sm:$0xff] }
 0x4c9   :  { %v4232_v33 = vpop.f32.mrf.mxu3  ;;  %v4766_v40 = vpop.f32.mrf.mxu0  ;;  %v2715_v48 = vadd.f32 %v11548_v0, %v11547_v38 }
 0x4ca   :  { %v4316_v2 = vadd.f32 %v4232_v33, %v3782_v49  ;;  %v3710_v38 = vpop.f32.mrf.mxu2 }
 0x4cb   :  { %v3249_v49 = vadd.f32 %v3169_v17, %v2715_v48  ;;  %v3178_v48 = vpop.f32.mrf.mxu1 }
 0x4cc   :  { %v10517_v31 = vadd.f32 %v4766_v40, %v4316_v2  ;;  %v11550_v40 = vld [vmem:[#allocation88_spill] sm:$0xff] }
 0x4cd   :  { %v3784_v41 = vadd.f32 %v3704_v28, %v3249_v49 }
 0x4ce   :  { %v4913_v22 = vadd.f32 %v4912_v36, %v10517_v31  ;;  %v4984_v24 = vmul.f32 %v10517_v31, %v10517_v31 }
 0x4d0   :  { %v5047_v10 = vadd.f32 %v5046_v50, %v4984_v24  ;;  %v11549_v50 = vld [vmem:[#allocation46_spill] sm:$0xff] }
 0x4d1   :  { %v4235_v46 = vpop.f32.mrf.mxu3  ;;  %v4769_v37 = vpop.f32.mrf.mxu0  ;;  %v2716_v43 = vadd.f32 %v11550_v40, %v11549_v50 }
 0x4d2   :  { %v4317_v9 = vadd.f32 %v4235_v46, %v3783_v21 }
 0x4d3   :  { %v3250_v21 = vadd.f32 %v3172_v58, %v2716_v43  ;;  %v3713_v58 = vpop.f32.mrf.mxu2 }
 0x4d4   :  { %v10524_v33 = vadd.f32 %v4769_v37, %v4317_v9 }
 0x4d6   :  { %v4914_v54 = vadd.f32 %v4913_v22, %v10524_v33  ;;  %v4985_v36 = vmul.f32 %v10524_v33, %v10524_v33  ;;  %v3785_v22 = vadd.f32 %v3707_v30, %v3250_v21 }
 0x4d8   :  { %v5048_v2 = vadd.f32 %v5047_v10, %v4985_v36  ;;  %v2717_v10 = vadd.f32 %v9281_v47, %v9279_v45  ;;  %v3181_v45 = vpop.f32.mrf.mxu1 }
 0x4d9   :  { %v4238_v55 = vpop.f32.mrf.mxu3  ;;  %v4772_v1 = vpop.f32.mrf.mxu0 }
 0x4da   :  { %v4318_v24 = vadd.f32 %v4238_v55, %v3784_v41  ;;  %v3251_v36 = vadd.f32 %v3175_v34, %v2717_v10 }
 0x4dc   :  { %v10531_v46 = vadd.f32 %v4772_v1, %v4318_v24  ;;  %v3786_v55 = vadd.f32 %v3710_v38, %v3251_v36 }
 0x4de   :  { %v4915_v9 = vadd.f32 %v4914_v54, %v10531_v46  ;;  %v4986_v17 = vmul.f32 %v10531_v46, %v10531_v46 }
 0x4e0   :  { %v5049_v0 = vadd.f32 %v5048_v2, %v4986_v17  ;;  %v2718_v2 = vadd.f32 %v9303_v12, %v9301_v7 }
 0x4e1   :  { %v4241_v28 = vpop.f32.mrf.mxu3  ;;  %v4775_v49 = vpop.f32.mrf.mxu0 }
 0x4e2   :  { %v4319_v37 = vadd.f32 %v4241_v28, %v3785_v22  ;;  %v3252_v47 = vadd.f32 %v3178_v48, %v2718_v2  ;;  %v3184_v48 = vpop.f32.mrf.mxu1 }
 0x4e4   :  { %v10538_v41 = vadd.f32 %v4775_v49, %v4319_v37  ;;  %v3787_v17 = vadd.f32 %v3713_v58, %v3252_v47 }
 0x4e6   :  { %v4916_v1 = vadd.f32 %v4915_v9, %v10538_v41  ;;  %v4987_v54 = vmul.f32 %v10538_v41, %v10538_v41  ;;  %v3716_v9 = vpop.f32.mrf.mxu2 }
 0x4e8   :  { %v5050_v50 = vadd.f32 %v5049_v0, %v4987_v54  ;;  %v2719_v0 = vadd.f32 %v9325_v59, %v9323_v15 }
 0x4e9   :  { %v4244_v30 = vpop.f32.mrf.mxu3  ;;  %v4778_v43 = vpop.f32.mrf.mxu0 }
 0x4ea   :  { %v4320_v40 = vadd.f32 %v4244_v30, %v3786_v55  ;;  %v3253_v12 = vadd.f32 %v3181_v45, %v2719_v0  ;;  %v2720_v55 = vadd.f32 %v9347_v56, %v9345_v8 }
 0x4ec   :  { %v10545_v24 = vadd.f32 %v4778_v43, %v4320_v40  ;;  %v3788_v36 = vadd.f32 %v3716_v9, %v3253_v12  ;;  %v3254_v59 = vadd.f32 %v3184_v48, %v2720_v55  ;;  %v3187_v43 = vpop.f32.mrf.mxu1 }
 0x4ee   :  { %v4917_v34 = vadd.f32 %v4916_v1, %v10545_v24  ;;  %v4988_v21 = vmul.f32 %v10545_v24, %v10545_v24  ;;  %v3719_v54 = vpop.f32.mrf.mxu2 }
 0x4ef   :  { %v3789_v45 = vadd.f32 %v3719_v54, %v3254_v59 }
 0x4f0   :  { %v5051_v22 = vadd.f32 %v5050_v50, %v4988_v21  ;;  %v2721_v21 = vadd.f32 %v9369_v53, %v9367_v62 }
 0x4f1   :  { %v4247_v38 = vpop.f32.mrf.mxu3  ;;  %v4781_v7 = vpop.f32.mrf.mxu0 }
 0x4f2   :  { %v4321_v28 = vadd.f32 %v4247_v38, %v3787_v17  ;;  %v3255_v56 = vadd.f32 %v3187_v43, %v2721_v21 }
 0x4f4   :  { %v10552_v10 = vadd.f32 %v4781_v7, %v4321_v28  ;;  %v3190_v12 = vpop.f32.mrf.mxu1 }
 0x4f6   :  { %v4918_v37 = vadd.f32 %v4917_v34, %v10552_v10  ;;  %v4989_v49 = vmul.f32 %v10552_v10, %v10552_v10  ;;  %v3722_v8 = vpop.f32.mrf.mxu2 }
 0x4f7   :  { %v3790_v28 = vadd.f32 %v3722_v8, %v3255_v56 }
 0x4f8   :  { %v5052_v1 = vadd.f32 %v5051_v22, %v4989_v49 }
 0x4f9   :  { %v4250_v58 = vpop.f32.mrf.mxu3  ;;  %v4784_v15 = vpop.f32.mrf.mxu0 }
 0x4fa   :  { %v4322_v50 = vadd.f32 %v4250_v58, %v3788_v36 }
 0x4fc   :  { %v10559_v30 = vadd.f32 %v4784_v15, %v4322_v50 }
 0x4fe   :  { %v4919_v2 = vadd.f32 %v4918_v37, %v10559_v30  ;;  %v4990_v40 = vmul.f32 %v10559_v30, %v10559_v30  ;;  %v2722_v37 = vadd.f32 %v9391_v57, %v9389_v39 }
 0x500   :  { %v5053_v47 = vadd.f32 %v5052_v1, %v4990_v40  ;;  %v3256_v53 = vadd.f32 %v3190_v12, %v2722_v37  ;;  %v3725_v1 = vpop.f32.mrf.mxu2 }
 0x501   :  { %v4253_v34 = vpop.f32.mrf.mxu3  ;;  %v4787_v17 = vpop.f32.mrf.mxu0 }
 0x502   :  { %v4323_v9 = vadd.f32 %v4253_v34, %v3789_v45  ;;  %v3791_v55 = vadd.f32 %v3725_v1, %v3256_v53 }
 0x504   :  { %v10566_v22 = vadd.f32 %v4787_v17, %v4323_v9 }
 0x506   :  { %v4920_v38 = vadd.f32 %v4919_v2, %v10566_v22  ;;  %v4991_v0 = vmul.f32 %v10566_v22, %v10566_v22 }
 0x508   :  { %v5054_v7 = vadd.f32 %v5053_v47, %v4991_v0 }
 0x509   :  { %v4256_v48 = vpop.f32.mrf.mxu3  ;;  %v4790_v62 = vpop.f32.mrf.mxu0 }
 0x50a   :  { %v4324_v49 = vadd.f32 %v4256_v48, %v3790_v28 }
 0x50c   :  { %v10573_v36 = vadd.f32 %v4790_v62, %v4324_v49 }
 0x50e   :  { %v4921_v54 = vadd.f32 %v4920_v38, %v10573_v36  ;;  %v4992_v58 = vmul.f32 %v10573_v36, %v10573_v36 }
 0x510   :  { %v5055_v50 = vadd.f32 %v5054_v7, %v4992_v58 }
 0x511   :  { %v4259_v15 = vpop.f32.mrf.mxu3  ;;  %v4793_v2 = vpop.f32.mrf.mxu0 }
 0x512   :  { %v4325_v59 = vadd.f32 %v4259_v15, %v3791_v55 }
 0x514   :  { %v10578_v40 = vadd.f32 %v4793_v2, %v4325_v59 }
 0x516   :  { %v4922_v39 = vadd.f32 %v4921_v54, %v10578_v40  ;;  %v4993_v57 = vmul.f32 %v10578_v40, %v10578_v40 }
 0x518   :  { %v4923_v43 = vrot.slane %v4922_v39, 4  ;;  %v5056_v45 = vadd.f32 %v5055_v50, %v4993_v57 }
 0x51a   :  { %v4924_v47 = vadd.f32 %v4923_v43, %v4922_v39  ;;  %v5057_v34 = vrot.slane %v5056_v45, 4 }
 0x51c   :  { %v4925_v21 = vrot.slane %v4924_v47, 2  ;;  %v5058_v9 = vadd.f32 %v5057_v34, %v5056_v45 }
 0x51e   :  { %v4926_v17 = vadd.f32 %v4925_v21, %v4924_v47  ;;  %v5059_v8 = vrot.slane %v5058_v9, 2 }
 0x520   :  { %v4927_v56 = vrot.slane %v4926_v17, 1  ;;  %v5060_v38 = vadd.f32 %v5059_v8, %v5058_v9 }
 0x522   :  { %v4928_v0 = vadd.f32 %v4927_v56, %v4926_v17  ;;  %v5061_v28 = vrot.slane %v5060_v38, 1 }
 0x524   :  { %v10583_v7 = vmul.f32 0.001953125, %v4928_v0  ;;  %v5062_v12 = vadd.f32 %v5061_v28, %v5060_v38 }
 0x526   :  { %v5063_v48 = vmul.f32 0.001953125, %v5062_v12  ;;  %v5064_v37 = vmul.f32 %v10583_v7, %v10583_v7 }
 0x528   :  { %v5065_v49 = vsub.f32 %v5063_v48, %v5064_v37 }
 0x52a   :  { %v5066_v62 = vmax.f32 %v5065_v49, 0.0 }
 0x52c   :  { %v5067_v53 = vadd.f32 1e-05, %v5066_v62 }
 0x52e   :  { %6988 = vrsqrt.f32 %v5067_v53  ;;  %vm5075_vm2 = vcmp.eq.f32.partialorder %v5067_v53, inf  ;;  %v5078_v2 = vand.u32 2147483648, %v5067_v53  ;;  %vm5077_vm3 = vcmp.eq.f32.partialorder %v5067_v53, 0.0 }
 0x534   :  { %v6989_v1 = vpop.eup %6988 }
 0x535   :  { %v5069_v54 = vmul.f32 %v6989_v1, %v5067_v53 }
 0x537   :  { %v5070_v58 = vmul.f32 %v6989_v1, %v5069_v54 }
 0x539   :  { %v5071_v55 = vmul.f32 0.5, %v5070_v58 }
 0x53b   :  { %v5072_v50 = vsub.f32 1.5, %v5071_v55 }
 0x53d   :  { %v5073_v15 = vmul.f32 %v6989_v1, %v5072_v50 }
 0x53e   :  { %5084 = sbr.rel (%p6961_p0) target bundleno = 1349 (0x545), region = 49 }
 0x53f   :  { %v5074_v59 = vmul.f32 %v5073_v15, %v5067_v53 }
 0x541   :  { %v5076_v39 = vsel %vm5075_vm2, %v5067_v53, %v5074_v59 }
 0x542   :  { %v10587_v57 = vsel %vm5077_vm3, %v5078_v2, %v5076_v39 }
 0x543   :  { %5085 = vst [vmem:[#allocation2] sm:$0x1] %v10583_v7 }
 0x544   :  { %5086 = vst [vmem:[#allocation3] sm:$0x1] %v10587_v57 }
 0x545 PF:  { %p6962_p1 = scmp.eq.s32.totalorder %s11269_s0, 1 }
 0x547   :  { %5090 = sbr.rel (%p6962_p1) target bundleno = 1359 (0x54f), region = 53 }
 0x54c   :  { %v5091_v43 = vld [vmem:[%s11273_s4] sm:$0x1] }
 0x54d   :  { %v5093_v45 = vld [vmem:[%s11274_s5] sm:$0x1]  ;;  %5092 = vst [vmem:[#allocation2] sm:$0x1] %v5091_v43 }
 0x54e   :  { %5094 = vst [vmem:[#allocation3] sm:$0x1] %v5093_v45 }
 0x54f PF:  { %6994 = vrcp.f32 %v10587_v57  ;;  %v5187_v34 = vand.u32 2147483647, %v10587_v57  ;;  %v5129_v56 = vsub.f32 %v9778_v29, %v10583_v7  ;;  %vm5183_vm4 = vweird.f32 %v10587_v57  ;;  %s5913_s2 = sshll.u32 %s11280_s11, 4  ;;  %s7144_s20 = smov [#allocation5]   ;;  %s5914_s2 = int_to_ptr.hbm [resolvable:$true] %s5913_s2 }
 0x550   :  { %v5189_v38 = vand.u32 2147483648, %v10587_v57  ;;  %v5128_v62 = vsub.f32 %v9751_v13, %v10583_v7  ;;  %v5127_v1 = vsub.f32 %v9722_v18, %v10583_v7  ;;  %v5126_v54 = vsub.f32 %v9697_v61, %v10583_v7  ;;  %s5911_s21 = sshll.u32 %s7144_s20, 4  ;;  %s7145_s11 = smov [#allocation10]   ;;  %s5912_s21 = int_to_ptr.vmem [resolvable:$true] %s5911_s21 }
 0x551   :  { %vm10611_vm6 = vcmp.eq.f32.partialorder %v5187_v34, 8.507059e+37  ;;  %v5125_v50 = vsub.f32 %v9674_v14, %v10583_v7  ;;  %v5124_v59 = vsub.f32 %v9651_v44, %v10583_v7  ;;  %v5123_v13 = vsub.f32 %v9628_v6, %v10583_v7  ;;  %s5944_s22 = sshll.u32 %s7145_s11, 4  ;;  %s5946_s4 = sshll.u32 %s11283_s14, 4  ;;  %s5945_s22 = int_to_ptr.vmem [resolvable:$true] %s5944_s22  ;;  %s5947_s4 = int_to_ptr.hbm [resolvable:$true] %s5946_s4 }
 0x552   :  { %v5190_v55 = vor.u32 1.1754944e-38, %v5189_v38  ;;  %v5122_v2 = vsub.f32 %v9605_v11, %v10583_v7  ;;  %v5121_v14 = vsub.f32 %v9582_v23, %v10583_v7  ;;  %v5145_v39 = vsub.f32 %v10148_v26, %v10583_v7  ;;  %s7146_s5 = smov [#allocation12]   ;;  %s5957_s25 = sshll.u32 %s11284_s15, 4  ;;  %s5958_s25 = int_to_ptr.hbm [resolvable:$true] %s5957_s25 }
 0x553   :  { %v5120_v44 = vsub.f32 %v9559_v5, %v10583_v7  ;;  %v5144_v43 = vsub.f32 %v10125_v4, %v10583_v7  ;;  %v5161_v45 = vsub.f32 %v10474_v16, %v10583_v7  ;;  %v5119_v23 = vsub.f32 %v9536_v35, %v10583_v7  ;;  %s5955_s24 = sshll.u32 %s7146_s5, 4  ;;  %s7147_s15 = smov [#allocation7]   ;;  %s5956_s24 = int_to_ptr.vmem [resolvable:$true] %s5955_s24 }
 0x554   :  { %v5095_v21 = vld [vmem:[#allocation2] sm:$0x1]  ;;  %v5143_v26 = vsub.f32 %v10102_v63, %v10583_v7  ;;  %v5160_v5 = vsub.f32 %v10461_v27, %v10583_v7  ;;  %v5142_v4 = vsub.f32 %v10079_v32, %v10583_v7  ;;  %s5922_s27 = sshll.u32 %s7147_s15, 4  ;;  %s5924_s30 = sshll.u32 %s11281_s12, 4  ;;  %s5923_s27 = int_to_ptr.vmem [resolvable:$true] %s5922_s27  ;;  %s5925_s30 = int_to_ptr.hbm [resolvable:$true] %s5924_s30 }
 0x555   :  { %v5096_v47 = vld [vmem:[#allocation3] sm:$0x1]  ;;  %v6995_v8 = vpop.eup %6994  ;;  %v5112_v28 = vsub.f32 %v10583_v7, %v5095_v21  ;;  %s7148_s16 = smov [#allocation9]   ;;  %s5935_s1 = sshll.u32 %s11282_s13, 4  ;;  %s5936_s1 = int_to_ptr.hbm [resolvable:$true] %s5935_s1 }
 0x556   :  { %6996 = vrcp.f32 %v5096_v47  ;;  %v5106_v9 = vand.u32 2147483647, %v5096_v47  ;;  %v5108_v17 = vand.u32 2147483648, %v5096_v47  ;;  %vm5102_vm5 = vweird.f32 %v5096_v47  ;;  %s5933_s17 = sshll.u32 %s7148_s16, 4  ;;  %s5934_s17 = int_to_ptr.vmem [resolvable:$true] %s5933_s17 }
 0x557   :  { %v5179_v12 = vmul.f32 %v6995_v8, %v10587_v57  ;;  %vm5184_vm8 = vweird.f32 %v6995_v8 }
 0x558   :  { %vm10615_vm7 = vcmp.eq.f32.partialorder %v5106_v9, 8.507059e+37  ;;  %v5109_v29 = vor.u32 1.1754944e-38, %v5108_v17  ;;  %vm10635_vm10 = vmor %vm5183_vm4, %vm5184_vm8  ;;  %v5159_v9 = vsub.f32 %v10445_v19, %v10583_v7  ;;  %v5117_v17 = vsub.f32 %v9489_v25, %v10583_v7 }
 0x559   :  { %v5180_v53 = vsub.f32 1.0, %v5179_v12 }
 0x55b   :  { %v5181_v15 = vmul.f32 %v6995_v8, %v5180_v53 }
 0x55c   :  { %v6997_v0 = vpop.eup %6996 }
 0x55d   :  { %v5098_v37 = vmul.f32 %v6997_v0, %v5096_v47  ;;  %vm5103_vm9 = vweird.f32 %v6997_v0  ;;  %v5182_v11 = vadd.f32 %v6995_v8, %v5181_v15  ;;  %v5118_v47 = vsub.f32 %v9512_v20, %v10583_v7 }
 0x55e   :  { %vm10646_vm11 = vmor %vm5102_vm5, %vm5103_vm9  ;;  %vm5742_vm9 = vcmask 1041408  }
 0x55f   :  { %v5099_v58 = vsub.f32 1.0, %v5098_v37  ;;  %v5186_v21 = vsel %vm10635_vm10, %v6995_v8, %v5182_v11  ;;  %v5141_v37 = vsub.f32 %v10056_v51, %v10583_v7  ;;  %v5158_v8 = vsub.f32 %v10432_v42, %v10583_v7 }
 0x560   :  { %v10674_v12 = vsel %vm10611_vm6, %v5190_v55, %v5186_v21  ;;  %vm5792_vm10 = vcmask 1040384  }
 0x561   :  { %v5100_v18 = vmul.f32 %v6997_v0, %v5099_v58  ;;  %v5207_v58 = vmul.f32 %v10674_v12, %v5129_v56  ;;  %v5206_v15 = vmul.f32 %v10674_v12, %v5128_v62  ;;  %v5204_v61 = vmul.f32 %v10674_v12, %v5126_v54 }
 0x562   :  { %v5203_v6 = vmul.f32 %v10674_v12, %v5125_v50  ;;  %v5202_v11 = vmul.f32 %v10674_v12, %v5124_v59  ;;  %v5201_v49 = vmul.f32 %v10674_v12, %v5123_v13  ;;  %v5200_v56 = vmul.f32 %v10674_v12, %v5122_v2  ;;  %v10709_v2 = vld [vmem:[%s11275_s6] ss:$0 sm:$0xff] }
 0x563   :  { %v5101_v34 = vadd.f32 %v6997_v0, %v5100_v18  ;;  %v5205_v18 = vmul.f32 %v10674_v12, %v5127_v1  ;;  %v5199_v1 = vmul.f32 %v10674_v12, %v5121_v14  ;;  %v5223_v54 = vmul.f32 %v10674_v12, %v5145_v39 }
 0x564   :  { %v5198_v50 = vmul.f32 %v10674_v12, %v5120_v44  ;;  %v5222_v59 = vmul.f32 %v10674_v12, %v5144_v43  ;;  %v5219_v20 = vmul.f32 %v10674_v12, %v5141_v37  ;;  %v5236_v32 = vmul.f32 %v10674_v12, %v5158_v8 }
 0x565   :  { %v5105_v38 = vsel %vm10646_vm11, %v6997_v0, %v5101_v34  ;;  %v5116_v0 = vsub.f32 %v9466_v52, %v10583_v7  ;;  %v5140_v34 = vsub.f32 %v10033_v60, %v10583_v7 }
 0x566   :  { %v5110_v53 = vsel %vm10615_vm7, %v5109_v29, %v5105_v38 }
 0x567   :  { %v5111_v48 = vmul.f32 %v5110_v53, %v10587_v57  ;;  %v5113_v55 = vmul.f32 %v5112_v28, %v5110_v53  ;;  %v5194_v42 = vmul.f32 %v10674_v12, %v5116_v0 }
 0x569   :  { %v10693_v29 = vperm.slane %v5111_v48, 0  ;;  %v10695_v62 = vperm.slane %v5113_v55, 0  ;;  %v10722_v48 = vld [vmem:[%s11276_s7] ss:$0 sm:$0xff] }
 0x56b   :  { %v5272_v13 = vmul.f32 %v10693_v29, %v5207_v58  ;;  %v5271_v21 = vmul.f32 %v10693_v29, %v5206_v15  ;;  %v5270_v38 = vmul.f32 %v10693_v29, %v5205_v18  ;;  %v5269_v53 = vmul.f32 %v10693_v29, %v5204_v61 }
 0x56c   :  { %v5268_v14 = vmul.f32 %v10693_v29, %v5203_v6  ;;  %v5267_v39 = vmul.f32 %v10693_v29, %v5202_v11  ;;  %v5266_v44 = vmul.f32 %v10693_v29, %v5201_v49  ;;  %v5265_v43 = vmul.f32 %v10693_v29, %v5200_v56 }
 0x56d   :  { %v5337_v58 = vadd.f32 %v10695_v62, %v5272_v13  ;;  %v5336_v15 = vadd.f32 %v10695_v62, %v5271_v21  ;;  %v5335_v55 = vadd.f32 %v10695_v62, %v5270_v38  ;;  %v5334_v18 = vadd.f32 %v10695_v62, %v5269_v53 }
 0x56e   :  { %v5333_v61 = vadd.f32 %v10695_v62, %v5268_v14  ;;  %v5332_v6 = vadd.f32 %v10695_v62, %v5267_v39  ;;  %v5331_v11 = vadd.f32 %v10695_v62, %v5266_v44  ;;  %v5330_v49 = vadd.f32 %v10695_v62, %v5265_v43 }
 0x56f   :  { %v5405_v56 = vmul.f32 %v10709_v2, %v5337_v58  ;;  %v5404_v13 = vmul.f32 %v10709_v2, %v5336_v15  ;;  %v5403_v28 = vmul.f32 %v10709_v2, %v5335_v55  ;;  %v5402_v21 = vmul.f32 %v10709_v2, %v5334_v18 }
 0x570   :  { %v5401_v38 = vmul.f32 %v10709_v2, %v5333_v61  ;;  %v5400_v53 = vmul.f32 %v10709_v2, %v5332_v6  ;;  %v5399_v14 = vmul.f32 %v10709_v2, %v5331_v11  ;;  %v5398_v39 = vmul.f32 %v10709_v2, %v5330_v49 }
 0x571   :  { %v5473_v44 = vadd.f32 %v10722_v48, %v5405_v56  ;;  %v5472_v43 = vadd.f32 %v10722_v48, %v5404_v13  ;;  %v5471_v58 = vadd.f32 %v10722_v48, %v5403_v28  ;;  %v5470_v15 = vadd.f32 %v10722_v48, %v5402_v21 }
 0x572   :  { %v5469_v55 = vadd.f32 %v10722_v48, %v5401_v38  ;;  %v5239_v18 = vmul.f32 %v10674_v12, %v5161_v45  ;;  %v5197_v61 = vmul.f32 %v10674_v12, %v5119_v23  ;;  %v5221_v6 = vmul.f32 %v10674_v12, %v5143_v26 }
 0x573   :  { %v5545_v28 = vmax.f32 %v5473_v44, 0.0  ;;  %v5544_v11 = vmax.f32 %v5472_v43, 0.0  ;;  %v5468_v49 = vadd.f32 %v10722_v48, %v5400_v53  ;;  %v5467_v56 = vadd.f32 %v10722_v48, %v5399_v14 }
 0x574   :  { %v5543_v13 = vmax.f32 %v5471_v58, 0.0  ;;  %v5542_v16 = vmax.f32 %v5470_v15, 0.0  ;;  %v5541_v21 = vmax.f32 %v5469_v55, 0.0  ;;  %v10759_v45 = vadd.f32 %v10722_v48, %v5398_v39 }
 0x575   :  { %5619 = vmatpush.msrb.mxu1 %v5545_v28  ;;  %v5264_v35 = vmul.f32 %v10693_v29, %v5199_v1  ;;  %v5288_v23 = vmul.f32 %v10693_v29, %v5223_v54  ;;  %v5263_v63 = vmul.f32 %v10693_v29, %v5198_v50  ;;  %v5287_v26 = vmul.f32 %v10693_v29, %v5222_v59 }
 0x576   :  { %v5304_v38 = vmul.f32 %v10693_v29, %v5239_v18  ;;  %v5262_v53 = vmul.f32 %v10693_v29, %v5197_v61  ;;  %v5286_v14 = vmul.f32 %v10693_v29, %v5221_v6  ;;  %v5238_v39 = vmul.f32 %v10674_v12, %v5160_v5 }
 0x577   :  { %5620 = vmatpush.msrb.mxu1 %v5544_v11  ;;  %v5329_v1 = vadd.f32 %v10695_v62, %v5264_v35  ;;  %v5353_v54 = vadd.f32 %v10695_v62, %v5288_v23  ;;  %v5328_v50 = vadd.f32 %v10695_v62, %v5263_v63  ;;  %v5352_v59 = vadd.f32 %v10695_v62, %v5287_v26 }
 0x578   :  { %v5369_v44 = vadd.f32 %v10695_v62, %v5304_v38  ;;  %v5327_v43 = vadd.f32 %v10695_v62, %v5262_v53  ;;  %v5351_v58 = vadd.f32 %v10695_v62, %v5286_v14  ;;  %v5303_v15 = vmul.f32 %v10693_v29, %v5238_v39 }
 0x579   :  { %5621 = vmatpush.msrb.mxu1 %v5543_v13  ;;  %v5397_v27 = vmul.f32 %v10709_v2, %v5329_v1  ;;  %v5421_v5 = vmul.f32 %v10709_v2, %v5353_v54  ;;  %v5396_v55 = vmul.f32 %v10709_v2, %v5328_v50  ;;  %v5420_v18 = vmul.f32 %v10709_v2, %v5352_v59 }
 0x57a   :  { %v5437_v61 = vmul.f32 %v10709_v2, %v5369_v44  ;;  %v5395_v6 = vmul.f32 %v10709_v2, %v5327_v43  ;;  %v5419_v28 = vmul.f32 %v10709_v2, %v5351_v58  ;;  %v5368_v11 = vadd.f32 %v10695_v62, %v5303_v15 }
 0x57b   :  { %5622 = vmatpush.msrb.mxu1 %v5542_v16  ;;  %v5540_v35 = vmax.f32 %v5468_v49, 0.0  ;;  %v5465_v13 = vadd.f32 %v10722_v48, %v5397_v27  ;;  %v5489_v23 = vadd.f32 %v10722_v48, %v5421_v5  ;;  %v5488_v63 = vadd.f32 %v10722_v48, %v5420_v18 }
 0x57c   :  { %v5539_v26 = vmax.f32 %v5467_v56, 0.0  ;;  %v5505_v38 = vadd.f32 %v10722_v48, %v5437_v61  ;;  %v5487_v53 = vadd.f32 %v10722_v48, %v5419_v28  ;;  %v5436_v14 = vmul.f32 %v10709_v2, %v5368_v11 }
 0x57d   :  { %5623 = vmatpush.msrb.mxu1 %v5541_v21  ;;  %v5538_v39 = vmax.f32 %v10759_v45, 0.0  ;;  %v5561_v1 = vmax.f32 %v5489_v23, 0.0  ;;  %v5464_v16 = vadd.f32 %v10722_v48, %v5396_v55  ;;  %v5560_v49 = vmax.f32 %v5488_v63, 0.0 }
 0x57e   :  { %v5537_v54 = vmax.f32 %v5465_v13, 0.0  ;;  %v5577_v50 = vmax.f32 %v5505_v38, 0.0  ;;  %v5463_v59 = vadd.f32 %v10722_v48, %v5395_v6  ;;  %v5504_v44 = vadd.f32 %v10722_v48, %v5436_v14 }
 0x57f   :  { %5624 = vmatpush.msrb.mxu1 %v5540_v35  ;;  %5639 = vmatpush.msrb.mxu2 %v5561_v1  ;;  %v5559_v56 = vmax.f32 %v5487_v53, 0.0  ;;  %v5196_v21 = vmul.f32 %v10674_v12, %v5118_v47  ;;  %v5220_v45 = vmul.f32 %v10674_v12, %v5142_v4  ;;  %v5237_v43 = vmul.f32 %v10674_v12, %v5159_v9 }
 0x580   :  { %5659 = vmatpush.msrb.mxu3 %v5577_v50  ;;  %v5576_v58 = vmax.f32 %v5504_v44, 0.0  ;;  %v5195_v15 = vmul.f32 %v10674_v12, %v5117_v17  ;;  %v5536_v19 = vmax.f32 %v5464_v16, 0.0  ;;  %v5284_v51 = vmul.f32 %v10693_v29, %v5219_v20 }
 0x581   :  { %5625 = vmatpush.msrb.mxu1 %v5539_v26  ;;  %5640 = vmatpush.msrb.mxu2 %v5560_v49  ;;  %v5261_v47 = vmul.f32 %v10693_v29, %v5196_v21  ;;  %v5285_v4 = vmul.f32 %v10693_v29, %v5220_v45  ;;  %v5302_v25 = vmul.f32 %v10693_v29, %v5237_v43  ;;  %v5535_v37 = vmax.f32 %v5463_v59, 0.0 }
 0x582   :  { %5660 = vmatpush.msrb.mxu3 %v5576_v58  ;;  %v5260_v9 = vmul.f32 %v10693_v29, %v5195_v15  ;;  %v5301_v17 = vmul.f32 %v10693_v29, %v5236_v32  ;;  %v5349_v18 = vadd.f32 %v10695_v62, %v5284_v51  ;;  %v5259_v6 = vmul.f32 %v10693_v29, %v5194_v42  ;;  %v11560_v15 = vld [vmem:[#allocation89_spill] sm:$0xff] }
 0x583   :  { %5626 = vmatpush.msrb.mxu1 %v5538_v39  ;;  %5641 = vmatpush.msrb.mxu2 %v5559_v56  ;;  %v5326_v8 = vadd.f32 %v10695_v62, %v5261_v47  ;;  %v5350_v27 = vadd.f32 %v10695_v62, %v5285_v4  ;;  %v5367_v5 = vadd.f32 %v10695_v62, %v5302_v25  ;;  %v11562_v4 = vld [vmem:[#allocation19_spill] sm:$0xff] }
 0x584   :  { %v5325_v55 = vadd.f32 %v10695_v62, %v5260_v9  ;;  %v5366_v61 = vadd.f32 %v10695_v62, %v5301_v17  ;;  %v5218_v11 = vmul.f32 %v10674_v12, %v5140_v34  ;;  %v5417_v13 = vmul.f32 %v10709_v2, %v5349_v18  ;;  %v11563_v9 = vld [vmem:[#allocation47_spill] sm:$0xff] }
 0x585   :  { %5627 = vmatpush.msrb.mxu1 %v5537_v54  ;;  %v5394_v52 = vmul.f32 %v10709_v2, %v5326_v8  ;;  %v5418_v0 = vmul.f32 %v10709_v2, %v5350_v27  ;;  %v5435_v28 = vmul.f32 %v10709_v2, %v5367_v5  ;;  %v5324_v63 = vadd.f32 %v10695_v62, %v5259_v6  ;;  %v11564_v5 = vld [vmem:[#allocation56_spill] sm:$0xff] }
 0x586   :  { %v5393_v35 = vmul.f32 %v10709_v2, %v5325_v55  ;;  %v5434_v23 = vmul.f32 %v10709_v2, %v5366_v61  ;;  %v5283_v14 = vmul.f32 %v10693_v29, %v5218_v11  ;;  %v5485_v34 = vadd.f32 %v10722_v48, %v5417_v13 }
 0x587   :  { %5628 = vmatpush.msrb.mxu1 %v5536_v19  ;;  %v5462_v26 = vadd.f32 %v10722_v48, %v5394_v52  ;;  %v5486_v38 = vadd.f32 %v10722_v48, %v5418_v0  ;;  %v5503_v53 = vadd.f32 %v10722_v48, %v5435_v28  ;;  %v5392_v1 = vmul.f32 %v10709_v2, %v5324_v63  ;;  %v11561_v19 = vld [vmem:[#allocation57_spill] sm:$0xff]  ;;  %v11565_v52 = vld [vmem:[#allocation35_spill] sm:$0xff] }
 0x588   :  { %v5461_v60 = vadd.f32 %v10722_v48, %v5393_v35  ;;  %v5502_v39 = vadd.f32 %v10722_v48, %v5434_v23  ;;  %v5348_v50 = vadd.f32 %v10695_v62, %v5283_v14  ;;  %v5557_v44 = vmax.f32 %v5485_v34, 0.0 }
 0x589   :  { %5629 = vmatpush.msrb.mxu1 %v5535_v37  ;;  %v5534_v16 = vmax.f32 %v5462_v26, 0.0  ;;  %v5558_v49 = vmax.f32 %v5486_v38, 0.0  ;;  %v5575_v54 = vmax.f32 %v5503_v53, 0.0  ;;  %v5460_v21 = vadd.f32 %v10722_v48, %v5392_v1 }
 0x58a   :  { %v5533_v59 = vmax.f32 %v5461_v60, 0.0  ;;  %v5574_v56 = vmax.f32 %v5502_v39, 0.0  ;;  %v5416_v45 = vmul.f32 %v10709_v2, %v5348_v50  ;;  %v11559_v43 = vsub.f32 %v10417_v3, %v10583_v7 }
 0x58b   :  { %5630 = vmatpush.msrb.mxu1 %v5534_v16  ;;  %5642 = vmatpush.msrb.mxu2 %v5558_v49  ;;  %v5115_v20 = vsub.f32 %v11560_v15, %v10583_v7  ;;  %v5532_v32 = vmax.f32 %v5460_v21, 0.0  ;;  %v5139_v47 = vsub.f32 %v11561_v19, %v10583_v7  ;;  %v5156_v25 = vsub.f32 %v11562_v4, %v10583_v7  ;;  %v11566_v4 = vld [vmem:[#allocation55_spill] sm:$0xff] }
 0x58c   :  { %v5235_v58 = vmul.f32 %v10674_v12, %v11559_v43  ;;  %5661 = vmatpush.msrb.mxu3 %v5575_v54  ;;  %v5114_v51 = vsub.f32 %v11563_v9, %v10583_v7  ;;  %v5484_v3 = vadd.f32 %v10722_v48, %v5416_v45  ;;  %v5138_v55 = vsub.f32 %v11564_v5, %v10583_v7 }
 0x58d   :  { %5631 = vmatpush.msrb.mxu1 %v5533_v59  ;;  %5643 = vmatpush.msrb.mxu2 %v5557_v44  ;;  %v5193_v42 = vmul.f32 %v10674_v12, %v5115_v20  ;;  %v5217_v37 = vmul.f32 %v10674_v12, %v5139_v47  ;;  %v5234_v8 = vmul.f32 %v10674_v12, %v5156_v25 }
 0x58e   :  { %v5300_v17 = vmul.f32 %v10693_v29, %v5235_v58  ;;  %5662 = vmatpush.msrb.mxu3 %v5574_v56  ;;  %v5192_v27 = vmul.f32 %v10674_v12, %v5114_v51  ;;  %v5556_v18 = vmax.f32 %v5484_v3, 0.0  ;;  %v5155_v0 = vsub.f32 %v11565_v52, %v10583_v7  ;;  %v11569_v52 = vld [vmem:[#allocation65_spill] sm:$0xff] }
 0x58f   :  { %5632 = vmatpush.msrb.mxu1 %v5532_v32  ;;  %v5258_v6 = vmul.f32 %v10693_v29, %v5193_v42  ;;  %v5282_v28 = vmul.f32 %v10693_v29, %v5217_v37  ;;  %v5299_v11 = vmul.f32 %v10693_v29, %v5234_v8  ;;  %v5216_v13 = vmul.f32 %v10674_v12, %v5138_v55 }
 0x590   :  { %v5365_v61 = vadd.f32 %v10695_v62, %v5300_v17  ;;  %v5257_v35 = vmul.f32 %v10693_v29, %v5192_v27  ;;  %5644 = vmatpush.msrb.mxu2 %v5556_v18  ;;  %v5233_v26 = vmul.f32 %v10674_v12, %v5155_v0  ;;  %v5177_v38 = vsub.f32 %v10578_v40, %v10583_v7  ;;  %v11567_v27 = vld [vmem:[#allocation66_spill] sm:$0xff] }
 0x591   :  { %v5323_v63 = vadd.f32 %v10695_v62, %v5258_v6  ;;  %v5347_v53 = vadd.f32 %v10695_v62, %v5282_v28  ;;  %v5364_v14 = vadd.f32 %v10695_v62, %v5299_v11  ;;  %v5281_v34 = vmul.f32 %v10693_v29, %v5216_v13 }
 0x592   :  { %v5433_v23 = vmul.f32 %v10709_v2, %v5365_v61  ;;  %v5322_v60 = vadd.f32 %v10695_v62, %v5257_v35  ;;  %v5298_v16 = vmul.f32 %v10693_v29, %v5233_v26  ;;  %v5255_v49 = vmul.f32 %v10674_v12, %v5177_v38  ;;  %v11568_v61 = vld [vmem:[#allocation54_spill] sm:$0xff] }
 0x593   :  { %v5391_v1 = vmul.f32 %v10709_v2, %v5323_v63  ;;  %v5415_v54 = vmul.f32 %v10709_v2, %v5347_v53  ;;  %v5432_v40 = vmul.f32 %v10709_v2, %v5364_v14  ;;  %v5346_v59 = vadd.f32 %v10695_v62, %v5281_v34 }
 0x594   :  { %v5501_v39 = vadd.f32 %v10722_v48, %v5433_v23  ;;  %v5390_v50 = vmul.f32 %v10709_v2, %v5322_v60  ;;  %v5363_v21 = vadd.f32 %v10695_v62, %v5298_v16  ;;  %v5320_v45 = vmul.f32 %v10693_v29, %v5255_v49  ;;  %v11570_v60 = vld [vmem:[#allocation53_spill] sm:$0xff] }
 0x595   :  { %v5459_v56 = vadd.f32 %v10722_v48, %v5391_v1  ;;  %v5483_v43 = vadd.f32 %v10722_v48, %v5415_v54  ;;  %v5500_v58 = vadd.f32 %v10722_v48, %v5432_v40  ;;  %v5414_v20 = vmul.f32 %v10709_v2, %v5346_v59 }
 0x596   :  { %v5573_v44 = vmax.f32 %v5501_v39, 0.0  ;;  %v5458_v15 = vadd.f32 %v10722_v48, %v5390_v50  ;;  %v5431_v19 = vmul.f32 %v10709_v2, %v5363_v21  ;;  %v5385_v47 = vadd.f32 %v10695_v62, %v5320_v45  ;;  %v11571_v50 = vld [vmem:[#allocation64_spill] sm:$0xff] }
 0x597   :  { %v5531_v32 = vmax.f32 %v5459_v56, 0.0  ;;  %v5137_v25 = vsub.f32 %v11566_v4, %v10583_v7  ;;  %v5555_v9 = vmax.f32 %v5483_v43, 0.0  ;;  %v5572_v51 = vmax.f32 %v5500_v58, 0.0 }
 0x598   :  { %5663 = vmatpush.msrb.mxu3 %v5573_v44  ;;  %v5530_v3 = vmax.f32 %v5458_v15, 0.0  ;;  %v5482_v17 = vadd.f32 %v10722_v48, %v5414_v20  ;;  %v5499_v42 = vadd.f32 %v10722_v48, %v5431_v19  ;;  %v5453_v37 = vmul.f32 %v10709_v2, %v5385_v47 }
 0x599   :  { %5633 = vmatpush.msrb.mxu1 %v5531_v32  ;;  %v5215_v8 = vmul.f32 %v10674_v12, %v5137_v25  ;;  %v5154_v5 = vsub.f32 %v11567_v27, %v10583_v7  ;;  %5645 = vmatpush.msrb.mxu2 %v5555_v9  ;;  %v5176_v18 = vsub.f32 %v10573_v36, %v10583_v7 }
 0x59a   :  { %5664 = vmatpush.msrb.mxu3 %v5572_v51  ;;  %v5554_v55 = vmax.f32 %v5482_v17, 0.0  ;;  %v5136_v6 = vsub.f32 %v11568_v61, %v10583_v7  ;;  %v5153_v0 = vsub.f32 %v11569_v52, %v10583_v7  ;;  %v5571_v28 = vmax.f32 %v5499_v42, 0.0 }
 0x59b   :  { %5634 = vmatpush.msrb.mxu1 %v5530_v3  ;;  %v5521_v11 = vadd.f32 %v10722_v48, %v5453_v37  ;;  %v5280_v35 = vmul.f32 %v10693_v29, %v5215_v8  ;;  %v5232_v13 = vmul.f32 %v10674_v12, %v5154_v5  ;;  %v5254_v23 = vmul.f32 %v10674_v12, %v5176_v18 }
 0x59c   :  { %5646 = vmatpush.msrb.mxu2 %v5554_v55  ;;  %v5214_v63 = vmul.f32 %v10674_v12, %v5136_v6  ;;  %v5231_v36 = vmul.f32 %v10674_v12, %v5153_v0  ;;  %v5175_v26 = vsub.f32 %v10566_v22, %v10583_v7  ;;  %5665 = vmatpush.msrb.mxu3 %v5571_v28 }
 0x59d   :  { %v5593_v38 = vmax.f32 %v5521_v11, 0.0  ;;  %v5345_v53 = vadd.f32 %v10695_v62, %v5280_v35  ;;  %v5297_v14 = vmul.f32 %v10693_v29, %v5232_v13  ;;  %v5135_v34 = vsub.f32 %v11570_v60, %v10583_v7  ;;  %v11572_v13 = vld [vmem:[#allocation52_spill] sm:$0xff] }
 0x59e   :  { %v5319_v39 = vmul.f32 %v10693_v29, %v5254_v23  ;;  %v5279_v1 = vmul.f32 %v10693_v29, %v5214_v63  ;;  %v5296_v16 = vmul.f32 %v10693_v29, %v5231_v36  ;;  %v5253_v49 = vmul.f32 %v10674_v12, %v5175_v26 }
 0x59f   :  { %5679 = vmatpush.msra.mxu1 %v5593_v38  ;;  %v5413_v22 = vmul.f32 %v10709_v2, %v5345_v53  ;;  %v5362_v54 = vadd.f32 %v10695_v62, %v5297_v14  ;;  %v5213_v40 = vmul.f32 %v10674_v12, %v5135_v34  ;;  %v5152_v59 = vsub.f32 %v11571_v50, %v10583_v7  ;;  %v11574_v38 = vld [vmem:[#allocation51_spill] sm:$0xff] }
 0x5a0   :  { %v5384_v44 = vadd.f32 %v10695_v62, %v5319_v39  ;;  %v5344_v56 = vadd.f32 %v10695_v62, %v5279_v1  ;;  %v5361_v21 = vadd.f32 %v10695_v62, %v5296_v16  ;;  %v5318_v45 = vmul.f32 %v10693_v29, %v5253_v49 }
 0x5a1   :  { %v5481_v43 = vadd.f32 %v10722_v48, %v5413_v22  ;;  %v5430_v58 = vmul.f32 %v10709_v2, %v5362_v54  ;;  %v5278_v15 = vmul.f32 %v10693_v29, %v5213_v40  ;;  %v5230_v20 = vmul.f32 %v10674_v12, %v5152_v59 }
 0x5a2   :  { %v5452_v32 = vmul.f32 %v10709_v2, %v5384_v44  ;;  %v5412_v19 = vmul.f32 %v10709_v2, %v5344_v56  ;;  %v5429_v47 = vmul.f32 %v10709_v2, %v5361_v21  ;;  %v5383_v4 = vadd.f32 %v10695_v62, %v5318_v45 }
 0x5a3   :  { %v5553_v25 = vmax.f32 %v5481_v43, 0.0  ;;  %v5498_v9 = vadd.f32 %v10722_v48, %v5430_v58  ;;  %v5343_v51 = vadd.f32 %v10695_v62, %v5278_v15  ;;  %v5295_v3 = vmul.f32 %v10693_v29, %v5230_v20  ;;  %v11576_v20 = vld [vmem:[#allocation50_spill] sm:$0xff] }
 0x5a4   :  { %v5520_v17 = vadd.f32 %v10722_v48, %v5452_v32  ;;  %v5480_v42 = vadd.f32 %v10722_v48, %v5412_v19  ;;  %v5497_v37 = vadd.f32 %v10722_v48, %v5429_v47  ;;  %v5451_v8 = vmul.f32 %v10709_v2, %v5383_v4 }
 0x5a5   :  { %5647 = vmatpush.msrb.mxu2 %v5553_v25  ;;  %v5570_v27 = vmax.f32 %v5498_v9, 0.0  ;;  %v5411_v5 = vmul.f32 %v10709_v2, %v5343_v51  ;;  %v5360_v55 = vadd.f32 %v10695_v62, %v5295_v3  ;;  %v5174_v18 = vsub.f32 %v10559_v30, %v10583_v7  ;;  %v11573_v30 = vld [vmem:[#allocation63_spill] sm:$0xff] }
 0x5a6   :  { %v5592_v61 = vmax.f32 %v5520_v17, 0.0  ;;  %v5552_v6 = vmax.f32 %v5480_v42, 0.0  ;;  %v5569_v52 = vmax.f32 %v5497_v37, 0.0  ;;  %v5519_v0 = vadd.f32 %v10722_v48, %v5451_v8 }
 0x5a7   :  { %5666 = vmatpush.msrb.mxu3 %v5570_v27  ;;  %v5479_v28 = vadd.f32 %v10722_v48, %v5411_v5  ;;  %v5428_v11 = vmul.f32 %v10709_v2, %v5360_v55  ;;  %v5252_v35 = vmul.f32 %v10674_v12, %v5174_v18  ;;  %v5134_v23 = vsub.f32 %v11572_v13, %v10583_v7  ;;  %v11577_v13 = vld [vmem:[#allocation61_spill] sm:$0xff] }
 0x5a8   :  { %5680 = vmatpush.msra.mxu1 %v5592_v61  ;;  %5648 = vmatpush.msrb.mxu2 %v5552_v6  ;;  %v5591_v63 = vmax.f32 %v5519_v0, 0.0  ;;  %v5151_v36 = vsub.f32 %v11573_v30, %v10583_v7  ;;  %v5173_v26 = vsub.f32 %v10552_v10, %v10583_v7  ;;  %v5133_v53 = vsub.f32 %v11574_v38, %v10583_v7  ;;  %v11575_v10 = vld [vmem:[#allocation62_spill] sm:$0xff] }
 0x5a9   :  { %5667 = vmatpush.msrb.mxu3 %v5569_v52  ;;  %v5551_v14 = vmax.f32 %v5479_v28, 0.0  ;;  %v5496_v60 = vadd.f32 %v10722_v48, %v5428_v11  ;;  %v5317_v34 = vmul.f32 %v10693_v29, %v5252_v35  ;;  %v5212_v39 = vmul.f32 %v10674_v12, %v5134_v23 }
 0x5aa   :  { %5681 = vmatpush.msra.mxu1 %v5591_v63  ;;  %v5229_v1 = vmul.f32 %v10674_v12, %v5151_v36  ;;  %v5251_v16 = vmul.f32 %v10674_v12, %v5173_v26  ;;  %v5211_v49 = vmul.f32 %v10674_v12, %v5133_v53  ;;  %v5150_v22 = vsub.f32 %v11575_v10, %v10583_v7 }
 0x5ab   :  { %5649 = vmatpush.msrb.mxu2 %v5551_v14  ;;  %v5568_v54 = vmax.f32 %v5496_v60, 0.0  ;;  %v5382_v40 = vadd.f32 %v10695_v62, %v5317_v34  ;;  %v5277_v50 = vmul.f32 %v10693_v29, %v5212_v39  ;;  %v5172_v59 = vsub.f32 %v10545_v24, %v10583_v7  ;;  %v11578_v39 = vld [vmem:[#allocation49_spill] sm:$0xff] }
 0x5ac   :  { %v5294_v44 = vmul.f32 %v10693_v29, %v5229_v1  ;;  %v5316_v56 = vmul.f32 %v10693_v29, %v5251_v16  ;;  %v5276_v21 = vmul.f32 %v10693_v29, %v5211_v49  ;;  %v5228_v45 = vmul.f32 %v10674_v12, %v5150_v22  ;;  %v11579_v16 = vld [vmem:[#allocation60_spill] sm:$0xff] }
 0x5ad   :  { %5668 = vmatpush.msrb.mxu3 %v5568_v54  ;;  %v5450_v43 = vmul.f32 %v10709_v2, %v5382_v40  ;;  %v5342_v58 = vadd.f32 %v10695_v62, %v5277_v50  ;;  %v5250_v15 = vmul.f32 %v10674_v12, %v5172_v59  ;;  %v5132_v32 = vsub.f32 %v11576_v20, %v10583_v7 }
 0x5ae   :  { %v5359_v24 = vadd.f32 %v10695_v62, %v5294_v44  ;;  %v5381_v19 = vadd.f32 %v10695_v62, %v5316_v56  ;;  %v5341_v47 = vadd.f32 %v10695_v62, %v5276_v21  ;;  %v5293_v4 = vmul.f32 %v10693_v29, %v5228_v45  ;;  %v11580_v56 = vld [vmem:[#allocation48_spill] sm:$0xff] }
 0x5af   :  { %v5518_v25 = vadd.f32 %v10722_v48, %v5450_v43  ;;  %v5410_v9 = vmul.f32 %v10709_v2, %v5342_v58  ;;  %v5315_v51 = vmul.f32 %v10693_v29, %v5250_v15  ;;  %v5210_v3 = vmul.f32 %v10674_v12, %v5132_v32  ;;  %v11581_v58 = vld [vmem:[#allocation59_spill] sm:$0xff] }
 0x5b0   :  { %v5427_v17 = vmul.f32 %v10709_v2, %v5359_v24  ;;  %v5449_v42 = vmul.f32 %v10709_v2, %v5381_v19  ;;  %v5409_v37 = vmul.f32 %v10709_v2, %v5341_v47  ;;  %v5358_v8 = vadd.f32 %v10695_v62, %v5293_v4 }
 0x5b1   :  { %v5590_v27 = vmax.f32 %v5518_v25, 0.0  ;;  %v5478_v5 = vadd.f32 %v10722_v48, %v5410_v9  ;;  %v5380_v55 = vadd.f32 %v10695_v62, %v5315_v51  ;;  %v5275_v18 = vmul.f32 %v10693_v29, %v5210_v3 }
 0x5b2   :  { %v5495_v61 = vadd.f32 %v10722_v48, %v5427_v17  ;;  %v5517_v6 = vadd.f32 %v10722_v48, %v5449_v42  ;;  %v5477_v52 = vadd.f32 %v10722_v48, %v5409_v37  ;;  %v5426_v0 = vmul.f32 %v10709_v2, %v5358_v8 }
 0x5b3   :  { %5682 = vmatpush.msra.mxu1 %v5590_v27  ;;  %v5550_v28 = vmax.f32 %v5478_v5, 0.0  ;;  %v5448_v11 = vmul.f32 %v10709_v2, %v5380_v55  ;;  %v5340_v35 = vadd.f32 %v10695_v62, %v5275_v18  ;;  %v5149_v23 = vsub.f32 %v11577_v13, %v10583_v7 }
 0x5b4   :  { %v5567_v63 = vmax.f32 %v5495_v61, 0.0  ;;  %v5589_v30 = vmax.f32 %v5517_v6, 0.0  ;;  %v5549_v36 = vmax.f32 %v5477_v52, 0.0  ;;  %v5494_v26 = vadd.f32 %v10722_v48, %v5426_v0 }
 0x5b5   :  { %5650 = vmatpush.msrb.mxu2 %v5550_v28  ;;  %v5516_v38 = vadd.f32 %v10722_v48, %v5448_v11  ;;  %v5408_v53 = vmul.f32 %v10709_v2, %v5340_v35  ;;  %v5227_v14 = vmul.f32 %v10674_v12, %v5149_v23  ;;  %v5171_v60 = vsub.f32 %v10538_v41, %v10583_v7 }
 0x5b6   :  { %5669 = vmatpush.msrb.mxu3 %v5567_v63  ;;  %5683 = vmatpush.msra.mxu1 %v5589_v30  ;;  %v5566_v34 = vmax.f32 %v5494_v26, 0.0  ;;  %v5131_v1 = vsub.f32 %v11578_v39, %v10583_v7  ;;  %v5148_v49 = vsub.f32 %v11579_v16, %v10583_v7  ;;  %v5170_v10 = vsub.f32 %v10531_v46, %v10583_v7 }
 0x5b7   :  { %5651 = vmatpush.msrb.mxu2 %v5549_v36  ;;  %v5588_v22 = vmax.f32 %v5516_v38, 0.0  ;;  %v5476_v54 = vadd.f32 %v10722_v48, %v5408_v53  ;;  %v5292_v40 = vmul.f32 %v10693_v29, %v5227_v14  ;;  %v5249_v41 = vmul.f32 %v10674_v12, %v5171_v60 }
 0x5b8   :  { %5670 = vmatpush.msrb.mxu3 %v5566_v34  ;;  %v5209_v50 = vmul.f32 %v10674_v12, %v5131_v1  ;;  %v5226_v59 = vmul.f32 %v10674_v12, %v5148_v49  ;;  %v5248_v44 = vmul.f32 %v10674_v12, %v5170_v10  ;;  %v5130_v21 = vsub.f32 %v11580_v56, %v10583_v7  ;;  %v11582_v10 = vld [vmem:[#allocation58_spill] sm:$0xff] }
 0x5b9   :  { %5684 = vmatpush.msra.mxu1 %v5588_v22  ;;  %v5548_v46 = vmax.f32 %v5476_v54, 0.0  ;;  %v5357_v45 = vadd.f32 %v10695_v62, %v5292_v40  ;;  %v5314_v43 = vmul.f32 %v10693_v29, %v5249_v41  ;;  %v5147_v15 = vsub.f32 %v11581_v58, %v10583_v7  ;;  %v5714_v40 = vld [vmem:[%s11277_s8 + $0x78] sm:$0xff] }
 0x5ba   :  { %v5274_v20 = vmul.f32 %v10693_v29, %v5209_v50  ;;  %v5291_v32 = vmul.f32 %v10693_v29, %v5226_v59  ;;  %v5313_v24 = vmul.f32 %v10693_v29, %v5248_v44  ;;  %v5208_v19 = vmul.f32 %v10674_v12, %v5130_v21 }
 0x5bb   :  { %5652 = vmatpush.msrb.mxu2 %v5548_v46  ;;  %v5425_v47 = vmul.f32 %v10709_v2, %v5357_v45  ;;  %v5379_v4 = vadd.f32 %v10695_v62, %v5314_v43  ;;  %v5225_v25 = vmul.f32 %v10674_v12, %v5147_v15  ;;  %v5169_v9 = vsub.f32 %v10524_v33, %v10583_v7  ;;  %v11584_v15 = vld [vmem:[#allocation25_spill] sm:$0xff] }
 0x5bc   :  { %v5339_v51 = vadd.f32 %v10695_v62, %v5274_v20  ;;  %v5356_v3 = vadd.f32 %v10695_v62, %v5291_v32  ;;  %v5378_v17 = vadd.f32 %v10695_v62, %v5313_v24  ;;  %v5273_v42 = vmul.f32 %v10693_v29, %v5208_v19  ;;  %v5713_v32 = vld [vmem:[%s11277_s8 + $0x70] sm:$0xff] }
 0x5bd   :  { %v5493_v37 = vadd.f32 %v10722_v48, %v5425_v47  ;;  %v5447_v8 = vmul.f32 %v10709_v2, %v5379_v4  ;;  %v5290_v27 = vmul.f32 %v10693_v29, %v5225_v25  ;;  %v5247_v5 = vmul.f32 %v10674_v12, %v5169_v9  ;;  %v5712_v25 = vld [vmem:[%s11277_s8 + $0x68] sm:$0xff] }
 0x5be   :  { %v5407_v55 = vmul.f32 %v10709_v2, %v5339_v51  ;;  %v5424_v33 = vmul.f32 %v10709_v2, %v5356_v3  ;;  %v5446_v18 = vmul.f32 %v10709_v2, %v5378_v17  ;;  %v5338_v61 = vadd.f32 %v10695_v62, %v5273_v42 }
 0x5bf   :  { %v5565_v6 = vmax.f32 %v5493_v37, 0.0  ;;  %v5515_v52 = vadd.f32 %v10722_v48, %v5447_v8  ;;  %v5355_v0 = vadd.f32 %v10695_v62, %v5290_v27  ;;  %v5312_v28 = vmul.f32 %v10693_v29, %v5247_v5  ;;  %v11585_v37 = vld [vmem:[#allocation23_spill] sm:$0xff]  ;;  %v11586_v27 = vld [vmem:[#allocation41_spill] sm:$0xff] }
 0x5c0   :  { %v5475_v11 = vadd.f32 %v10722_v48, %v5407_v55  ;;  %v5492_v35 = vadd.f32 %v10722_v48, %v5424_v33  ;;  %v5514_v13 = vadd.f32 %v10722_v48, %v5446_v18  ;;  %v5406_v23 = vmul.f32 %v10709_v2, %v5338_v61  ;;  %v11587_v55 = vld [vmem:[#allocation21_spill] sm:$0xff]  ;;  %v5711_v18 = vld [vmem:[%s11277_s8 + $0x60] sm:$0xff] }
 0x5c1   :  { %5671 = vmatpush.msrb.mxu3 %v5565_v6  ;;  %v5587_v63 = vmax.f32 %v5515_v52, 0.0  ;;  %v5423_v30 = vmul.f32 %v10709_v2, %v5355_v0  ;;  %v5377_v36 = vadd.f32 %v10695_v62, %v5312_v28  ;;  %v5594_v26 = vlaneseq  ;;  %v11588_v0 = vld [vmem:[#allocation38_spill] sm:$0xff] }
 0x5c2   :  { %v5547_v38 = vmax.f32 %v5475_v11, 0.0  ;;  %v5564_v53 = vmax.f32 %v5492_v35, 0.0  ;;  %v5586_v14 = vmax.f32 %v5514_v13, 0.0  ;;  %v5474_v60 = vadd.f32 %v10722_v48, %v5406_v23 }
 0x5c3   :  { %5685 = vmatpush.msra.mxu1 %v5587_v63  ;;  %v5491_v34 = vadd.f32 %v10722_v48, %v5423_v30  ;;  %v5445_v39 = vmul.f32 %v10709_v2, %v5377_v36  ;;  %v5595_v1 = vshrl.u32 %v5594_v26, 7  ;;  %v11086_v16 = vand.u32 127, %v5594_v26  ;;  %v5710_v63 = vld [vmem:[%s11277_s8 + $0x58] sm:$0xff] }
 0x5c4   :  { %5653 = vmatpush.msrb.mxu2 %v5547_v38  ;;  %5672 = vmatpush.msrb.mxu3 %v5564_v53  ;;  %v5546_v49 = vmax.f32 %v5474_v60, 0.0  ;;  %v5146_v22 = vsub.f32 %v11582_v10, %v10583_v7  ;;  %v5168_v54 = vsub.f32 %v10517_v31, %v10583_v7  ;;  %v11583_v31 = vld [vmem:[#allocation27_spill] sm:$0xff]  ;;  %v5166_v20 = vsub.f32 %v11584_v15, %v10583_v7  ;;  %v5709_v10 = vld [vmem:[%s11277_s8 + $0x50] sm:$0xff] }
 0x5c5   :  { %5686 = vmatpush.msra.mxu1 %v5586_v14  ;;  %v5563_v41 = vmax.f32 %v5491_v34, 0.0  ;;  %v5513_v50 = vadd.f32 %v10722_v48, %v5445_v39  ;;  %v5598_v59 = vadd.s32 128, %v11086_v16  ;;  %v11097_v44 = vmul.u32 256, %v5595_v1 }
 0x5c6   :  { %5654 = vmatpush.msrb.mxu2 %v5546_v49  ;;  %v5224_v56 = vmul.f32 %v10674_v12, %v5146_v22  ;;  %v5246_v21 = vmul.f32 %v10674_v12, %v5168_v54  ;;  %v5599_v46 = vadd.s32 256, %v11086_v16  ;;  %v5167_v45 = vsub.f32 %v11583_v31, %v10583_v7 }
 0x5c7   :  { %5673 = vmatpush.msrb.mxu3 %v5563_v41  ;;  %v5585_v43 = vmax.f32 %v5513_v50, 0.0  ;;  %vm5603_vm12 = vcmp.ge.s32.totalorder %v5598_v59, %v11097_v44  ;;  %v11106_v58 = vadd.s32 256, %v11097_v44  ;;  %v5244_v4 = vmul.f32 %v10674_v12, %v5166_v20 }
 0x5c8   :  { %5719 = vmatpush.msra.mxu2 %v5714_v40  ;;  %v5289_v24 = vmul.f32 %v10693_v29, %v5224_v56  ;;  %v5311_v19 = vmul.f32 %v10693_v29, %v5246_v21  ;;  %vm5604_vm13 = vcmp.ge.s32.totalorder %v5599_v46, %v11097_v44  ;;  %v5245_v47 = vmul.f32 %v10674_v12, %v5167_v45 }
 0x5c9   :  { %5687 = vmatpush.msra.mxu1 %v5585_v43  ;;  %vm5608_vm14 = vcmp.lt.s32.totalorder %v5598_v59, %v11106_v58  ;;  %vm5609_vm15 = vcmp.lt.s32.totalorder %v5599_v46, %v11106_v58  ;;  %vm5602_vm0 = vcmp.ge.s32.totalorder %v11086_v16, %v11097_v44  ;;  %vm5607_vm2 = vcmp.lt.s32.totalorder %v11086_v16, %v11106_v58 }
 0x5ca   :  { %vm5612_vm1 = vmand %vm5603_vm12, %vm5608_vm14  ;;  %v5354_v9 = vadd.f32 %v10695_v62, %v5289_v24  ;;  %v5376_v51 = vadd.f32 %v10695_v62, %v5311_v19  ;;  %v5310_v3 = vmul.f32 %v10693_v29, %v5245_v47  ;;  %5720 = vmatpush.msra.mxu2 %v5713_v32  ;;  %v7142_v17 = vmov 0.00390625   ;;  %v5706_v24 = vld [vmem:[%s11277_s8 + $0x38] sm:$0xff] }
 0x5cb   :  { %6964 = vmatmul.msk.f32.vlgmr.msrb.gmra.mxu2 %vm5612_vm1, %v7142_v17  ;;  %v5309_v42 = vmul.f32 %v10693_v29, %v5244_v4  ;;  %v5165_v8 = vsub.f32 %v11585_v37, %v10583_v7  ;;  %v5164_v5 = vsub.f32 %v11586_v27, %v10583_v7  ;;  %v5163_v33 = vsub.f32 %v11587_v55, %v10583_v7  ;;  %vm5611_vm3 = vmand %vm5602_vm0, %vm5607_vm2  ;;  %v5705_v4 = vld [vmem:[%s11277_s8 + $0x30] sm:$0xff] }
 0x5cc   :  { %v5422_v61 = vmul.f32 %v10709_v2, %v5354_v9  ;;  %v5444_v6 = vmul.f32 %v10709_v2, %v5376_v51  ;;  %v5375_v52 = vadd.f32 %v10695_v62, %v5310_v3  ;;  %v5162_v28 = vsub.f32 %v11588_v0, %v10583_v7  ;;  %5721 = vmatpush.msra.mxu2 %v5712_v25  ;;  %vm5613_vm4 = vmand %vm5604_vm13, %vm5609_vm15  ;;  %v5703_v51 = vld [vmem:[%s11277_s8 + $0x20] sm:$0xff]  ;;  %v5700_v3 = vld [vmem:[%s11277_s8 + $0x8] sm:$0xff] }
 0x5cd   :  { %v5374_v11 = vadd.f32 %v10695_v62, %v5309_v42  ;;  %6963 = vmatmul.msk.f32.vlgmr.msrb.gmra.mxu1 %vm5611_vm3, %v7142_v17  ;;  %v5243_v35 = vmul.f32 %v10674_v12, %v5165_v8  ;;  %v5242_v13 = vmul.f32 %v10674_v12, %v5164_v5  ;;  %v5241_v23 = vmul.f32 %v10674_v12, %v5163_v33 }
 0x5ce   :  { %v5490_v30 = vadd.f32 %v10722_v48, %v5422_v61  ;;  %v5512_v36 = vadd.f32 %v10722_v48, %v5444_v6  ;;  %v5443_v26 = vmul.f32 %v10709_v2, %v5375_v52  ;;  %v5240_v38 = vmul.f32 %v10674_v12, %v5162_v28  ;;  %5722 = vmatpush.msra.mxu2 %v5711_v18  ;;  %v6993_v18 = vld [vmem:[%s11278_s9] ss:$0 sm:$0xff] }
 0x5cf   :  { %v5442_v53 = vmul.f32 %v10709_v2, %v5374_v11  ;;  %v5308_v14 = vmul.f32 %v10693_v29, %v5243_v35  ;;  %v5307_v60 = vmul.f32 %v10693_v29, %v5242_v13  ;;  %v5306_v34 = vmul.f32 %v10693_v29, %v5241_v23  ;;  %v5789_v28 = vld [vmem:[%s11279_s10] sm:$0x1] }
 0x5d0   :  { %v5562_v39 = vmax.f32 %v5490_v30, 0.0  ;;  %v5584_v1 = vmax.f32 %v5512_v36, 0.0  ;;  %v5511_v49 = vadd.f32 %v10722_v48, %v5443_v26  ;;  %v5305_v12 = vmul.f32 %v10693_v29, %v5240_v38  ;;  %5723 = vmatpush.msra.mxu2 %v5710_v63  ;;  %v5708_v29 = vld [vmem:[%s11277_s8 + $0x48] sm:$0xff] }
 0x5d1   :  { %v5510_v22 = vadd.f32 %v10722_v48, %v5442_v53  ;;  %v5373_v54 = vadd.f32 %v10695_v62, %v5308_v14  ;;  %v5372_v40 = vadd.f32 %v10695_v62, %v5307_v60  ;;  %v5371_v41 = vadd.f32 %v10695_v62, %v5306_v34 }
 0x5d2   :  { %5674 = vmatpush.msrb.mxu3 %v5562_v39  ;;  %5688 = vmatpush.msra.mxu1 %v5584_v1  ;;  %v5583_v50 = vmax.f32 %v5511_v49, 0.0  ;;  %v5370_v59 = vadd.f32 %v10695_v62, %v5305_v12  ;;  %v5707_v62 = vld [vmem:[%s11277_s8 + $0x40] sm:$0xff]  ;;  %v5600_v32 = vadd.s32 384, %v11086_v16  ;;  %vm5740_vm8 = vcmp.lt.s32.totalorder %v11086_v16, 10 }
 0x5d3   :  { %6965 = vmatmul.msk.f32.vlgmr.msrb.gmra.mxu3 %vm5613_vm4, %v7142_v17  ;;  %v5582_v56 = vmax.f32 %v5510_v22, 0.0  ;;  %v5441_v21 = vmul.f32 %v10709_v2, %v5373_v54  ;;  %v5440_v46 = vmul.f32 %v10709_v2, %v5372_v40  ;;  %v5439_v31 = vmul.f32 %v10709_v2, %v5371_v41  ;;  %5724 = vmatpush.msra.mxu2 %v5709_v10 }
 0x5d4   :  { %5689 = vmatpush.msra.mxu1 %v5583_v50  ;;  %v5438_v45 = vmul.f32 %v10709_v2, %v5370_v59  ;;  %vm5605_vm5 = vcmp.ge.s32.totalorder %v5600_v32, %v11097_v44  ;;  %vm5610_vm6 = vcmp.lt.s32.totalorder %v5600_v32, %v11106_v58  ;;  %v5702_v44 = vld [vmem:[%s11277_s8 + $0x18] sm:$0xff]  ;;  %v5701_v58 = vld [vmem:[%s11277_s8 + $0x10] sm:$0xff]  ;;  %6998 = vrcp.f32 %v5789_v28 }
 0x5d5   :  { %v5509_v43 = vadd.f32 %v10722_v48, %v5441_v21  ;;  %v5508_v15 = vadd.f32 %v10722_v48, %v5440_v46  ;;  %v5507_v20 = vadd.f32 %v10722_v48, %v5439_v31  ;;  %5725 = vmatpush.msra.mxu2 %v5708_v29  ;;  %vm5614_vm7 = vmand %vm5605_vm5, %vm5610_vm6  ;;  %vm5824_vm2 = vcmask 1024  }
 0x5d6   :  { %5690 = vmatpush.msra.mxu1 %v5582_v56  ;;  %v5506_v47 = vadd.f32 %v10722_v48, %v5438_v45  ;;  %v5704_v48 = vld [vmem:[%s11277_s8 + $0x28] sm:$0xff] }
 0x5d7   :  { %v5581_v19 = vmax.f32 %v5509_v43, 0.0  ;;  %v5580_v2 = vmax.f32 %v5508_v15, 0.0  ;;  %5726 = vmatpush.msra.mxu2 %v5707_v62  ;;  %v5579_v25 = vmax.f32 %v5507_v20, 0.0 }
 0x5d8   :  { %v5578_v9 = vmax.f32 %v5506_v47, 0.0 }
 0x5d9   :  { %5691 = vmatpush.msra.mxu1 %v5581_v19  ;;  %5727 = vmatpush.msra.mxu2 %v5706_v24 }
 0x5da   :  { %v6999_v11 = vpop.eup %6998 }
 0x5db   :  { %5692 = vmatpush.msra.mxu1 %v5580_v2  ;;  %5728 = vmatpush.msra.mxu2 %v5705_v4  ;;  %v11236_v35 = vsel %vm5740_vm8, %v6999_v11, 0.0  ;;  %v5902_v2 = vmul.f32 0.95, %v5789_v28 }
 0x5dc   :  { %v5793_v13 = vsel %vm5792_vm10, %v11236_v35, 0.0 }
 0x5dd   :  { %5693 = vmatpush.msra.mxu1 %v5579_v25  ;;  %5729 = vmatpush.msra.mxu2 %v5704_v48 }
 0x5df   :  { %5694 = vmatpush.msra.mxu1 %v5578_v9  ;;  %5730 = vmatpush.msra.mxu2 %v5703_v51 }
 0x5e0   :  { %6966 = vmatmul.msk.f32.vlgmr.msra.gmra.mxu1 %vm5614_vm7, %v7142_v17  ;;  %v5699_v17 = vld [vmem:[%s11277_s8] sm:$0xff] }
 0x5e1   :  { %5731 = vmatpush.msra.mxu2 %v5702_v44 }
 0x5e3   :  { %5732 = vmatpush.msra.mxu2 %v5701_v58 }
 0x5e5   :  { %5733 = vmatpush.msra.mxu2 %v5700_v3 }
 0x5e7   :  { %5734 = vmatpush.msra.mxu2 %v5699_v17 }
 0x64a   :  { %v5636_v42 = vpop.f32.mrf.mxu1 }
 0x64e   :  { %v5656_v37 = vpop.f32.mrf.mxu2 }
 0x64f   :  { %v5657_v8 = vadd.f32 %v5656_v37, %v5636_v42 }
 0x656   :  { %v5676_v27 = vpop.f32.mrf.mxu3 }
 0x657   :  { %v5677_v5 = vadd.f32 %v5676_v27, %v5657_v8 }
 0x65d   :  { %v5696_v55 = vpop.f32.mrf.mxu1 }
 0x65e   :  { %v5697_v33 = vadd.f32 %v5696_v55, %v5677_v5 }
 0x660   :  { %5735 = vmatmul.f32.vlgmr.msra.gmra.mxu2 %v5697_v33 }
 0x6e3   :  { %v5736_v61 = vpop.f32.mrf.mxu2 }
 0x6e4   :  { %v5737_v6 = vadd.f32 %v6993_v18, %v5736_v61 }
 0x6e6   :  { %5739 = vst [vmem:[#allocation5] sm:$0x3] %v5737_v6  ;;  %v5741_v52 = vsel %vm5740_vm8, %v5737_v6, -1e+30 }
 0x6e7   :  { %v5743_v0 = vsel %vm5742_vm9, %v5741_v52, -inf  ;;  %5916 = dma.vmem_to_hbm [thread:$0]  %s5912_s21, 32, %s5914_s2, [#allocation6]  }
 0x6e8   :  { %5744 = vmax.xlane.f32.xlu0 %v5743_v0  ;;  %v7143_v0 = vmov 0.0  }
 0x6f0   :  { %5794 = vadd.xlane.f32.xlu0 %v5793_v13 }
 0x75b   :  { %v5745_v23 = vpop.xlane.xlu0 %5744 }
 0x75c   :  { %v5746_v63 = vsub.f32 %v5741_v52, %v5745_v23  ;;  %vm5769_vm11 = vcmp.eq.f32.partialorder %v5741_v52, %v5745_v23 }
 0x75d   :  { %v5770_v30 = vsel %vm5769_vm11, %v11086_v16, 128 }
 0x75e   :  { %v5747_v36 = vmul.f32 1.442695, %v5746_v63  ;;  %v5771_v26 = vsel %vm5742_vm9, %v5770_v30, 2147483647 }
 0x75f   :  { %v5773_v38 = vshra.s32 %v5771_v26, 16  ;;  %v5772_v40 = vand.u32 65535, %v5771_v26 }
 0x760   :  { %7000 = vpow2.f32 %v5747_v36 }
 0x761   :  { %v5775_v53 = vcvt.s32.f32 %v5773_v38  ;;  %v5774_v50 = vcvt.s32.f32 %v5772_v40 }
 0x763   :  { %5776 = vmin.xlane.f32.xlu1 %v5775_v53  ;;  %v5795_v39 = vpop.xlane.xlu0 %5794 }
 0x764   :  { %v5796_v1 = vrot.slane %v5795_v39, 4 }
 0x766   :  { %v7001_v14 = vpop.eup %7000  ;;  %v5797_v49 = vadd.f32 %v5796_v1, %v5795_v39 }
 0x767   :  { %v5749_v60 = vsel %vm5740_vm8, %v7001_v14, 0.0 }
 0x768   :  { %v5750_v34 = vsel %vm5742_vm9, %v5749_v60, 0.0  ;;  %v5798_v12 = vrot.slane %v5797_v49, 2  ;;  %v5757_v56 = vmul.f32 %v5749_v60, %v5746_v63 }
 0x769   :  { %5751 = vadd.xlane.f32.xlu0 %v5750_v34 }
 0x76a   :  { %v5799_v10 = vadd.f32 %v5798_v12, %v5797_v49  ;;  %v5758_v21 = vsel %vm5742_vm9, %v5757_v56, 0.0 }
 0x76c   :  { %v5800_v22 = vrot.slane %v5799_v10, 1 }
 0x76e   :  { %v5801_v54 = vadd.f32 %v5800_v22, %v5799_v10 }
 0x770   :  { %6972 = vpush %v5801_v54 }
 0x7a1   :  { %s6973_s9 = spop %6972 }
 0x7a2   :  { %v5803_v25 = vstv %s6973_s9 }
 0x7a3   :  { %vm5809_vm13 = vweird.f32 %v5803_v25  ;;  %v5815_v58 = vand.u32 2147483648, %v5803_v25  ;;  %v5813_v17 = vand.u32 2147483647, %v5803_v25 }
 0x7a5   :  { %v5816_v42 = vor.u32 1.1754944e-38, %v5815_v58  ;;  %vm5814_vm0 = vcmp.eq.f32.partialorder %v5813_v17, 8.507059e+37 }
 0x7d6   :  { %v5777_v41 = vpop.xlane.xlu1 %5776 }
 0x7d7   :  { %vm5778_vm12 = vcmp.eq.f32.partialorder %v5775_v53, %v5777_v41  ;;  %v5783_v8 = vcvt.f32.s32 %v5777_v41 }
 0x7d8   :  { %v5779_v59 = vsel %vm5778_vm12, %v5774_v50, inf  ;;  %vm5892_vm12 = vcmask 0  }
 0x7d9   :  { %5780 = vmin.xlane.f32.xlu1 %v5779_v59  ;;  %v5784_v55 = vshll.u32 %v5783_v8, 16  ;;  %v7014_v8 = vld [vmem:[#allocation2] sm:$0x1] }
 0x7dc   :  { %v5752_v29 = vpop.xlane.xlu0 %5751 }
 0x7dd   :  { %7002 = vrcp.f32 %v5752_v29 }
 0x7de   :  { %7004 = vrcp.f32 %v5803_v25 }
 0x7df   :  { %7006 = vlog2.f32 %v5752_v29 }
 0x7e1   :  { %5759 = vadd.xlane.f32.xlu1 %v5758_v21 }
 0x7e3   :  { %v7003_v46 = vpop.eup %7002 }
 0x7e4   :  { %v5754_v31 = vmul.f32 %v7003_v46, %v5749_v60  ;;  %v7005_v9 = vpop.eup %7004 }
 0x7e5   :  { %v5805_v48 = vmul.f32 %v7005_v9, %v5803_v25  ;;  %vm5810_vm14 = vweird.f32 %v7005_v9  ;;  %v7007_v52 = vpop.eup %7006 }
 0x7e6   :  { %v5894_v45 = vsel %vm5742_vm9, %v5754_v31, 0.0  ;;  %vm5811_vm15 = vmor %vm5809_vm13, %vm5810_vm14  ;;  %v5756_v23 = vmul.f32 0.6931472, %v7007_v52 }
 0x7e7   :  { %v5895_v62 = vrot.slane %v5894_v45, 4  ;;  %v5806_v51 = vsub.f32 1.0, %v5805_v48 }
 0x7e9   :  { %v5896_v43 = vadd.f32 %v5895_v62, %v5894_v45  ;;  %v5807_v44 = vmul.f32 %v7005_v9, %v5806_v51 }
 0x7eb   :  { %v5897_v15 = vrot.slane %v5896_v43, 2  ;;  %v5808_v3 = vadd.f32 %v7005_v9, %v5807_v44 }
 0x7ed   :  { %v5898_v20 = vadd.f32 %v5897_v15, %v5896_v43  ;;  %v5812_v37 = vsel %vm5811_vm15, %v7005_v9, %v5808_v3 }
 0x7ee   :  { %v5817_v27 = vsel %vm5814_vm0, %v5816_v42, %v5812_v37 }
 0x7ef   :  { %v5899_v32 = vrot.slane %v5898_v20, 1  ;;  %v5818_v18 = vmul.f32 %v5817_v27, %v11236_v35  ;;  %v5522_v27 = vmul.f32 0.95, %v7014_v8 }
 0x7f1   :  { %v5900_v24 = vadd.f32 %v5899_v32, %v5898_v20  ;;  %v5819_v6 = vperm.slane %v5818_v18, 0  ;;  %v5527_v18 = vmul.f32 0.05, %v10587_v57 }
 0x7f3   :  { %v5901_v19 = vmul.f32 0.5, %v5900_v24 }
 0x7f5   :  { %v5903_v47 = vmul.f32 0.05, %v5901_v19 }
 0x7f7   :  { %v5904_v4 = vadd.f32 %v5903_v47, %v5902_v2 }
 0x7f9   :  { %5905 = vst [vmem:[#allocation9] sm:$0x1] %v5904_v4 }
 0x84c   :  { %v5781_v5 = vpop.xlane.xlu1 %5780 }
 0x84d   :  { %v5782_v33 = vcvt.f32.s32 %v5781_v5  ;;  %v5523_v5 = vmul.f32 0.05, %v10583_v7 }
 0x84f   :  { %v5785_v61 = vadd.s32 %v5784_v55, %v5782_v33  ;;  %v7015_v55 = vld [vmem:[#allocation3] sm:$0x1] }
 0x850   :  { %v5526_v33 = vmul.f32 0.95, %v7015_v55 }
 0x851   :  { %vm5786_vm1 = vcmp.eq.s32.totalorder %v11086_v16, %v5785_v61  ;;  %v5524_v61 = vadd.f32 %v5523_v5, %v5522_v27 }
 0x852   :  { %v6968_v28 = vsel %vm5786_vm1, 1.0, %v7143_v0 }
 0x853   :  { %v5820_v11 = vmul.f32 %v6968_v28, %v5819_v6  ;;  %v5528_v6 = vadd.f32 %v5527_v18, %v5526_v33  ;;  %5525 = vst [vmem:[#allocation10] sm:$0x1] %v5524_v61 }
 0x854   :  { %v5760_v13 = vpop.xlane.xlu1 %5759  ;;  %5949 = dma.vmem_to_hbm [thread:$0]  %s5945_s22, 16, %s5947_s4, [#allocation11]  }
 0x855   :  { %v5761_v63 = vmul.f32 %v7003_v46, %v5760_v13  ;;  %v5821_v30 = vsel %vm5742_vm9, %v5820_v11, 0.0  ;;  %5529 = vst [vmem:[#allocation12] sm:$0x1] %v5528_v6 }
 0x856   :  { %5822 = vadd.xlane.f32.xlu2 %v5821_v30  ;;  %5960 = dma.vmem_to_hbm [thread:$0]  %s5956_s24, 16, %s5958_s25, [#allocation11]  }
 0x857   :  { %v5762_v36 = vsub.f32 %v5756_v23, %v5761_v63 }
 0x859   :  { %v5763_v26 = vsub.f32 1.1512926, %v5762_v36 }
 0x85b   :  { %v5764_v38 = vmul.f32 1.442695, %v5763_v26 }
 0x85d   :  { %7008 = vpow2.f32 %v5764_v38 }
 0x863   :  { %v7009_v53 = vpop.eup %7008 }
 0x864   :  { %vm5766_vm3 = vcmp.gt.f32.partialorder %v7009_v53, 1.0 }
 0x865   :  { %v6967_v35 = vsel %vm5766_vm3, 1.0, %v7143_v0 }
 0x866   :  { %v5866_v16 = vsel %vm5824_vm2, %v6967_v35, 0.0 }
 0x867   :  { %5867 = vadd.xlane.f32.xlu0 %v5866_v16 }
 0x8c9   :  { %v5823_v14 = vpop.xlane.xlu2 %5822 }
 0x8ca   :  { %v5825_v60 = vsel %vm5824_vm2, %v5823_v14, 0.0 }
 0x8cb   :  { %5826 = vadd.xlane.f32.xlu2 %v5825_v60 }
 0x8da   :  { %v5868_v19 = vpop.xlane.xlu0 %5867 }
 0x8db   :  { %v5869_v2 = vrot.slane %v5868_v19, 4 }
 0x8dd   :  { %v5870_v47 = vadd.f32 %v5869_v2, %v5868_v19 }
 0x8df   :  { %v5871_v4 = vrot.slane %v5870_v47, 2 }
 0x8e1   :  { %v5872_v51 = vadd.f32 %v5871_v4, %v5870_v47 }
 0x8e3   :  { %v5873_v3 = vrot.slane %v5872_v51, 1 }
 0x8e5   :  { %v5874_v37 = vadd.f32 %v5873_v3, %v5872_v51 }
 0x93e   :  { %v5827_v34 = vpop.xlane.xlu2 %5826 }
 0x93f   :  { %v5828_v39 = vrot.slane %v5827_v34, 4 }
 0x941   :  { %v5829_v1 = vadd.f32 %v5828_v39, %v5827_v34 }
 0x943   :  { %v5830_v49 = vrot.slane %v5829_v1, 2 }
 0x945   :  { %v5831_v12 = vadd.f32 %v5830_v49, %v5829_v1 }
 0x947   :  { %v5832_v10 = vrot.slane %v5831_v12, 1 }
 0x949   :  { %v5833_v22 = vadd.f32 %v5832_v10, %v5831_v12 }
 0x94b   :  { %6974 = vpush %v5833_v22 }
 0x97c   :  { %s6975_s10 = spop %6974 }
 0x97d   :  { %v5835_v54 = vstv %s6975_s10 }
 0x97e   :  { %7010 = vrcp.f32 %v5835_v54  ;;  %v5847_v59 = vand.u32 2147483648, %v5835_v54  ;;  %v5845_v56 = vand.u32 2147483647, %v5835_v54  ;;  %vm5841_vm5 = vweird.f32 %v5835_v54 }
 0x980   :  { %v5848_v46 = vor.u32 1.1754944e-38, %v5847_v59  ;;  %vm5846_vm7 = vcmp.eq.f32.partialorder %v5845_v56, 8.507059e+37 }
 0x984   :  { %v7011_v40 = vpop.eup %7010 }
 0x985   :  { %v5837_v41 = vmul.f32 %v7011_v40, %v5835_v54  ;;  %vm5842_vm4 = vweird.f32 %v7011_v40 }
 0x986   :  { %vm5843_vm6 = vmor %vm5841_vm5, %vm5842_vm4 }
 0x987   :  { %v5838_v50 = vsub.f32 1.0, %v5837_v41 }
 0x989   :  { %v5839_v29 = vmul.f32 %v7011_v40, %v5838_v50 }
 0x98b   :  { %v5840_v21 = vadd.f32 %v7011_v40, %v5839_v29 }
 0x98d   :  { %v5844_v31 = vsel %vm5843_vm6, %v7011_v40, %v5840_v21 }
 0x98e   :  { %v5849_v45 = vsel %vm5846_vm7, %v5848_v46, %v5844_v31 }
 0x98f   :  { %v5850_v62 = vmul.f32 %v5849_v45, %v5823_v14 }
 0x991   :  { %v5851_v43 = vmul.f32 2.0, %v5850_v62 }
 0x993   :  { %v5852_v15 = vmul.f32 %v7009_v53, %v5851_v43 }
 0x995   :  { %v5853_v20 = vmul.f32 %v5852_v15, %v5762_v36 }
 0x997   :  { %v5854_v32 = vmul.f32 %v6967_v35, %v5853_v20 }
 0x999   :  { %v5855_v24 = vsel %vm5824_vm2, %v5854_v32, 0.0 }
 0x99a   :  { %5856 = vadd.xlane.f32.xlu2 %v5855_v24 }
 0xa0d   :  { %v5857_v25 = vpop.xlane.xlu2 %5856 }
 0xa0e   :  { %v5858_v9 = vrot.slane %v5857_v25, 4 }
 0xa10   :  { %v5859_v48 = vadd.f32 %v5858_v9, %v5857_v25 }
 0xa12   :  { %v5860_v44 = vrot.slane %v5859_v48, 2 }
 0xa14   :  { %v5861_v58 = vadd.f32 %v5860_v44, %v5859_v48 }
 0xa16   :  { %v5862_v17 = vrot.slane %v5861_v58, 1 }
 0xa18   :  { %v5863_v42 = vadd.f32 %v5862_v17, %v5861_v58 }
 0xa1a   :  { %6976 = vpush %v5863_v42 }
 0xa1b   :  { %6978 = vpush %v5874_v37 }
 0xa4b   :  { %s6977_s14 = spop %6976 }
 0xa4c   :  { %s6979_s26 = spop %6978  ;;  %v5865_v36 = vstv %s6977_s14 }
 0xa4d   :  { %v5876_v7 = vstv %s6979_s26 }
 0xa4e   :  { %7012 = vrcp.f32 %v5876_v7  ;;  %v5888_v11 = vand.u32 2147483648, %v5876_v7  ;;  %v5886_v57 = vand.u32 2147483647, %v5876_v7  ;;  %vm5882_vm9 = vweird.f32 %v5876_v7 }
 0xa50   :  { %v5889_v63 = vor.u32 1.1754944e-38, %v5888_v11  ;;  %vm5887_vm11 = vcmp.eq.f32.partialorder %v5886_v57, 8.507059e+37 }
 0xa54   :  { %v7013_v52 = vpop.eup %7012 }
 0xa55   :  { %v5878_v0 = vmul.f32 %v7013_v52, %v5876_v7  ;;  %vm5883_vm8 = vweird.f32 %v7013_v52 }
 0xa56   :  { %vm5884_vm10 = vmor %vm5882_vm9, %vm5883_vm8 }
 0xa57   :  { %v5879_v28 = vsub.f32 1.0, %v5878_v0 }
 0xa59   :  { %v5880_v13 = vmul.f32 %v7013_v52, %v5879_v28 }
 0xa5b   :  { %v5881_v23 = vadd.f32 %v7013_v52, %v5880_v13 }
 0xa5d   :  { %v5885_v30 = vsel %vm5884_vm10, %v7013_v52, %v5881_v23 }
 0xa5e   :  { %v5890_v26 = vsel %vm5887_vm11, %v5889_v63, %v5885_v30 }
 0xa5f   :  { %v5891_v38 = vmul.f32 %v5890_v26, %v5865_v36 }
 0xa61   :  { %5893 = vst.msk [vmem:[#allocation7] sm:$0x1] %vm5892_vm12, %v5891_v38 }
 0xa62   :  { %5927 = dma.vmem_to_hbm [thread:$0]  %s5923_s27, 16, %s5925_s30, [#allocation8]  }
 0xa63   :  { %5938 = dma.vmem_to_hbm [thread:$0]  %s5934_s17, 16, %s5936_s1, [#allocation8]  }
 0xa64   :  { %7136 = dma.done.wait [#allocation6], 32  }
 0xa65   :  { %7137 = vsyncadd [#allocation6], 4294967264 }
 0xa66   :  { %7138 = dma.done.wait [#allocation8], 32  }
 0xa67   :  { %7139 = vsyncadd [#allocation8], 4294967264 }
 0xa68   :  { %7140 = dma.done.wait [#allocation11], 32  }
 0xa69   :  { %7141 = vsyncadd [#allocation11], 4294967264 }
 0xa6a   :  { %5981 = vsyncpa [#allocation6], 1 }
 0xa6b   :  { %5982 = vsyncpa [#allocation8], 1 }
 0xa6c   :  { %5983 = vsyncpa [#allocation11], 1 }

</bundles_post_ra>
